<compile_context>
chip_gen: v7x
topology: tpu7x:2x2x1
jax: 0.10.0
libtpu: 0.0.40
codegen_flags: <defaults>
</compile_context>

<pallas_src>
import jax
import jax.numpy as jnp
from jax import lax
from jax.experimental import pallas as pl
from jax.experimental.pallas import tpu as pltpu

C_IN = 2                      # input channels
C_MID = 2                     # encoder conv output channels
H = W = 32
HW = H * W                    # 1024 (lane-dense: 8 x 128)
TOTAL = C_MID * HW            # 2048
REDUCTION = 4
DIM_OUT = TOTAL // REDUCTION  # 512
NEG_SLOPE = 0.3
BN_EPS = 1e-5
N_TAPS = C_IN * 3 * 3         # 18 shifted input planes

# Batch tile: a multiple of 128 fills the v5e MXU (4x128x128); prefer 256 on
# v6e/v7x (2x256x256 MXU) if the VMEM budget is raised accordingly.
DEFAULT_TILE_N = 128


def _round_up(v, m):
    return (v + m - 1) // m * m


def _csinet_encoder_kernel(taps_ref, wconv_ref, scale_ref, bias_ref, wfc_ref,
                           fcb_ref, out_ref, feat_ref):
    """taps_ref : (N_TAPS, TILE_N, HW) f32 VMEM; plane ci*9 + kh*3 + kw holds
                  xpad[n, ci, h+kh, w+kw] flattened to p = h*W + w.
       wconv_ref: (C_MID*C_IN*9,) f32 SMEM (flattened OIHW conv weights)
       scale_ref/bias_ref: (C_MID,) f32 SMEM (folded BatchNorm affine)
       wfc_ref  : (TOTAL, DIM_OUT) bf16 VMEM (fc_w.T, grid-resident)
       fcb_ref  : (1, DIM_OUT) f32 VMEM
       out_ref  : (TILE_N, DIM_OUT) f32 VMEM
       feat_ref : (TILE_N, TOTAL) bf16 VMEM scratch (flattened conv output)."""
    tile_n = out_ref.shape[0]

    # -- 3x3 conv (stride 1, pad 1, no bias) + folded BN + LeakyReLU(0.3) -----
    # Each tap is a full-vreg (TILE_N, 1024) scalar-broadcast FMA in f32.
    for co in range(C_MID):
        acc = jnp.zeros((tile_n, HW), jnp.float32)
        for ci in range(C_IN):
            for k in range(9):
                wv = wconv_ref[(co * C_IN + ci) * 9 + k]
                acc = acc + wv * taps_ref[ci * 9 + k]
        acc = acc * scale_ref[co] + bias_ref[co]
        acc = jnp.where(acc >= 0.0, acc, NEG_SLOPE * acc)
        # Write this channel's slab straight into the lane-dense FC LHS
        # (matches PyTorch's x.view(n, -1) => (c, h, w) flatten order).
        feat_ref[:, co * HW:(co + 1) * HW] = acc.astype(jnp.bfloat16)

    # -- encoder_fc: single (TILE_N, 2048) x (2048, 512) bf16 MXU dot ---------
    out = jnp.dot(feat_ref[...], wfc_ref[...],
                  preferred_element_type=jnp.float32)
    out_ref[...] = (out + fcb_ref[...]).astype(out_ref.dtype)


def csinet_encoder_forward(x, params, *, tile_n_max=DEFAULT_TILE_N):
    """x: (N, 2, 32, 32) float32 NCHW.  Returns (N, 512) float32."""
    n = x.shape[0]
    conv_w = params["conv_w"]                      # (2, 2, 3, 3) OIHW
    fc_w, fc_b = params["fc_w"], params["fc_b"]    # (512, 2048), (512,)

    # Fold BatchNorm (running stats) into a per-channel scale/bias.
    scale = params["bn_gamma"] / jnp.sqrt(params["bn_var"] + BN_EPS)
    bias = params["bn_beta"] - params["bn_mean"] * scale

    # Batch tiling: pad N so the grid divides evenly (padded rows sliced off).
    tile_n = min(tile_n_max, _round_up(n, 8))
    n_pad = _round_up(n, tile_n)
    grid = (n_pad // tile_n,)

    # ---- layout plumbing (no arithmetic hoisted out of the kernel) ----------
    # Lane-dense shifted stack of the zero-padded input: one (N, 1024) plane
    # per (ci, kh, kw), so every in-kernel conv tap is a full-vreg FMA.
    xb = jnp.pad(x.astype(jnp.float32),
                 ((0, n_pad - n), (0, 0), (0, 0), (0, 0)))
    xsp = jnp.pad(xb, ((0, 0), (0, 0), (1, 1), (1, 1)))
    taps = jnp.stack(
        [xsp[:, ci, kh:kh + H, kw:kw + W].reshape(n_pad, HW)
         for ci in range(C_IN) for kh in range(3) for kw in range(3)],
        axis=0)                                          # (18, N_pad, 1024) f32
    wconv_flat = conv_w.reshape(-1).astype(jnp.float32)  # (36,)
    # wfc[c*HW + h*W + w, d] == fc_w[d, c*HW + h*W + w]; bf16 halves the weight
    # footprint/traffic and runs the MXU at full bf16 rate (f32 accumulate).
    wfc = fc_w.T.astype(jnp.bfloat16)                    # (2048, 512)
    fcb = fc_b.reshape(1, DIM_OUT).astype(jnp.float32)

    cost = pl.CostEstimate(
        flops=2 * n_pad * (TOTAL * DIM_OUT + C_MID * C_IN * 9 * HW),
        transcendentals=0,
        bytes_accessed=(N_TAPS * n_pad * HW * 4      # shifted-stack input
                        + TOTAL * DIM_OUT * 2        # bf16 FC weight
                        + n_pad * DIM_OUT * 4        # output
                        + DIM_OUT * 4                # fc bias
                        + (C_MID * C_IN * 9 + 2 * C_MID) * 4),
    )

    out = pl.pallas_call(
        _csinet_encoder_kernel,
        out_shape=jax.ShapeDtypeStruct((n_pad, DIM_OUT), jnp.float32),
        grid=grid,
        in_specs=[
            # New batch tile of shifted-stack planes each step (pipelined DMA).
            pl.BlockSpec((N_TAPS, tile_n, HW), lambda i: (0, i, 0)),
            pl.BlockSpec(memory_space=pltpu.MemorySpace.SMEM),   # conv weights
            pl.BlockSpec(memory_space=pltpu.MemorySpace.SMEM),   # bn scale
            pl.BlockSpec(memory_space=pltpu.MemorySpace.SMEM),   # bn bias
            # FC weight: constant block index -> VMEM-resident, DMA'd once.
            pl.BlockSpec((TOTAL, DIM_OUT), lambda i: (0, 0)),
            pl.BlockSpec((1, DIM_OUT), lambda i: (0, 0)),        # fc bias
        ],
        out_specs=pl.BlockSpec((tile_n, DIM_OUT), lambda i: (i, 0)),
        scratch_shapes=[pltpu.VMEM((tile_n, TOTAL), jnp.bfloat16)],
        compiler_params=pltpu.CompilerParams(
            dimension_semantics=("parallel",),   # v7x: both TCs split the batch
            vmem_limit_bytes=48 * 1024 * 1024,
        ),
        cost_estimate=cost,
    )(taps, wconv_flat, scale, bias, wfc, fcb)
    return out[:n]


def reference_forward(x, params, *, fc_operands_bf16=False):
    """Pure-JAX reference of the PyTorch encoder forward (eval-mode BN).

    fc_operands_bf16=True rounds the Linear operands to bf16 exactly like the
    kernel (f32 accumulation), isolating implementation error from the
    expected bf16 rounding of the optimized FC path."""
    conv_w = params["conv_w"]
    scale = params["bn_gamma"] / jnp.sqrt(params["bn_var"] + BN_EPS)
    bias = params["bn_beta"] - params["bn_mean"] * scale
    y = lax.conv_general_dilated(x, conv_w, (1, 1), "SAME",
                                 dimension_numbers=("NCHW", "OIHW", "NCHW"),
                                 precision=lax.Precision.HIGHEST)
    y = y * scale[None, :, None, None] + bias[None, :, None, None]
    y = jnp.where(y >= 0.0, y, NEG_SLOPE * y)
    flat = y.reshape(x.shape[0], -1)
    wt = params["fc_w"].T
    if fc_operands_bf16:
        out = jnp.dot(flat.astype(jnp.bfloat16), wt.astype(jnp.bfloat16),
                      preferred_element_type=jnp.float32)
    else:
        out = jnp.dot(flat, wt, precision=lax.Precision.HIGHEST)
    return out + params["fc_b"]


def make_params(key):
    ks = jax.random.split(key, 6)
    conv_w = 0.1 * jax.random.normal(ks[0], (C_MID, C_IN, 3, 3), jnp.float32)
    bn_gamma = 1.0 + 0.1 * jax.random.normal(ks[1], (C_MID,), jnp.float32)
    bn_beta = 0.1 * jax.random.normal(ks[2], (C_MID,), jnp.float32)
    bn_mean = 0.1 * jax.random.normal(ks[3], (C_MID,), jnp.float32)
    bn_var = jax.random.uniform(ks[4], (C_MID,), jnp.float32, 0.5, 1.5)
    fc_w = 0.02 * jax.random.normal(ks[5], (DIM_OUT, TOTAL), jnp.float32)
    fc_b = 0.01 * jnp.arange(DIM_OUT, dtype=jnp.float32) / DIM_OUT
    return dict(conv_w=conv_w, bn_gamma=bn_gamma, bn_beta=bn_beta,
                bn_mean=bn_mean, bn_var=bn_var, fc_w=fc_w, fc_b=fc_b)


if __name__ == "__main__":
    key = jax.random.PRNGKey(0)
    k_x, k_p = jax.random.split(key)
    n = 2
    x = jax.random.normal(k_x, (n, C_IN, H, W), jnp.float32)
    params = make_params(k_p)

    out = csinet_encoder_forward(x, params)
    out = jax.block_until_ready(out)
    assert out.shape == (n, DIM_OUT), out.shape

    # Implementation check: reference with the same bf16 operand rounding as
    # the kernel's FC dot (f32 accumulate) -> only order-of-accumulation diffs.
    ref_bf16 = jax.block_until_ready(
        reference_forward(x, params, fc_operands_bf16=True))
    err_impl = float(jnp.max(jnp.abs(out - ref_bf16)))
    assert jnp.allclose(out, ref_bf16, atol=1e-3, rtol=1e-3), err_impl

    # Numerics check vs the full-f32 (PyTorch-semantics) reference: bf16 FC
    # operands (unit roundoff 2^-8) over K=2048 give an expected max |err| of
    # a few 1e-3 at these weight scales, hence the looser tolerance.
    ref_f32 = jax.block_until_ready(reference_forward(x, params))
    err_f32 = float(jnp.max(jnp.abs(out - ref_f32)))
    assert jnp.allclose(out, ref_f32, atol=1e-2, rtol=1e-2), err_f32

    print("KERNEL_OK")
</pallas_src>

<mosaic_0001>
module attributes {stable_mosaic.version = 11 : i64} {
  func.func @_csinet_encoder_kernel(%arg0: i32, %arg1: memref<18x8x1024xf32, #tpu.memory_space<vmem>>, %arg2: memref<36xf32, #tpu.memory_space<smem>>, %arg3: memref<2xf32, #tpu.memory_space<smem>>, %arg4: memref<2xf32, #tpu.memory_space<smem>>, %arg5: memref<2048x512xbf16, #tpu.memory_space<vmem>>, %arg6: memref<1x512xf32, #tpu.memory_space<vmem>>, %arg7: memref<8x512xf32, #tpu.memory_space<vmem>>, %arg8: memref<8x2048xbf16, #tpu.memory_space<vmem>>) attributes {dimension_semantics = [#tpu.dimension_semantics<parallel>], iteration_bounds = array<i64: 1>, scalar_prefetch = 0 : i64, scratch_operands = 1 : i64, tpu.core_type = #tpu.core_type<tc>, window_params = [{transform_indices = @transform_0, window_bounds = array<i64: 18, 8, 1024>}, {transform_indices = @transform_1, window_bounds = array<i64: 36>}, {transform_indices = @transform_2, window_bounds = array<i64: 2>}, {transform_indices = @transform_3, window_bounds = array<i64: 2>}, {pipeline_mode = #tpu.pipeline_mode<synchronous>, transform_indices = @transform_4, window_bounds = array<i64: 2048, 512>}, {pipeline_mode = #tpu.pipeline_mode<synchronous>, transform_indices = @transform_5, window_bounds = array<i64: 1, 512>}, {transform_indices = @transform_6, window_bounds = array<i64: 8, 512>}]} {
    %cst = arith.constant 0.000000e+00 : f32
    %0 = vector.broadcast %cst : f32 to vector<8x1024xf32>
    %c0 = arith.constant 0 : index
    %1 = memref.load %arg2[%c0] : memref<36xf32, #tpu.memory_space<smem>>
    %c0_0 = arith.constant 0 : index
    %c0_1 = arith.constant 0 : index
    %c0_2 = arith.constant 0 : index
    %2 = vector.load %arg1[%c0_0, %c0_1, %c0_2] : memref<18x8x1024xf32, #tpu.memory_space<vmem>>, vector<1x8x1024xf32>
    %3 = vector.shape_cast %2 : vector<1x8x1024xf32> to vector<8x1024xf32>
    %4 = vector.broadcast %1 : f32 to vector<8x1024xf32>
    %5 = arith.mulf %4, %3 : vector<8x1024xf32>
    %6 = arith.addf %0, %5 : vector<8x1024xf32>
    %c1 = arith.constant 1 : index
    %7 = memref.load %arg2[%c1] : memref<36xf32, #tpu.memory_space<smem>>
    %c1_3 = arith.constant 1 : index
    %c0_4 = arith.constant 0 : index
    %c0_5 = arith.constant 0 : index
    %8 = vector.load %arg1[%c1_3, %c0_4, %c0_5] : memref<18x8x1024xf32, #tpu.memory_space<vmem>>, vector<1x8x1024xf32>
    %9 = vector.shape_cast %8 : vector<1x8x1024xf32> to vector<8x1024xf32>
    %10 = vector.broadcast %7 : f32 to vector<8x1024xf32>
    %11 = arith.mulf %10, %9 : vector<8x1024xf32>
    %12 = arith.addf %6, %11 : vector<8x1024xf32>
    %c2 = arith.constant 2 : index
    %13 = memref.load %arg2[%c2] : memref<36xf32, #tpu.memory_space<smem>>
    %c2_6 = arith.constant 2 : index
    %c0_7 = arith.constant 0 : index
    %c0_8 = arith.constant 0 : index
    %14 = vector.load %arg1[%c2_6, %c0_7, %c0_8] : memref<18x8x1024xf32, #tpu.memory_space<vmem>>, vector<1x8x1024xf32>
    %15 = vector.shape_cast %14 : vector<1x8x1024xf32> to vector<8x1024xf32>
    %16 = vector.broadcast %13 : f32 to vector<8x1024xf32>
    %17 = arith.mulf %16, %15 : vector<8x1024xf32>
    %18 = arith.addf %12, %17 : vector<8x1024xf32>
    %c3 = arith.constant 3 : index
    %19 = memref.load %arg2[%c3] : memref<36xf32, #tpu.memory_space<smem>>
    %c3_9 = arith.constant 3 : index
    %c0_10 = arith.constant 0 : index
    %c0_11 = arith.constant 0 : index
    %20 = vector.load %arg1[%c3_9, %c0_10, %c0_11] : memref<18x8x1024xf32, #tpu.memory_space<vmem>>, vector<1x8x1024xf32>
    %21 = vector.shape_cast %20 : vector<1x8x1024xf32> to vector<8x1024xf32>
    %22 = vector.broadcast %19 : f32 to vector<8x1024xf32>
    %23 = arith.mulf %22, %21 : vector<8x1024xf32>
    %24 = arith.addf %18, %23 : vector<8x1024xf32>
    %c4 = arith.constant 4 : index
    %25 = memref.load %arg2[%c4] : memref<36xf32, #tpu.memory_space<smem>>
    %c4_12 = arith.constant 4 : index
    %c0_13 = arith.constant 0 : index
    %c0_14 = arith.constant 0 : index
    %26 = vector.load %arg1[%c4_12, %c0_13, %c0_14] : memref<18x8x1024xf32, #tpu.memory_space<vmem>>, vector<1x8x1024xf32>
    %27 = vector.shape_cast %26 : vector<1x8x1024xf32> to vector<8x1024xf32>
    %28 = vector.broadcast %25 : f32 to vector<8x1024xf32>
    %29 = arith.mulf %28, %27 : vector<8x1024xf32>
    %30 = arith.addf %24, %29 : vector<8x1024xf32>
    %c5 = arith.constant 5 : index
    %31 = memref.load %arg2[%c5] : memref<36xf32, #tpu.memory_space<smem>>
    %c5_15 = arith.constant 5 : index
    %c0_16 = arith.constant 0 : index
    %c0_17 = arith.constant 0 : index
    %32 = vector.load %arg1[%c5_15, %c0_16, %c0_17] : memref<18x8x1024xf32, #tpu.memory_space<vmem>>, vector<1x8x1024xf32>
    %33 = vector.shape_cast %32 : vector<1x8x1024xf32> to vector<8x1024xf32>
    %34 = vector.broadcast %31 : f32 to vector<8x1024xf32>
    %35 = arith.mulf %34, %33 : vector<8x1024xf32>
    %36 = arith.addf %30, %35 : vector<8x1024xf32>
    %c6 = arith.constant 6 : index
    %37 = memref.load %arg2[%c6] : memref<36xf32, #tpu.memory_space<smem>>
    %c6_18 = arith.constant 6 : index
    %c0_19 = arith.constant 0 : index
    %c0_20 = arith.constant 0 : index
    %38 = vector.load %arg1[%c6_18, %c0_19, %c0_20] : memref<18x8x1024xf32, #tpu.memory_space<vmem>>, vector<1x8x1024xf32>
    %39 = vector.shape_cast %38 : vector<1x8x1024xf32> to vector<8x1024xf32>
    %40 = vector.broadcast %37 : f32 to vector<8x1024xf32>
    %41 = arith.mulf %40, %39 : vector<8x1024xf32>
    %42 = arith.addf %36, %41 : vector<8x1024xf32>
    %c7 = arith.constant 7 : index
    %43 = memref.load %arg2[%c7] : memref<36xf32, #tpu.memory_space<smem>>
    %c7_21 = arith.constant 7 : index
    %c0_22 = arith.constant 0 : index
    %c0_23 = arith.constant 0 : index
    %44 = vector.load %arg1[%c7_21, %c0_22, %c0_23] : memref<18x8x1024xf32, #tpu.memory_space<vmem>>, vector<1x8x1024xf32>
    %45 = vector.shape_cast %44 : vector<1x8x1024xf32> to vector<8x1024xf32>
    %46 = vector.broadcast %43 : f32 to vector<8x1024xf32>
    %47 = arith.mulf %46, %45 : vector<8x1024xf32>
    %48 = arith.addf %42, %47 : vector<8x1024xf32>
    %c8 = arith.constant 8 : index
    %49 = memref.load %arg2[%c8] : memref<36xf32, #tpu.memory_space<smem>>
    %c8_24 = arith.constant 8 : index
    %c0_25 = arith.constant 0 : index
    %c0_26 = arith.constant 0 : index
    %50 = vector.load %arg1[%c8_24, %c0_25, %c0_26] : memref<18x8x1024xf32, #tpu.memory_space<vmem>>, vector<1x8x1024xf32>
    %51 = vector.shape_cast %50 : vector<1x8x1024xf32> to vector<8x1024xf32>
    %52 = vector.broadcast %49 : f32 to vector<8x1024xf32>
    %53 = arith.mulf %52, %51 : vector<8x1024xf32>
    %54 = arith.addf %48, %53 : vector<8x1024xf32>
    %c9 = arith.constant 9 : index
    %55 = memref.load %arg2[%c9] : memref<36xf32, #tpu.memory_space<smem>>
    %c9_27 = arith.constant 9 : index
    %c0_28 = arith.constant 0 : index
    %c0_29 = arith.constant 0 : index
    %56 = vector.load %arg1[%c9_27, %c0_28, %c0_29] : memref<18x8x1024xf32, #tpu.memory_space<vmem>>, vector<1x8x1024xf32>
    %57 = vector.shape_cast %56 : vector<1x8x1024xf32> to vector<8x1024xf32>
    %58 = vector.broadcast %55 : f32 to vector<8x1024xf32>
    %59 = arith.mulf %58, %57 : vector<8x1024xf32>
    %60 = arith.addf %54, %59 : vector<8x1024xf32>
    %c10 = arith.constant 10 : index
    %61 = memref.load %arg2[%c10] : memref<36xf32, #tpu.memory_space<smem>>
    %c10_30 = arith.constant 10 : index
    %c0_31 = arith.constant 0 : index
    %c0_32 = arith.constant 0 : index
    %62 = vector.load %arg1[%c10_30, %c0_31, %c0_32] : memref<18x8x1024xf32, #tpu.memory_space<vmem>>, vector<1x8x1024xf32>
    %63 = vector.shape_cast %62 : vector<1x8x1024xf32> to vector<8x1024xf32>
    %64 = vector.broadcast %61 : f32 to vector<8x1024xf32>
    %65 = arith.mulf %64, %63 : vector<8x1024xf32>
    %66 = arith.addf %60, %65 : vector<8x1024xf32>
    %c11 = arith.constant 11 : index
    %67 = memref.load %arg2[%c11] : memref<36xf32, #tpu.memory_space<smem>>
    %c11_33 = arith.constant 11 : index
    %c0_34 = arith.constant 0 : index
    %c0_35 = arith.constant 0 : index
    %68 = vector.load %arg1[%c11_33, %c0_34, %c0_35] : memref<18x8x1024xf32, #tpu.memory_space<vmem>>, vector<1x8x1024xf32>
    %69 = vector.shape_cast %68 : vector<1x8x1024xf32> to vector<8x1024xf32>
    %70 = vector.broadcast %67 : f32 to vector<8x1024xf32>
    %71 = arith.mulf %70, %69 : vector<8x1024xf32>
    %72 = arith.addf %66, %71 : vector<8x1024xf32>
    %c12 = arith.constant 12 : index
    %73 = memref.load %arg2[%c12] : memref<36xf32, #tpu.memory_space<smem>>
    %c12_36 = arith.constant 12 : index
    %c0_37 = arith.constant 0 : index
    %c0_38 = arith.constant 0 : index
    %74 = vector.load %arg1[%c12_36, %c0_37, %c0_38] : memref<18x8x1024xf32, #tpu.memory_space<vmem>>, vector<1x8x1024xf32>
    %75 = vector.shape_cast %74 : vector<1x8x1024xf32> to vector<8x1024xf32>
    %76 = vector.broadcast %73 : f32 to vector<8x1024xf32>
    %77 = arith.mulf %76, %75 : vector<8x1024xf32>
    %78 = arith.addf %72, %77 : vector<8x1024xf32>
    %c13 = arith.constant 13 : index
    %79 = memref.load %arg2[%c13] : memref<36xf32, #tpu.memory_space<smem>>
    %c13_39 = arith.constant 13 : index
    %c0_40 = arith.constant 0 : index
    %c0_41 = arith.constant 0 : index
    %80 = vector.load %arg1[%c13_39, %c0_40, %c0_41] : memref<18x8x1024xf32, #tpu.memory_space<vmem>>, vector<1x8x1024xf32>
    %81 = vector.shape_cast %80 : vector<1x8x1024xf32> to vector<8x1024xf32>
    %82 = vector.broadcast %79 : f32 to vector<8x1024xf32>
    %83 = arith.mulf %82, %81 : vector<8x1024xf32>
    %84 = arith.addf %78, %83 : vector<8x1024xf32>
    %c14 = arith.constant 14 : index
    %85 = memref.load %arg2[%c14] : memref<36xf32, #tpu.memory_space<smem>>
    %c14_42 = arith.constant 14 : index
    %c0_43 = arith.constant 0 : index
    %c0_44 = arith.constant 0 : index
    %86 = vector.load %arg1[%c14_42, %c0_43, %c0_44] : memref<18x8x1024xf32, #tpu.memory_space<vmem>>, vector<1x8x1024xf32>
    %87 = vector.shape_cast %86 : vector<1x8x1024xf32> to vector<8x1024xf32>
    %88 = vector.broadcast %85 : f32 to vector<8x1024xf32>
    %89 = arith.mulf %88, %87 : vector<8x1024xf32>
    %90 = arith.addf %84, %89 : vector<8x1024xf32>
    %c15 = arith.constant 15 : index
    %91 = memref.load %arg2[%c15] : memref<36xf32, #tpu.memory_space<smem>>
    %c15_45 = arith.constant 15 : index
    %c0_46 = arith.constant 0 : index
    %c0_47 = arith.constant 0 : index
    %92 = vector.load %arg1[%c15_45, %c0_46, %c0_47] : memref<18x8x1024xf32, #tpu.memory_space<vmem>>, vector<1x8x1024xf32>
    %93 = vector.shape_cast %92 : vector<1x8x1024xf32> to vector<8x1024xf32>
    %94 = vector.broadcast %91 : f32 to vector<8x1024xf32>
    %95 = arith.mulf %94, %93 : vector<8x1024xf32>
    %96 = arith.addf %90, %95 : vector<8x1024xf32>
    %c16 = arith.constant 16 : index
    %97 = memref.load %arg2[%c16] : memref<36xf32, #tpu.memory_space<smem>>
    %c16_48 = arith.constant 16 : index
    %c0_49 = arith.constant 0 : index
    %c0_50 = arith.constant 0 : index
    %98 = vector.load %arg1[%c16_48, %c0_49, %c0_50] : memref<18x8x1024xf32, #tpu.memory_space<vmem>>, vector<1x8x1024xf32>
    %99 = vector.shape_cast %98 : vector<1x8x1024xf32> to vector<8x1024xf32>
    %100 = vector.broadcast %97 : f32 to vector<8x1024xf32>
    %101 = arith.mulf %100, %99 : vector<8x1024xf32>
    %102 = arith.addf %96, %101 : vector<8x1024xf32>
    %c17 = arith.constant 17 : index
    %103 = memref.load %arg2[%c17] : memref<36xf32, #tpu.memory_space<smem>>
    %c17_51 = arith.constant 17 : index
    %c0_52 = arith.constant 0 : index
    %c0_53 = arith.constant 0 : index
    %104 = vector.load %arg1[%c17_51, %c0_52, %c0_53] : memref<18x8x1024xf32, #tpu.memory_space<vmem>>, vector<1x8x1024xf32>
    %105 = vector.shape_cast %104 : vector<1x8x1024xf32> to vector<8x1024xf32>
    %106 = vector.broadcast %103 : f32 to vector<8x1024xf32>
    %107 = arith.mulf %106, %105 : vector<8x1024xf32>
    %108 = arith.addf %102, %107 : vector<8x1024xf32>
    %c0_54 = arith.constant 0 : index
    %109 = memref.load %arg3[%c0_54] : memref<2xf32, #tpu.memory_space<smem>>
    %110 = vector.broadcast %109 : f32 to vector<8x1024xf32>
    %111 = arith.mulf %108, %110 : vector<8x1024xf32>
    %c0_55 = arith.constant 0 : index
    %112 = memref.load %arg4[%c0_55] : memref<2xf32, #tpu.memory_space<smem>>
    %113 = vector.broadcast %112 : f32 to vector<8x1024xf32>
    %114 = arith.addf %111, %113 : vector<8x1024xf32>
    %cst_56 = arith.constant 0.000000e+00 : f32
    %115 = vector.broadcast %cst_56 : f32 to vector<8x1024xf32>
    %116 = arith.cmpf oge, %114, %115 : vector<8x1024xf32>
    %cst_57 = arith.constant 3.000000e-01 : f32
    %117 = vector.broadcast %cst_57 : f32 to vector<8x1024xf32>
    %118 = arith.mulf %117, %114 : vector<8x1024xf32>
    %119 = arith.select %116, %114, %118 : vector<8x1024xi1>, vector<8x1024xf32>
    %120 = arith.truncf %119 : vector<8x1024xf32> to vector<8x1024xbf16>
    %c0_58 = arith.constant 0 : index
    %c0_59 = arith.constant 0 : index
    %121 = vector.load %arg8[%c0_58, %c0_59] : memref<8x2048xbf16, #tpu.memory_space<vmem>>, vector<8x1024xbf16>
    tpu.vector_store %arg8[%c0_58, %c0_59], %120 {strides = array<i32>} : memref<8x2048xbf16, #tpu.memory_space<vmem>>, vector<8x1024xbf16>,
    %cst_60 = arith.constant 0.000000e+00 : f32
    %122 = vector.broadcast %cst_60 : f32 to vector<8x1024xf32>
    %c18 = arith.constant 18 : index
    %123 = memref.load %arg2[%c18] : memref<36xf32, #tpu.memory_space<smem>>
    %c0_61 = arith.constant 0 : index
    %c0_62 = arith.constant 0 : index
    %c0_63 = arith.constant 0 : index
    %124 = vector.load %arg1[%c0_61, %c0_62, %c0_63] : memref<18x8x1024xf32, #tpu.memory_space<vmem>>, vector<1x8x1024xf32>
    %125 = vector.shape_cast %124 : vector<1x8x1024xf32> to vector<8x1024xf32>
    %126 = vector.broadcast %123 : f32 to vector<8x1024xf32>
    %127 = arith.mulf %126, %125 : vector<8x1024xf32>
    %128 = arith.addf %122, %127 : vector<8x1024xf32>
    %c19 = arith.constant 19 : index
    %129 = memref.load %arg2[%c19] : memref<36xf32, #tpu.memory_space<smem>>
    %c1_64 = arith.constant 1 : index
    %c0_65 = arith.constant 0 : index
    %c0_66 = arith.constant 0 : index
    %130 = vector.load %arg1[%c1_64, %c0_65, %c0_66] : memref<18x8x1024xf32, #tpu.memory_space<vmem>>, vector<1x8x1024xf32>
    %131 = vector.shape_cast %130 : vector<1x8x1024xf32> to vector<8x1024xf32>
    %132 = vector.broadcast %129 : f32 to vector<8x1024xf32>
    %133 = arith.mulf %132, %131 : vector<8x1024xf32>
    %134 = arith.addf %128, %133 : vector<8x1024xf32>
    %c20 = arith.constant 20 : index
    %135 = memref.load %arg2[%c20] : memref<36xf32, #tpu.memory_space<smem>>
    %c2_67 = arith.constant 2 : index
    %c0_68 = arith.constant 0 : index
    %c0_69 = arith.constant 0 : index
    %136 = vector.load %arg1[%c2_67, %c0_68, %c0_69] : memref<18x8x1024xf32, #tpu.memory_space<vmem>>, vector<1x8x1024xf32>
    %137 = vector.shape_cast %136 : vector<1x8x1024xf32> to vector<8x1024xf32>
    %138 = vector.broadcast %135 : f32 to vector<8x1024xf32>
    %139 = arith.mulf %138, %137 : vector<8x1024xf32>
    %140 = arith.addf %134, %139 : vector<8x1024xf32>
    %c21 = arith.constant 21 : index
    %141 = memref.load %arg2[%c21] : memref<36xf32, #tpu.memory_space<smem>>
    %c3_70 = arith.constant 3 : index
    %c0_71 = arith.constant 0 : index
    %c0_72 = arith.constant 0 : index
    %142 = vector.load %arg1[%c3_70, %c0_71, %c0_72] : memref<18x8x1024xf32, #tpu.memory_space<vmem>>, vector<1x8x1024xf32>
    %143 = vector.shape_cast %142 : vector<1x8x1024xf32> to vector<8x1024xf32>
    %144 = vector.broadcast %141 : f32 to vector<8x1024xf32>
    %145 = arith.mulf %144, %143 : vector<8x1024xf32>
    %146 = arith.addf %140, %145 : vector<8x1024xf32>
    %c22 = arith.constant 22 : index
    %147 = memref.load %arg2[%c22] : memref<36xf32, #tpu.memory_space<smem>>
    %c4_73 = arith.constant 4 : index
    %c0_74 = arith.constant 0 : index
    %c0_75 = arith.constant 0 : index
    %148 = vector.load %arg1[%c4_73, %c0_74, %c0_75] : memref<18x8x1024xf32, #tpu.memory_space<vmem>>, vector<1x8x1024xf32>
    %149 = vector.shape_cast %148 : vector<1x8x1024xf32> to vector<8x1024xf32>
    %150 = vector.broadcast %147 : f32 to vector<8x1024xf32>
    %151 = arith.mulf %150, %149 : vector<8x1024xf32>
    %152 = arith.addf %146, %151 : vector<8x1024xf32>
    %c23 = arith.constant 23 : index
    %153 = memref.load %arg2[%c23] : memref<36xf32, #tpu.memory_space<smem>>
    %c5_76 = arith.constant 5 : index
    %c0_77 = arith.constant 0 : index
    %c0_78 = arith.constant 0 : index
    %154 = vector.load %arg1[%c5_76, %c0_77, %c0_78] : memref<18x8x1024xf32, #tpu.memory_space<vmem>>, vector<1x8x1024xf32>
    %155 = vector.shape_cast %154 : vector<1x8x1024xf32> to vector<8x1024xf32>
    %156 = vector.broadcast %153 : f32 to vector<8x1024xf32>
    %157 = arith.mulf %156, %155 : vector<8x1024xf32>
    %158 = arith.addf %152, %157 : vector<8x1024xf32>
    %c24 = arith.constant 24 : index
    %159 = memref.load %arg2[%c24] : memref<36xf32, #tpu.memory_space<smem>>
    %c6_79 = arith.constant 6 : index
    %c0_80 = arith.constant 0 : index
    %c0_81 = arith.constant 0 : index
    %160 = vector.load %arg1[%c6_79, %c0_80, %c0_81] : memref<18x8x1024xf32, #tpu.memory_space<vmem>>, vector<1x8x1024xf32>
    %161 = vector.shape_cast %160 : vector<1x8x1024xf32> to vector<8x1024xf32>
    %162 = vector.broadcast %159 : f32 to vector<8x1024xf32>
    %163 = arith.mulf %162, %161 : vector<8x1024xf32>
    %164 = arith.addf %158, %163 : vector<8x1024xf32>
    %c25 = arith.constant 25 : index
    %165 = memref.load %arg2[%c25] : memref<36xf32, #tpu.memory_space<smem>>
    %c7_82 = arith.constant 7 : index
    %c0_83 = arith.constant 0 : index
    %c0_84 = arith.constant 0 : index
    %166 = vector.load %arg1[%c7_82, %c0_83, %c0_84] : memref<18x8x1024xf32, #tpu.memory_space<vmem>>, vector<1x8x1024xf32>
    %167 = vector.shape_cast %166 : vector<1x8x1024xf32> to vector<8x1024xf32>
    %168 = vector.broadcast %165 : f32 to vector<8x1024xf32>
    %169 = arith.mulf %168, %167 : vector<8x1024xf32>
    %170 = arith.addf %164, %169 : vector<8x1024xf32>
    %c26 = arith.constant 26 : index
    %171 = memref.load %arg2[%c26] : memref<36xf32, #tpu.memory_space<smem>>
    %c8_85 = arith.constant 8 : index
    %c0_86 = arith.constant 0 : index
    %c0_87 = arith.constant 0 : index
    %172 = vector.load %arg1[%c8_85, %c0_86, %c0_87] : memref<18x8x1024xf32, #tpu.memory_space<vmem>>, vector<1x8x1024xf32>
    %173 = vector.shape_cast %172 : vector<1x8x1024xf32> to vector<8x1024xf32>
    %174 = vector.broadcast %171 : f32 to vector<8x1024xf32>
    %175 = arith.mulf %174, %173 : vector<8x1024xf32>
    %176 = arith.addf %170, %175 : vector<8x1024xf32>
    %c27 = arith.constant 27 : index
    %177 = memref.load %arg2[%c27] : memref<36xf32, #tpu.memory_space<smem>>
    %c9_88 = arith.constant 9 : index
    %c0_89 = arith.constant 0 : index
    %c0_90 = arith.constant 0 : index
    %178 = vector.load %arg1[%c9_88, %c0_89, %c0_90] : memref<18x8x1024xf32, #tpu.memory_space<vmem>>, vector<1x8x1024xf32>
    %179 = vector.shape_cast %178 : vector<1x8x1024xf32> to vector<8x1024xf32>
    %180 = vector.broadcast %177 : f32 to vector<8x1024xf32>
    %181 = arith.mulf %180, %179 : vector<8x1024xf32>
    %182 = arith.addf %176, %181 : vector<8x1024xf32>
    %c28 = arith.constant 28 : index
    %183 = memref.load %arg2[%c28] : memref<36xf32, #tpu.memory_space<smem>>
    %c10_91 = arith.constant 10 : index
    %c0_92 = arith.constant 0 : index
    %c0_93 = arith.constant 0 : index
    %184 = vector.load %arg1[%c10_91, %c0_92, %c0_93] : memref<18x8x1024xf32, #tpu.memory_space<vmem>>, vector<1x8x1024xf32>
    %185 = vector.shape_cast %184 : vector<1x8x1024xf32> to vector<8x1024xf32>
    %186 = vector.broadcast %183 : f32 to vector<8x1024xf32>
    %187 = arith.mulf %186, %185 : vector<8x1024xf32>
    %188 = arith.addf %182, %187 : vector<8x1024xf32>
    %c29 = arith.constant 29 : index
    %189 = memref.load %arg2[%c29] : memref<36xf32, #tpu.memory_space<smem>>
    %c11_94 = arith.constant 11 : index
    %c0_95 = arith.constant 0 : index
    %c0_96 = arith.constant 0 : index
    %190 = vector.load %arg1[%c11_94, %c0_95, %c0_96] : memref<18x8x1024xf32, #tpu.memory_space<vmem>>, vector<1x8x1024xf32>
    %191 = vector.shape_cast %190 : vector<1x8x1024xf32> to vector<8x1024xf32>
    %192 = vector.broadcast %189 : f32 to vector<8x1024xf32>
    %193 = arith.mulf %192, %191 : vector<8x1024xf32>
    %194 = arith.addf %188, %193 : vector<8x1024xf32>
    %c30 = arith.constant 30 : index
    %195 = memref.load %arg2[%c30] : memref<36xf32, #tpu.memory_space<smem>>
    %c12_97 = arith.constant 12 : index
    %c0_98 = arith.constant 0 : index
    %c0_99 = arith.constant 0 : index
    %196 = vector.load %arg1[%c12_97, %c0_98, %c0_99] : memref<18x8x1024xf32, #tpu.memory_space<vmem>>, vector<1x8x1024xf32>
    %197 = vector.shape_cast %196 : vector<1x8x1024xf32> to vector<8x1024xf32>
    %198 = vector.broadcast %195 : f32 to vector<8x1024xf32>
    %199 = arith.mulf %198, %197 : vector<8x1024xf32>
    %200 = arith.addf %194, %199 : vector<8x1024xf32>
    %c31 = arith.constant 31 : index
    %201 = memref.load %arg2[%c31] : memref<36xf32, #tpu.memory_space<smem>>
    %c13_100 = arith.constant 13 : index
    %c0_101 = arith.constant 0 : index
    %c0_102 = arith.constant 0 : index
    %202 = vector.load %arg1[%c13_100, %c0_101, %c0_102] : memref<18x8x1024xf32, #tpu.memory_space<vmem>>, vector<1x8x1024xf32>
    %203 = vector.shape_cast %202 : vector<1x8x1024xf32> to vector<8x1024xf32>
    %204 = vector.broadcast %201 : f32 to vector<8x1024xf32>
    %205 = arith.mulf %204, %203 : vector<8x1024xf32>
    %206 = arith.addf %200, %205 : vector<8x1024xf32>
    %c32 = arith.constant 32 : index
    %207 = memref.load %arg2[%c32] : memref<36xf32, #tpu.memory_space<smem>>
    %c14_103 = arith.constant 14 : index
    %c0_104 = arith.constant 0 : index
    %c0_105 = arith.constant 0 : index
    %208 = vector.load %arg1[%c14_103, %c0_104, %c0_105] : memref<18x8x1024xf32, #tpu.memory_space<vmem>>, vector<1x8x1024xf32>
    %209 = vector.shape_cast %208 : vector<1x8x1024xf32> to vector<8x1024xf32>
    %210 = vector.broadcast %207 : f32 to vector<8x1024xf32>
    %211 = arith.mulf %210, %209 : vector<8x1024xf32>
    %212 = arith.addf %206, %211 : vector<8x1024xf32>
    %c33 = arith.constant 33 : index
    %213 = memref.load %arg2[%c33] : memref<36xf32, #tpu.memory_space<smem>>
    %c15_106 = arith.constant 15 : index
    %c0_107 = arith.constant 0 : index
    %c0_108 = arith.constant 0 : index
    %214 = vector.load %arg1[%c15_106, %c0_107, %c0_108] : memref<18x8x1024xf32, #tpu.memory_space<vmem>>, vector<1x8x1024xf32>
    %215 = vector.shape_cast %214 : vector<1x8x1024xf32> to vector<8x1024xf32>
    %216 = vector.broadcast %213 : f32 to vector<8x1024xf32>
    %217 = arith.mulf %216, %215 : vector<8x1024xf32>
    %218 = arith.addf %212, %217 : vector<8x1024xf32>
    %c34 = arith.constant 34 : index
    %219 = memref.load %arg2[%c34] : memref<36xf32, #tpu.memory_space<smem>>
    %c16_109 = arith.constant 16 : index
    %c0_110 = arith.constant 0 : index
    %c0_111 = arith.constant 0 : index
    %220 = vector.load %arg1[%c16_109, %c0_110, %c0_111] : memref<18x8x1024xf32, #tpu.memory_space<vmem>>, vector<1x8x1024xf32>
    %221 = vector.shape_cast %220 : vector<1x8x1024xf32> to vector<8x1024xf32>
    %222 = vector.broadcast %219 : f32 to vector<8x1024xf32>
    %223 = arith.mulf %222, %221 : vector<8x1024xf32>
    %224 = arith.addf %218, %223 : vector<8x1024xf32>
    %c35 = arith.constant 35 : index
    %225 = memref.load %arg2[%c35] : memref<36xf32, #tpu.memory_space<smem>>
    %c17_112 = arith.constant 17 : index
    %c0_113 = arith.constant 0 : index
    %c0_114 = arith.constant 0 : index
    %226 = vector.load %arg1[%c17_112, %c0_113, %c0_114] : memref<18x8x1024xf32, #tpu.memory_space<vmem>>, vector<1x8x1024xf32>
    %227 = vector.shape_cast %226 : vector<1x8x1024xf32> to vector<8x1024xf32>
    %228 = vector.broadcast %225 : f32 to vector<8x1024xf32>
    %229 = arith.mulf %228, %227 : vector<8x1024xf32>
    %230 = arith.addf %224, %229 : vector<8x1024xf32>
    %c1_115 = arith.constant 1 : index
    %231 = memref.load %arg3[%c1_115] : memref<2xf32, #tpu.memory_space<smem>>
    %232 = vector.broadcast %231 : f32 to vector<8x1024xf32>
    %233 = arith.mulf %230, %232 : vector<8x1024xf32>
    %c1_116 = arith.constant 1 : index
    %234 = memref.load %arg4[%c1_116] : memref<2xf32, #tpu.memory_space<smem>>
    %235 = vector.broadcast %234 : f32 to vector<8x1024xf32>
    %236 = arith.addf %233, %235 : vector<8x1024xf32>
    %cst_117 = arith.constant 0.000000e+00 : f32
    %237 = vector.broadcast %cst_117 : f32 to vector<8x1024xf32>
    %238 = arith.cmpf oge, %236, %237 : vector<8x1024xf32>
    %cst_118 = arith.constant 3.000000e-01 : f32
    %239 = vector.broadcast %cst_118 : f32 to vector<8x1024xf32>
    %240 = arith.mulf %239, %236 : vector<8x1024xf32>
    %241 = arith.select %238, %236, %240 : vector<8x1024xi1>, vector<8x1024xf32>
    %242 = arith.truncf %241 : vector<8x1024xf32> to vector<8x1024xbf16>
    %c0_119 = arith.constant 0 : index
    %c1024 = arith.constant 1024 : index
    %243 = vector.load %arg8[%c0_119, %c1024] : memref<8x2048xbf16, #tpu.memory_space<vmem>>, vector<8x1024xbf16>
    tpu.vector_store %arg8[%c0_119, %c1024], %242 {strides = array<i32>} : memref<8x2048xbf16, #tpu.memory_space<vmem>>, vector<8x1024xbf16>,
    %c0_120 = arith.constant 0 : index
    %c0_121 = arith.constant 0 : index
    %244 = vector.load %arg8[%c0_120, %c0_121] : memref<8x2048xbf16, #tpu.memory_space<vmem>>, vector<8x2048xbf16>
    %c0_122 = arith.constant 0 : index
    %c0_123 = arith.constant 0 : index
    %245 = vector.load %arg5[%c0_122, %c0_123] : memref<2048x512xbf16, #tpu.memory_space<vmem>>, vector<2048x512xbf16>
    %cst_124 = arith.constant dense<0.000000e+00> : vector<8x512xf32>
    %246 = tpu.matmul %244, %245, %cst_124 {dimension_numbers = #tpu.dot_dimension_numbers<[1], [0], [0], [1], [0, 0, 1, 1], [], []>} : vector<8x2048xbf16>, vector<2048x512xbf16>, vector<8x512xf32> -> vector<8x512xf32>
    %c0_125 = arith.constant 0 : index
    %c0_126 = arith.constant 0 : index
    %247 = vector.load %arg6[%c0_125, %c0_126] : memref<1x512xf32, #tpu.memory_space<vmem>>, vector<1x512xf32>
    %248 = vector.broadcast %247 : vector<1x512xf32> to vector<8x512xf32>
    %249 = arith.addf %246, %248 : vector<8x512xf32>
    %c0_127 = arith.constant 0 : index
    %c0_128 = arith.constant 0 : index
    %250 = vector.load %arg7[%c0_127, %c0_128] : memref<8x512xf32, #tpu.memory_space<vmem>>, vector<8x512xf32>
    tpu.vector_store %arg7[%c0_127, %c0_128], %249 {strides = array<i32>} : memref<8x512xf32, #tpu.memory_space<vmem>>, vector<8x512xf32>,
    return
  }
  func.func @transform_0(%arg0: i32) -> (i32, i32, i32) {
    %c0_i32 = arith.constant 0 : i32
    %c0_i32_0 = arith.constant 0 : i32
    %c0_i32_1 = arith.constant 0 : i32
    return %c0_i32, %arg0, %c0_i32_0 : i32, i32, i32
  }
  func.func @transform_1(%arg0: i32) -> i32 {
    %c0_i32 = arith.constant 0 : i32
    %c0_i32_0 = arith.constant 0 : i32
    return %c0_i32 : i32
  }
  func.func @transform_2(%arg0: i32) -> i32 {
    %c0_i32 = arith.constant 0 : i32
    %c0_i32_0 = arith.constant 0 : i32
    return %c0_i32 : i32
  }
  func.func @transform_3(%arg0: i32) -> i32 {
    %c0_i32 = arith.constant 0 : i32
    %c0_i32_0 = arith.constant 0 : i32
    return %c0_i32 : i32
  }
  func.func @transform_4(%arg0: i32) -> (i32, i32) {
    %c0_i32 = arith.constant 0 : i32
    %c0_i32_0 = arith.constant 0 : i32
    %c0_i32_1 = arith.constant 0 : i32
    return %c0_i32, %c0_i32_0 : i32, i32
  }
  func.func @transform_5(%arg0: i32) -> (i32, i32) {
    %c0_i32 = arith.constant 0 : i32
    %c0_i32_0 = arith.constant 0 : i32
    %c0_i32_1 = arith.constant 0 : i32
    return %c0_i32, %c0_i32_0 : i32, i32
  }
  func.func @transform_6(%arg0: i32) -> (i32, i32) {
    %c0_i32 = arith.constant 0 : i32
    %c0_i32_0 = arith.constant 0 : i32
    return %arg0, %c0_i32 : i32, i32
  }
}

</mosaic_0001>

<bundles_post_ra>
// kernel: tpu_custom_call.1
= control target key start
LH: loop header
LB: loop body
LE: loop exit
PB: predicated region body
PF: predicated region fallthrough
CT: control target
= control target key end

     0   :  { %11 = vsyncpa [#allocation4], 0  ;;  %s7233_s0 = inlined_call_operand.hbm [shape: f32[18,8,1024], index: 0, kind: input, shape index: {}]   ;;  %s7234_s1 = inlined_call_operand.hbm [shape: f32[36], index: 1, kind: input, shape index: {}]   ;;  %s7235_s2 = inlined_call_operand.hbm [shape: f32[2], index: 2, kind: input, shape index: {}]   ;;  %s7236_s3 = inlined_call_operand.hbm [shape: f32[2], index: 3, kind: input, shape index: {}]   ;;  %s7237_s4 = inlined_call_operand.hbm [shape: bf16[2048,512], index: 4, kind: input, shape index: {}]   ;;  %s7238_s5 = inlined_call_operand.hbm [shape: f32[1,512], index: 5, kind: input, shape index: {}]   ;;  %s7239_s6 = inlined_call_operand.hbm [shape: f32[8,512], index: 6, kind: output, shape index: {}]  }
   0x1   :  { %12 = vsyncpa [#allocation6], 0 }
   0x2   :  { %13 = vsyncpa [#allocation9], 0 }
   0x3   :  { %14 = vsyncpa [#allocation12], 0 }
   0x4   :  { %15 = vsyncpa [#allocation5], 0  ;;  %s6478_s23 = scalar_lea.hbm %s7235_s2, 16 }
   0x5   :  { %p6479_p0 = scmp.ne.s32.totalorder %s7235_s2, %s6478_s23  ;;  %p6482_p1 = scmp.lt.u32.totalorder %s6478_s23, %s7235_s2 }
   0x7   :  { %p6484_p2 = pnand %p6482_p1, %p6479_p0 }
   0x9   :  { %6487 = shalt.err (!%p6484_p2)
}
   0xa   :  { %s6606_s28 = smov [#allocation8]   ;;  %s6607_s7 = smov [#allocation11]  }
   0xb   :  { %43 = dma.hbm_to_smem %s7235_s2, 16, %s6606_s28, [#allocation9]  }
   0xc   :  { %s57_s8 = sshll.u32 %s6607_s7, 4  ;;  %s6488_s11 = scalar_lea.hbm %s7237_s4, 65536  ;;  %s58_s8 = int_to_ptr.vmem [resolvable:$true] %s57_s8 }
   0xd   :  { %p6489_p3 = scmp.ne.s32.totalorder %s7237_s4, %s6488_s11  ;;  %p6492_p4 = scmp.lt.u32.totalorder %s6488_s11, %s7237_s4 }
   0xf   :  { %p6494_p5 = pnand %p6492_p4, %p6489_p3 }
  0x11   :  { %6497 = shalt.err (!%p6494_p5)
}
  0x12   :  { %s6498_s16 = scalar_lea.vmem %s58_s8, 65536  ;;  %p6503_p7 = scmp.lt.s32.totalorder %s58_s8, %s58_s8 }
  0x13   :  { %p6499_p6 = scmp.ne.s32.totalorder %s58_s8, %s6498_s16  ;;  %p6504_p8 = scmp.lt.s32.totalorder %s6498_s16, %s6498_s16 }
  0x15   :  { %p6505_p9 = por %p6504_p8, %p6503_p7 }
  0x17   :  { %p6506_p10 = pnand %p6505_p9, %p6499_p6 }
  0x19   :  { %6509 = shalt.err (!%p6506_p10)
}
  0x1a   :  { %s6608_s2 = smov 256   ;;  %s6609_s17 = smov 16  }
  0x1b   :  { %63 = dma.hbm_to_vmem [thread:$0]  %s7237_s4, 65536, %s58_s8, [#allocation12], %s6608_s2, %s6608_s2, %s6609_s17  }
  0x1c   :  { %s6610_s20 = smov [#allocation3]   ;;  %s6510_s24 = scalar_lea.hbm %s7233_s0, 18432 }
  0x1d   :  { %s21_s21 = sshll.u32 %s6610_s20, 4  ;;  %p6511_p11 = scmp.ne.s32.totalorder %s7233_s0, %s6510_s24  ;;  %s22_s21 = int_to_ptr.vmem [resolvable:$true] %s21_s21 }
  0x1e   :  { %p6514_p12 = scmp.lt.u32.totalorder %s6510_s24, %s7233_s0 }
  0x20   :  { %p6516_p13 = pnand %p6514_p12, %p6511_p11 }
  0x22   :  { %6519 = shalt.err (!%p6516_p13)
}
  0x23   :  { %s6520_s29 = scalar_lea.vmem %s22_s21, 18432  ;;  %p6525_p1 = scmp.lt.s32.totalorder %s22_s21, %s22_s21 }
  0x24   :  { %p6521_p0 = scmp.ne.s32.totalorder %s22_s21, %s6520_s29  ;;  %p6526_p2 = scmp.lt.s32.totalorder %s6520_s29, %s6520_s29 }
  0x26   :  { %p6527_p3 = por %p6526_p2, %p6525_p1 }
  0x28   :  { %p6528_p4 = pnand %p6527_p3, %p6521_p0 }
  0x2a   :  { %6531 = shalt.err (!%p6528_p4)
}
  0x2b   :  { %s6611_s4 = smov 1024   ;;  %s6612_s30 = smov 64  }
  0x2c   :  { %27 = dma.hbm_to_vmem [thread:$0]  %s7233_s0, 18432, %s22_s21, [#allocation4], %s6611_s4, %s6611_s4, %s6612_s30  }
  0x2d   :  { %s6532_s11 = scalar_lea.hbm %s7234_s1, 16 }
  0x2e   :  { %p6533_p5 = scmp.ne.s32.totalorder %s7234_s1, %s6532_s11  ;;  %p6536_p6 = scmp.lt.u32.totalorder %s6532_s11, %s7234_s1 }
  0x30   :  { %p6538_p7 = pnand %p6536_p6, %p6533_p5 }
  0x32   :  { %6541 = shalt.err (!%p6538_p7)
}
  0x33   :  { %s6613_s16 = smov [#allocation7]   ;;  %s6542_s19 = scalar_lea.hbm %s7236_s3, 16 }
  0x34   :  { %35 = dma.hbm_to_smem %s7234_s1, 16, %s6613_s16, [#allocation6]  }
  0x35   :  { %p6543_p8 = scmp.ne.s32.totalorder %s7236_s3, %s6542_s19  ;;  %p6546_p9 = scmp.lt.u32.totalorder %s6542_s19, %s7236_s3 }
  0x37   :  { %p6548_p10 = pnand %p6546_p9, %p6543_p8 }
  0x39   :  { %6551 = shalt.err (!%p6548_p10)
}
  0x3a   :  { %s6614_s24 = smov [#allocation10]   ;;  %s6615_s1 = smov [#allocation13]  }
  0x3b   :  { %51 = dma.hbm_to_smem %s7236_s3, 16, %s6614_s24, [#allocation9]  }
  0x3c   :  { %s70_s27 = sshll.u32 %s6615_s1, 4  ;;  %s6552_s4 = scalar_lea.hbm %s7238_s5, 64  ;;  %s71_s27 = int_to_ptr.vmem [resolvable:$true] %s70_s27 }
  0x3d   :  { %p6553_p11 = scmp.ne.s32.totalorder %s7238_s5, %s6552_s4  ;;  %p6556_p12 = scmp.lt.u32.totalorder %s6552_s4, %s7238_s5 }
  0x3f   :  { %p6558_p13 = pnand %p6556_p12, %p6553_p11 }
  0x41   :  { %6561 = shalt.err (!%p6558_p13)
}
  0x42   :  { %s6562_s10 = scalar_lea.vmem %s71_s27, 64  ;;  %p6567_p1 = scmp.lt.s32.totalorder %s71_s27, %s71_s27 }
  0x43   :  { %p6563_p0 = scmp.ne.s32.totalorder %s71_s27, %s6562_s10  ;;  %p6568_p2 = scmp.lt.s32.totalorder %s6562_s10, %s6562_s10 }
  0x45   :  { %p6569_p3 = por %p6568_p2, %p6567_p1 }
  0x47   :  { %p6570_p4 = pnand %p6569_p3, %p6563_p0 }
  0x49   :  { %6573 = shalt.err (!%p6570_p4)
}
  0x4a   :  { %73 = dma.hbm_to_vmem [thread:$0]  %s7238_s5, 64, %s71_s27, [#allocation12]  }
  0x4b   :  { %6596 = dma.done.wait [#allocation4], 18432  }
  0x4c   :  { %6597 = vsyncadd [#allocation4], 4294948864 }
  0x4d   :  { %6598 = dma.done.wait [#allocation6], 16  }
  0x4e   :  { %6599 = vsyncadd [#allocation6], 4294967280 }
  0x4f   :  { %6600 = dma.done.wait [#allocation9], 32  }
  0x50   :  { %6601 = vsyncadd [#allocation9], 4294967264 }
  0x51   :  { %6602 = dma.done.wait [#allocation12], 65600  }
  0x52   :  { %6603 = vsyncadd [#allocation12], 4294901696 }
  0x53   :  { %92 = sfence }
  0x54   :  { %v5710_v0 = vld [vmem:[#allocation11 + $0x4] ss:$16 sps:$4 sm:$0xff]   ;;  %v5712_v1 = vld [vmem:[#allocation11 + $0xc] ss:$16 sps:$4 sm:$0xff]   ;;  %v5714_v2 = vld [vmem:[#allocation11] ss:$16 sps:$4 sm:$0xff]  }
  0x55   :  { %4364 = vmatprep.subr.bf16.mxu0 %v5710_v0  ;;  %v5715_v3 = vld [vmem:[#allocation11 + $0x8] ss:$16 sps:$4 sm:$0xff]   ;;  %4692 = vmatprep.subr.bf16.mxu1 %v5712_v1  ;;  %v5716_v4 = vld [vmem:[#allocation11 + $0x24] ss:$16 sps:$4 sm:$0xff]   ;;  %v5718_v5 = vld [vmem:[#allocation11 + $0x2c] ss:$16 sps:$4 sm:$0xff]  }
  0x56   :  { %4365 = vmatpush1.bf16.msra.mxu0 %v5714_v2  ;;  %4693 = vmatpush1.bf16.msra.mxu1 %v5715_v3  ;;  %v5720_v6 = vld [vmem:[#allocation11 + $0x20] ss:$16 sps:$4 sm:$0xff]   ;;  %v5721_v7 = vld [vmem:[#allocation11 + $0x28] ss:$16 sps:$4 sm:$0xff]   ;;  %v5722_v8 = vld [vmem:[#allocation11 + $0x44] ss:$16 sps:$4 sm:$0xff]  }
  0x57   :  { %4366 = vmatprep.subr.bf16.mxu0 %v5716_v4  ;;  %4694 = vmatprep.subr.bf16.mxu1 %v5718_v5  ;;  %v5724_v9 = vld [vmem:[#allocation11 + $0x4c] ss:$16 sps:$4 sm:$0xff]   ;;  %v5726_v10 = vld [vmem:[#allocation11 + $0x40] ss:$16 sps:$4 sm:$0xff]   ;;  %v5727_v11 = vld [vmem:[#allocation11 + $0x48] ss:$16 sps:$4 sm:$0xff]  }
  0x58   :  { %v5728_v12 = vld [vmem:[#allocation11 + $0x64] ss:$16 sps:$4 sm:$0xff]   ;;  %v5730_v13 = vld [vmem:[#allocation11 + $0x6c] ss:$16 sps:$4 sm:$0xff]   ;;  %v5732_v14 = vld [vmem:[#allocation11 + $0x60] ss:$16 sps:$4 sm:$0xff]  }
  0x59   :  { %v5733_v15 = vld [vmem:[#allocation11 + $0x68] ss:$16 sps:$4 sm:$0xff]   ;;  %v5734_v16 = vld [vmem:[#allocation11 + $0x84] ss:$16 sps:$4 sm:$0xff]   ;;  %v5736_v17 = vld [vmem:[#allocation11 + $0x8c] ss:$16 sps:$4 sm:$0xff]  }
  0x5a   :  { %4367 = vmatpush1.bf16.msra.mxu0 %v5720_v6  ;;  %4695 = vmatpush1.bf16.msra.mxu1 %v5721_v7  ;;  %v5738_v18 = vld [vmem:[#allocation11 + $0x80] ss:$16 sps:$4 sm:$0xff]   ;;  %v5739_v19 = vld [vmem:[#allocation11 + $0x88] ss:$16 sps:$4 sm:$0xff]   ;;  %v5740_v20 = vld [vmem:[#allocation11 + $0xa4] ss:$16 sps:$4 sm:$0xff]  }
  0x5b   :  { %4368 = vmatprep.subr.bf16.mxu0 %v5722_v8  ;;  %4696 = vmatprep.subr.bf16.mxu1 %v5724_v9  ;;  %v5742_v21 = vld [vmem:[#allocation11 + $0xac] ss:$16 sps:$4 sm:$0xff]   ;;  %v5744_v22 = vld [vmem:[#allocation11 + $0xa0] ss:$16 sps:$4 sm:$0xff]   ;;  %v5745_v23 = vld [vmem:[#allocation11 + $0xa8] ss:$16 sps:$4 sm:$0xff]  }
  0x5c   :  { %v5746_v24 = vld [vmem:[#allocation11 + $0xc4] ss:$16 sps:$4 sm:$0xff]   ;;  %v5748_v25 = vld [vmem:[#allocation11 + $0xcc] ss:$16 sps:$4 sm:$0xff]   ;;  %v5750_v26 = vld [vmem:[#allocation11 + $0xc0] ss:$16 sps:$4 sm:$0xff]  }
  0x5d   :  { %v5751_v27 = vld [vmem:[#allocation11 + $0xc8] ss:$16 sps:$4 sm:$0xff]   ;;  %v5752_v28 = vld [vmem:[#allocation11 + $0xe4] ss:$16 sps:$4 sm:$0xff]   ;;  %v5754_v29 = vld [vmem:[#allocation11 + $0xec] ss:$16 sps:$4 sm:$0xff]  }
  0x5e   :  { %4369 = vmatpush1.bf16.msra.mxu0 %v5726_v10  ;;  %4697 = vmatpush1.bf16.msra.mxu1 %v5727_v11  ;;  %v5756_v30 = vld [vmem:[#allocation11 + $0xe0] ss:$16 sps:$4 sm:$0xff]   ;;  %v5757_v31 = vld [vmem:[#allocation11 + $0xe8] ss:$16 sps:$4 sm:$0xff]   ;;  %v5758_v32 = vld [vmem:[#allocation11 + $0x104] ss:$16 sps:$4 sm:$0xff]  }
  0x5f   :  { %4370 = vmatprep.subr.bf16.mxu0 %v5728_v12  ;;  %4698 = vmatprep.subr.bf16.mxu1 %v5730_v13  ;;  %v5760_v33 = vld [vmem:[#allocation11 + $0x10c] ss:$16 sps:$4 sm:$0xff]   ;;  %v5762_v34 = vld [vmem:[#allocation11 + $0x100] ss:$16 sps:$4 sm:$0xff]   ;;  %v5763_v35 = vld [vmem:[#allocation11 + $0x108] ss:$16 sps:$4 sm:$0xff]  }
  0x60   :  { %s93_s5 = sld [smem:[#allocation7]]  ;;  %v5764_v36 = vld [vmem:[#allocation11 + $0x124] ss:$16 sps:$4 sm:$0xff]   ;;  %s5042_s12 = sld [smem:[#allocation7 + $0x1]]  ;;  %v5766_v37 = vld [vmem:[#allocation11 + $0x12c] ss:$16 sps:$4 sm:$0xff]  }
  0x61   :  { %s5043_s13 = sld [smem:[#allocation7 + $0x2]]  ;;  %v5768_v38 = vld [vmem:[#allocation11 + $0x120] ss:$16 sps:$4 sm:$0xff]   ;;  %s5044_s14 = sld [smem:[#allocation7 + $0x3]]  ;;  %v5769_v39 = vld [vmem:[#allocation11 + $0x128] ss:$16 sps:$4 sm:$0xff]  }
  0x62   :  { %4371 = vmatpush1.bf16.msra.mxu0 %v5732_v14  ;;  %4699 = vmatpush1.bf16.msra.mxu1 %v5733_v15  ;;  %v5770_v40 = vld [vmem:[#allocation11 + $0x144] ss:$16 sps:$4 sm:$0xff]   ;;  %v5772_v41 = vld [vmem:[#allocation11 + $0x14c] ss:$16 sps:$4 sm:$0xff]   ;;  %s6724_s15 = sld [smem:[#allocation7 + $0x4]]  ;;  %s6726_s16 = sld [smem:[#allocation7 + $0x5]] }
  0x63   :  { %4372 = vmatprep.subr.bf16.mxu0 %v5734_v16  ;;  %4700 = vmatprep.subr.bf16.mxu1 %v5736_v17  ;;  %v5774_v42 = vld [vmem:[#allocation11 + $0x140] ss:$16 sps:$4 sm:$0xff]   ;;  %v5775_v43 = vld [vmem:[#allocation11 + $0x148] ss:$16 sps:$4 sm:$0xff]   ;;  %v5776_v44 = vld [vmem:[#allocation11 + $0x164] ss:$16 sps:$4 sm:$0xff]  }
  0x64   :  { %s6730_s2 = sld [smem:[#allocation7 + $0x6]]  ;;  %v5778_v46 = vld [vmem:[#allocation11 + $0x16c] ss:$16 sps:$4 sm:$0xff]   ;;  %s6739_s17 = sld [smem:[#allocation7 + $0x7]]  ;;  %v5780_v55 = vld [vmem:[#allocation11 + $0x160] ss:$16 sps:$4 sm:$0xff]  }
  0x65   :  { %v95_v49 = vld [vmem:[#allocation3 + $0x8] sm:$0xff]  ;;  %s6743_s0 = sld [smem:[#allocation7 + $0x8]]  ;;  %v5782_v59 = vld [vmem:[#allocation11 + $0x184] ss:$16 sps:$4 sm:$0xff]   ;;  %v5786_v1 = vld [vmem:[#allocation11 + $0x180] ss:$16 sps:$4 sm:$0xff]  }
  0x66   :  { %4373 = vmatpush1.bf16.msra.mxu0 %v5738_v18  ;;  %4701 = vmatpush1.bf16.msra.mxu1 %v5739_v19  ;;  %v6728_v45 = vstv %s93_s5  ;;  %v6732_v47 = vstv %s5042_s12  ;;  %v122_v51 = vld [vmem:[#allocation3 + $0x48] sm:$0xff]  ;;  %s6752_s18 = sld [smem:[#allocation7 + $0x9]]  ;;  %s6758_s19 = sld [smem:[#allocation7 + $0xa]]  ;;  %v5788_v9 = vld [vmem:[#allocation11 + $0x1a4] ss:$16 sps:$4 sm:$0xff]  }
  0x67   :  { %4374 = vmatprep.subr.bf16.mxu0 %v5740_v20  ;;  %4702 = vmatprep.subr.bf16.mxu1 %v5742_v21  ;;  %v6734_v48 = vstv %s5043_s13  ;;  %v104_v50 = vmul.f32 %v6728_v45, %v95_v49  ;;  %v149_v52 = vld [vmem:[#allocation3 + $0x88] sm:$0xff]  ;;  %v6737_v54 = vstv %s5044_s14  ;;  %v131_v57 = vmul.f32 %v6732_v47, %v122_v51  ;;  %v5792_v11 = vld [vmem:[#allocation11 + $0x1a0] ss:$16 sps:$4 sm:$0xff]   ;;  %s6765_s20 = sld [smem:[#allocation7 + $0xb]]  ;;  %s6770_s21 = sld [smem:[#allocation7 + $0xc]] }
  0x68   :  { %v176_v53 = vld [vmem:[#allocation3 + $0xc8] sm:$0xff]  ;;  %v158_v58 = vmul.f32 %v6734_v48, %v149_v52  ;;  %v6746_v62 = vstv %s6724_s15  ;;  %v6750_v3 = vstv %s6726_s16  ;;  %v94_v18 = vld [vmem:[#allocation3] sm:$0xff]  ;;  %s6781_s22 = sld [smem:[#allocation7 + $0xd]]  ;;  %s6787_s23 = sld [smem:[#allocation7 + $0xe]] }
  0x69   :  { %v5781_v56 = vld [vmem:[#allocation11 + $0x168] ss:$16 sps:$4 sm:$0xff]   ;;  %v5784_v60 = vld [vmem:[#allocation11 + $0x18c] ss:$16 sps:$4 sm:$0xff]   ;;  %v139_v63 = vadd.f32 %v131_v57, %v104_v50  ;;  %v185_v0 = vmul.f32 %v6737_v54, %v176_v53  ;;  %v121_v19 = vld [vmem:[#allocation3 + $0x40] sm:$0xff]  ;;  %s6795_s24 = sld [smem:[#allocation7 + $0xf]] }
  0x6a   :  { %4375 = vmatpush1.bf16.msra.mxu0 %v5744_v22  ;;  %4703 = vmatpush1.bf16.msra.mxu1 %v5745_v23  ;;  %v203_v61 = vld [vmem:[#allocation3 + $0x108] sm:$0xff]  ;;  %v6756_v8 = vstv %s6730_s2  ;;  %v6763_v17 = vstv %s6739_s17  ;;  %v103_v23 = vmul.f32 %v6728_v45, %v94_v18  ;;  %v256_v51 = vld [vmem:[#allocation3 + $0x180] sm:$0xff]  ;;  %s6801_s25 = sld [smem:[#allocation7 + $0x10]]  ;;  %s6809_s26 = sld [smem:[#allocation7 + $0x11]] }
  0x6b   :  { %4376 = vmatprep.subr.bf16.mxu0 %v5746_v24  ;;  %4704 = vmatprep.subr.bf16.mxu1 %v5748_v25  ;;  %v230_v2 = vld [vmem:[#allocation3 + $0x148] sm:$0xff]  ;;  %v166_v5 = vadd.f32 %v158_v58, %v139_v63  ;;  %v212_v6 = vmul.f32 %v6746_v62, %v203_v61  ;;  %v6768_v22 = vstv %s6743_s0  ;;  %v130_v24 = vmul.f32 %v6732_v47, %v121_v19  ;;  %v148_v25 = vld [vmem:[#allocation3 + $0x80] sm:$0xff]  ;;  %s578_s1 = sld [smem:[#allocation8]]  ;;  %s6962_s28 = sld [smem:[#allocation7 + $0x12]] }
  0x6c   :  { %v5787_v4 = vld [vmem:[#allocation11 + $0x188] ss:$16 sps:$4 sm:$0xff]   ;;  %v5790_v10 = vld [vmem:[#allocation11 + $0x1ac] ss:$16 sps:$4 sm:$0xff]   ;;  %v239_v14 = vmul.f32 %v6750_v3, %v230_v2  ;;  %v5804_v52 = vld [vmem:[#allocation11 + $0x1e0] ss:$16 sps:$4 sm:$0xff]  }
  0x6d   :  { %v257_v7 = vld [vmem:[#allocation3 + $0x188] sm:$0xff]  ;;  %v193_v13 = vadd.f32 %v185_v0, %v166_v5  ;;  %v6793_v63 = vstv %s6765_s20  ;;  %v5808_v0 = vld [vmem:[#allocation11 + $0x204] ss:$16 sps:$4 sm:$0xff]   ;;  %s588_s27 = sld [smem:[#allocation10]]  ;;  %s6964_s29 = sld [smem:[#allocation7 + $0x13]] }
  0x6e   :  { %4377 = vmatpush1.bf16.msra.mxu0 %v5750_v26  ;;  %4705 = vmatpush1.bf16.msra.mxu1 %v5751_v27  ;;  %v5793_v12 = vld [vmem:[#allocation11 + $0x1a8] ss:$16 sps:$4 sm:$0xff]   ;;  %v266_v15 = vmul.f32 %v6756_v8, %v257_v7  ;;  %v175_v26 = vld [vmem:[#allocation3 + $0xc0] sm:$0xff]  ;;  %v5811_v5 = vld [vmem:[#allocation11 + $0x20c] ss:$16 sps:$4 sm:$0xff]   ;;  %v265_v7 = vmul.f32 %v6756_v8, %v256_v51  ;;  %s5065_s4 = sld [smem:[#allocation7 + $0x14]] }
  0x6f   :  { %4378 = vmatprep.subr.bf16.mxu0 %v5752_v28  ;;  %4706 = vmatprep.subr.bf16.mxu1 %v5754_v29  ;;  %v284_v16 = vld [vmem:[#allocation3 + $0x1c8] sm:$0xff]  ;;  %v220_v20 = vadd.f32 %v212_v6, %v193_v13  ;;  %v5794_v27 = vld [vmem:[#allocation11 + $0x1c4] ss:$16 sps:$4 sm:$0xff]   ;;  %v157_v29 = vmul.f32 %v6734_v48, %v148_v25  ;;  %s6967_s30 = sld [smem:[#allocation7 + $0x15]]  ;;  %s6969_s7 = sld [smem:[#allocation7 + $0x16]] }
  0x70   :  { %v311_v21 = vld [vmem:[#allocation3 + $0x208] sm:$0xff]  ;;  %v337_v18 = vld [vmem:[#allocation3 + $0x240] sm:$0xff]  ;;  %s6971_s8 = sld [smem:[#allocation7 + $0x17]]  ;;  %s6980_s9 = sld [smem:[#allocation7 + $0x18]] }
  0x71   :  { %v5796_v28 = vld [vmem:[#allocation11 + $0x1cc] ss:$16 sps:$4 sm:$0xff]   ;;  %v5805_v53 = vld [vmem:[#allocation11 + $0x1e8] ss:$16 sps:$4 sm:$0xff]   ;;  %v364_v25 = vld [vmem:[#allocation3 + $0x280] sm:$0xff]  ;;  %s6988_s10 = sld [smem:[#allocation7 + $0x19]] }
  0x72   :  { %4379 = vmatpush1.bf16.msra.mxu0 %v5756_v30  ;;  %4707 = vmatpush1.bf16.msra.mxu1 %v5757_v31  ;;  %v202_v30 = vld [vmem:[#allocation3 + $0x100] sm:$0xff]  ;;  %v392_v57 = vld [vmem:[#allocation3 + $0x2c8] sm:$0xff]  ;;  %s6996_s3 = sld [smem:[#allocation7 + $0x1a]]  ;;  %s6999_s11 = sld [smem:[#allocation7 + $0x1b]] }
  0x73   :  { %4380 = vmatprep.subr.bf16.mxu0 %v5758_v32  ;;  %4708 = vmatprep.subr.bf16.mxu1 %v5760_v33  ;;  %v5798_v31 = vld [vmem:[#allocation11 + $0x1c0] ss:$16 sps:$4 sm:$0xff]   ;;  %v247_v32 = vadd.f32 %v239_v14, %v220_v20  ;;  %v293_v33 = vmul.f32 %v6763_v17, %v284_v16  ;;  %v211_v50 = vmul.f32 %v6746_v62, %v202_v30  ;;  %v419_v58 = vld [vmem:[#allocation3 + $0x308] sm:$0xff]  ;;  %v6807_v16 = vstv %s6781_s22  ;;  %s7008_s5 = sld [smem:[#allocation7 + $0x1c]]  ;;  %s7015_s12 = sld [smem:[#allocation7 + $0x1d]] }
  0x74   :  { %v473_v20 = vld [vmem:[#allocation3 + $0x388] sm:$0xff]  ;;  %v445_v51 = vld [vmem:[#allocation3 + $0x340] sm:$0xff]  ;;  %s7021_s13 = sld [smem:[#allocation7 + $0x1e]]  ;;  %s7031_s14 = sld [smem:[#allocation7 + $0x1f]] }
  0x75   :  { %v500_v30 = vld [vmem:[#allocation3 + $0x3c8] sm:$0xff]  ;;  %s7038_s15 = sld [smem:[#allocation7 + $0x20]]  ;;  %s7042_s16 = sld [smem:[#allocation7 + $0x21]] }
  0x76   :  { %4381 = vmatpush1.bf16.msra.mxu0 %v5762_v34  ;;  %4709 = vmatpush1.bf16.msra.mxu1 %v5763_v35  ;;  %v138_v34 = vadd.f32 %v130_v24, %v103_v23  ;;  %v184_v35 = vmul.f32 %v6737_v54, %v175_v26  ;;  %v6813_v24 = vstv %s6787_s23  ;;  %s7052_s2 = sld [smem:[#allocation7 + $0x22]]  ;;  %s7058_s17 = sld [smem:[#allocation7 + $0x23]] }
  0x77   :  { %4382 = vmatprep.subr.bf16.mxu0 %v5764_v36  ;;  %4710 = vmatprep.subr.bf16.mxu1 %v5766_v37  ;;  %v5799_v36 = vld [vmem:[#allocation11 + $0x1c8] ss:$16 sps:$4 sm:$0xff]   ;;  %v320_v37 = vmul.f32 %v6768_v22, %v311_v21  ;;  %s7074_s0 = sld [smem:[#allocation8 + $0x1]] }
  0x78   :  { %v165_v49 = vadd.f32 %v157_v29, %v138_v34  ;;  %v482_v34 = vmul.f32 %v6813_v24, %v473_v20 }
  0x7a   :  { %4383 = vmatpush1.bf16.msra.mxu0 %v5768_v38  ;;  %4711 = vmatpush1.bf16.msra.mxu1 %v5769_v39  ;;  %v338_v38 = vld [vmem:[#allocation3 + $0x248] sm:$0xff]  ;;  %v6779_v39 = vstv %s6752_s18  ;;  %s5082_s18 = sld [smem:[#allocation10 + $0x1]] }
  0x7b   :  { %4384 = vmatprep.subr.bf16.mxu0 %v5770_v40  ;;  %4712 = vmatprep.subr.bf16.mxu1 %v5772_v41  ;;  %v229_v40 = vld [vmem:[#allocation3 + $0x140] sm:$0xff]  ;;  %v346_v29 = vmul.f32 %v6779_v39, %v337_v18 }
  0x7c   :  { %v5800_v41 = vld [vmem:[#allocation11 + $0x1e4] ss:$16 sps:$4 sm:$0xff]  }
  0x7e   :  { %4385 = vmatpush1.bf16.msra.mxu0 %v5774_v42  ;;  %4713 = vmatpush1.bf16.msra.mxu1 %v5775_v43  ;;  %v5802_v42 = vld [vmem:[#allocation11 + $0x1ec] ss:$16 sps:$4 sm:$0xff]   ;;  %v274_v43 = vadd.f32 %v266_v15, %v247_v32  ;;  %v391_v32 = vld [vmem:[#allocation3 + $0x2c0] sm:$0xff] }
  0x7f   :  { %4386 = vmatprep.subr.bf16.mxu0 %v5776_v44  ;;  %4714 = vmatprep.subr.bf16.mxu1 %v5778_v46  ;;  %v365_v44 = vld [vmem:[#allocation3 + $0x288] sm:$0xff]  ;;  %v6784_v46 = vstv %s6758_s19  ;;  %s6616_s19 = smov [#allocation14]  }
  0x80   :  { %v374_v61 = vmul.f32 %v6784_v46, %v365_v44  ;;  %v446_v15 = vld [vmem:[#allocation3 + $0x348] sm:$0xff]  ;;  %v400_v44 = vmul.f32 %v6793_v63, %v391_v32  ;;  %s5030_s20 = sshll.u32 %s6616_s19, 4  ;;  %s5031_s20 = int_to_ptr.vmem [resolvable:$true] %s5030_s20 }
  0x81   :  { %p6579_p6 = scmp.lt.s32.totalorder %s5031_s20, %s5031_s20 }
  0x82   :  { %4387 = vmatpush1.bf16.msra.mxu0 %v5780_v55  ;;  %4715 = vmatpush1.bf16.msra.mxu1 %v5781_v56  ;;  %v301_v55 = vadd.f32 %v293_v33, %v274_v43  ;;  %v347_v56 = vmul.f32 %v6779_v39, %v338_v38  ;;  %v6823_v38 = vstv %s6801_s25 }
  0x83   :  { %4388 = vmatprep.subr.bf16.mxu0 %v5782_v59  ;;  %4716 = vmatprep.subr.bf16.mxu1 %v5784_v60  ;;  %v192_v59 = vadd.f32 %v184_v35, %v165_v49  ;;  %v238_v60 = vmul.f32 %v6750_v3, %v229_v40  ;;  %v527_v35 = vld [vmem:[#allocation3 + $0x408] sm:$0xff]  ;;  %v418_v40 = vld [vmem:[#allocation3 + $0x300] sm:$0xff] }
  0x84   :  { %v328_v2 = vadd.f32 %v320_v37, %v301_v55  ;;  %v373_v37 = vmul.f32 %v6784_v46, %v364_v25  ;;  %v554_v49 = vld [vmem:[#allocation3 + $0x448] sm:$0xff] }
  0x85   :  { %v219_v6 = vadd.f32 %v211_v50, %v192_v59  ;;  %v6828_v50 = vstv %s6809_s26 }
  0x86   :  { %4389 = vmatpush1.bf16.msra.mxu0 %v5786_v1  ;;  %4717 = vmatpush1.bf16.msra.mxu1 %v5787_v4  ;;  %v283_v1 = vld [vmem:[#allocation3 + $0x1c0] sm:$0xff]  ;;  %v6798_v4 = vstv %s6770_s21  ;;  %v563_v59 = vmul.f32 %v6828_v50, %v554_v49  ;;  %s6574_s21 = scalar_lea.vmem %s5031_s20, 512 }
  0x87   :  { %4390 = vmatprep.subr.bf16.mxu0 %v5788_v9  ;;  %4718 = vmatprep.subr.bf16.mxu1 %v5790_v10  ;;  %v310_v9 = vld [vmem:[#allocation3 + $0x200] sm:$0xff]  ;;  %v355_v10 = vadd.f32 %v347_v56, %v328_v2  ;;  %v292_v13 = vmul.f32 %v6763_v17, %v283_v1  ;;  %v428_v14 = vmul.f32 %v6798_v4, %v419_v58  ;;  %p6575_p5 = scmp.ne.s32.totalorder %s5031_s20, %s6574_s21  ;;  %p6580_p7 = scmp.lt.s32.totalorder %s6574_s21, %s6574_s21 }
  0x88   :  { %v319_v23 = vmul.f32 %v6768_v22, %v310_v9  ;;  %v427_v56 = vmul.f32 %v6798_v4, %v418_v40  ;;  %v5817_v40 = vld [vmem:[#allocation11 + $0x22c] ss:$16 sps:$4 sm:$0xff]  }
  0x89   :  { %v382_v19 = vadd.f32 %v374_v61, %v355_v10  ;;  %v454_v61 = vmul.f32 %v6807_v16, %v445_v51  ;;  %p6581_p8 = por %p6580_p7, %p6579_p6 }
  0x8a   :  { %4391 = vmatpush1.bf16.msra.mxu0 %v5792_v11  ;;  %4719 = vmatpush1.bf16.msra.mxu1 %v5793_v12  ;;  %v401_v11 = vmul.f32 %v6793_v63, %v392_v57  ;;  %v246_v12 = vadd.f32 %v238_v60, %v219_v6  ;;  %v472_v57 = vld [vmem:[#allocation3 + $0x380] sm:$0xff]  ;;  %v6835_v6 = vstv %s578_s1 }
  0x8b   :  { %4392 = vmatprep.subr.bf16.mxu0 %v5794_v27  ;;  %4720 = vmatprep.subr.bf16.mxu1 %v5796_v28  ;;  %v455_v27 = vmul.f32 %v6807_v16, %v446_v15  ;;  %p6582_p9 = pnand %p6581_p8, %p6575_p5 }
  0x8c   :  { %v273_v21 = vadd.f32 %v265_v7, %v246_v12  ;;  %v409_v26 = vadd.f32 %v401_v11, %v382_v19  ;;  %v526_v7 = vld [vmem:[#allocation3 + $0x400] sm:$0xff]  ;;  %v6838_v12 = vstv %s588_s27 }
  0x8d   :  { %v535_v18 = vmul.f32 %v6823_v38, %v526_v7 }
  0x8e   :  { %4393 = vmatpush1.bf16.msra.mxu0 %v5798_v31  ;;  %4721 = vmatpush1.bf16.msra.mxu1 %v5799_v36  ;;  %v300_v28 = vadd.f32 %v292_v13, %v273_v21  ;;  %v6818_v31 = vstv %s6795_s24  ;;  %v436_v33 = vadd.f32 %v428_v14, %v409_v26  ;;  %v553_v13 = vld [vmem:[#allocation3 + $0x440] sm:$0xff] }
  0x8f   :  { %4394 = vmatprep.subr.bf16.mxu0 %v5800_v41  ;;  %4722 = vmatprep.subr.bf16.mxu1 %v5802_v42  ;;  %v509_v42 = vmul.f32 %v6818_v31, %v500_v30  ;;  %v562_v21 = vmul.f32 %v6828_v50, %v553_v13  ;;  %v5827_v13 = vld [vmem:[#allocation11 + $0x268] ss:$16 sps:$4 sm:$0xff]  }
  0x90   :  { %v327_v36 = vadd.f32 %v319_v23, %v300_v28  ;;  %v463_v41 = vadd.f32 %v455_v27, %v436_v33  ;;  %v5806_v33 = vld [vmem:[#allocation11 + $0x200] ss:$16 sps:$4 sm:$0xff]  }
  0x92   :  { %4395 = vmatpush1.bf16.msra.mxu0 %v5804_v52  ;;  %4723 = vmatpush1.bf16.msra.mxu1 %v5805_v53  ;;  %v354_v43 = vadd.f32 %v346_v29, %v327_v36  ;;  %v490_v52 = vadd.f32 %v482_v34, %v463_v41  ;;  %v536_v53 = vmul.f32 %v6823_v38, %v527_v35  ;;  %v5809_v34 = vld [vmem:[#allocation11 + $0x208] ss:$16 sps:$4 sm:$0xff]   ;;  %v5812_v41 = vld [vmem:[#allocation11 + $0x220] ss:$16 sps:$4 sm:$0xff]  }
  0x93   :  { %4405 = vmatprep.subr.bf16.mxu0 %v5808_v0  ;;  %4733 = vmatprep.subr.bf16.mxu1 %v5811_v5  ;;  %v499_v0 = vld [vmem:[#allocation3 + $0x3c0] sm:$0xff]  ;;  %v481_v5 = vmul.f32 %v6813_v24, %v472_v57 }
  0x94   :  { %v381_v55 = vadd.f32 %v373_v37, %v354_v43  ;;  %v517_v58 = vadd.f32 %v509_v42, %v490_v52  ;;  %v508_v11 = vmul.f32 %v6818_v31, %v499_v0  ;;  %v5814_v37 = vld [vmem:[#allocation11 + $0x224] ss:$16 sps:$4 sm:$0xff]   ;;  %v97_v42 = vld [vmem:[#allocation3 + $0x18] sm:$0xff] }
  0x95   :  { %v124_v43 = vld [vmem:[#allocation3 + $0x58] sm:$0xff]  ;;  %v106_v49 = vmul.f32 %v6728_v45, %v97_v42  ;;  %v5830_v42 = vld [vmem:[#allocation11 + $0x280] ss:$16 sps:$4 sm:$0xff]  }
  0x96   :  { %v408_v60 = vadd.f32 %v400_v44, %v381_v55  ;;  %v544_v1 = vadd.f32 %v536_v53, %v517_v58  ;;  %v5815_v44 = vld [vmem:[#allocation11 + $0x228] ss:$16 sps:$4 sm:$0xff]   ;;  %v133_v51 = vmul.f32 %v6732_v47, %v124_v43  ;;  %v5820_v55 = vld [vmem:[#allocation11 + $0x244] ss:$16 sps:$4 sm:$0xff]  }
  0x97   :  { %v151_v52 = vld [vmem:[#allocation3 + $0x98] sm:$0xff] }
  0x98   :  { %v435_v2 = vadd.f32 %v427_v56, %v408_v60  ;;  %v571_v9 = vadd.f32 %v563_v59, %v544_v1  ;;  %v178_v53 = vld [vmem:[#allocation3 + $0xd8] sm:$0xff]  ;;  %v160_v57 = vmul.f32 %v6734_v48, %v151_v52  ;;  %v141_v59 = vadd.f32 %v133_v51, %v106_v49  ;;  %v231_v51 = vld [vmem:[#allocation3 + $0x150] sm:$0xff] }
  0x99   :  { %v5823_v56 = vld [vmem:[#allocation11 + $0x24c] ss:$16 sps:$4 sm:$0xff]   ;;  %v187_v60 = vmul.f32 %v6737_v54, %v178_v53  ;;  %v5821_v1 = vld [vmem:[#allocation11 + $0x248] ss:$16 sps:$4 sm:$0xff]   ;;  %v5838_v52 = vld [vmem:[#allocation11 + $0x2a4] ss:$16 sps:$4 sm:$0xff]  }
  0x9a   :  { %v462_v10 = vadd.f32 %v454_v61, %v435_v2  ;;  %v581_v14 = vmul.f32 %v6835_v6, %v571_v9  ;;  %v205_v58 = vld [vmem:[#allocation3 + $0x118] sm:$0xff]  ;;  %v5818_v61 = vld [vmem:[#allocation11 + $0x240] ss:$16 sps:$4 sm:$0xff]   ;;  %v5826_v2 = vld [vmem:[#allocation11 + $0x264] ss:$16 sps:$4 sm:$0xff]   ;;  %v168_v7 = vadd.f32 %v160_v57, %v141_v59 }
  0x9b   :  { %v232_v0 = vld [vmem:[#allocation3 + $0x158] sm:$0xff]  ;;  %v214_v9 = vmul.f32 %v6746_v62, %v205_v58  ;;  %v5836_v58 = vld [vmem:[#allocation11 + $0x2a0] ss:$16 sps:$4 sm:$0xff]  }
  0x9c   :  { %v489_v15 = vadd.f32 %v481_v5, %v462_v10  ;;  %v591_v19 = vadd.f32 %v6838_v12, %v581_v14  ;;  %v5829_v5 = vld [vmem:[#allocation11 + $0x26c] ss:$16 sps:$4 sm:$0xff]   ;;  %v195_v14 = vadd.f32 %v187_v60, %v168_v7  ;;  %v5833_v43 = vld [vmem:[#allocation11 + $0x288] ss:$16 sps:$4 sm:$0xff]   ;;  %v5844_v7 = vld [vmem:[#allocation11 + $0x2c4] ss:$16 sps:$4 sm:$0xff]  }
  0x9d   :  { %v259_v10 = vld [vmem:[#allocation3 + $0x198] sm:$0xff] }
  0x9e   :  { %v516_v20 = vadd.f32 %v508_v11, %v489_v15  ;;  %vm599_vm0 = vcmp.ge.f32.partialorder %v591_v19, 0.0  ;;  %v607_v23 = vmul.f32 0.3, %v591_v19  ;;  %v5824_v11 = vld [vmem:[#allocation11 + $0x260] ss:$16 sps:$4 sm:$0xff]   ;;  %v241_v15 = vmul.f32 %v6750_v3, %v232_v0 }
  0x9f   :  { %v5841_v53 = vld [vmem:[#allocation11 + $0x2ac] ss:$16 sps:$4 sm:$0xff]   ;;  %v5839_v59 = vld [vmem:[#allocation11 + $0x2a8] ss:$16 sps:$4 sm:$0xff]   ;;  %v258_v0 = vld [vmem:[#allocation3 + $0x190] sm:$0xff] }
  0xa0   :  { %v543_v25 = vadd.f32 %v535_v18, %v516_v20  ;;  %v615_v26 = vsel %vm599_vm0, %v591_v19, %v607_v23  ;;  %v5832_v18 = vld [vmem:[#allocation11 + $0x284] ss:$16 sps:$4 sm:$0xff]   ;;  %v286_v19 = vld [vmem:[#allocation3 + $0x1d8] sm:$0xff]  ;;  %v222_v20 = vadd.f32 %v214_v9, %v195_v14 }
  0xa1   :  { %v5624_v28 = vpack.c.bf16 %v615_v26, %v615_v26  ;;  %v96_v23 = vld [vmem:[#allocation3 + $0x10] sm:$0xff]  ;;  %v421_v14 = vld [vmem:[#allocation3 + $0x318] sm:$0xff] }
  0xa2   :  { %v570_v27 = vadd.f32 %v562_v21, %v543_v25  ;;  %v268_v21 = vmul.f32 %v6756_v8, %v259_v10  ;;  %v123_v25 = vld [vmem:[#allocation3 + $0x50] sm:$0xff] }
  0xa3   :  { %4396 = vmatprep.mubr.bf16.mxu0 %v5624_v28  ;;  %4724 = vmatprep.mubr.bf16.mxu1 %v5624_v28  ;;  %v150_v26 = vld [vmem:[#allocation3 + $0x90] sm:$0xff]  ;;  %v313_v28 = vld [vmem:[#allocation3 + $0x218] sm:$0xff] }
  0xa4   :  { %v580_v29 = vmul.f32 %v6835_v6, %v570_v27  ;;  %v5835_v27 = vld [vmem:[#allocation11 + $0x28c] ss:$16 sps:$4 sm:$0xff]   ;;  %v322_v49 = vmul.f32 %v6768_v22, %v313_v28 }
  0xa6   :  { %v590_v30 = vadd.f32 %v6838_v12, %v580_v29  ;;  %v105_v29 = vmul.f32 %v6728_v45, %v96_v23 }
  0xa8   :  { %vm598_vm1 = vcmp.ge.f32.partialorder %v590_v30, 0.0  ;;  %v606_v32 = vmul.f32 0.3, %v590_v30 }
  0xaa   :  { %v614_v35 = vsel %vm598_vm1, %v590_v30, %v606_v32  ;;  %v132_v30 = vmul.f32 %v6732_v47, %v123_v25  ;;  %v159_v32 = vmul.f32 %v6734_v48, %v150_v26  ;;  %v312_v25 = vld [vmem:[#allocation3 + $0x210] sm:$0xff]  ;;  %v448_v26 = vld [vmem:[#allocation3 + $0x358] sm:$0xff] }
  0xab   :  { %v5623_v36 = vpack.c.bf16 %v614_v35, %v614_v35  ;;  %v295_v35 = vmul.f32 %v6763_v17, %v286_v19  ;;  %v5842_v19 = vld [vmem:[#allocation11 + $0x2c0] ss:$16 sps:$4 sm:$0xff]  }
  0xad   :  { %4397 = vmatmul.mubr.bf16.vlgmr.msra.gmra.mrb[0].mxu0 %v5623_v36  ;;  %4725 = vmatmul.mubr.bf16.vlgmr.msra.gmra.mrb[0].mxu1 %v5623_v36  ;;  %v204_v36 = vld [vmem:[#allocation3 + $0x110] sm:$0xff] }
  0xae   :  { %4406 = vmatpush1.bf16.msra.mxu0 %v5806_v33  ;;  %4734 = vmatpush1.bf16.msra.mxu1 %v5809_v34  ;;  %v177_v33 = vld [vmem:[#allocation3 + $0xd0] sm:$0xff]  ;;  %v249_v34 = vadd.f32 %v241_v15, %v222_v20  ;;  %v213_v57 = vmul.f32 %v6746_v62, %v204_v36  ;;  %v5845_v20 = vld [vmem:[#allocation11 + $0x2c8] ss:$16 sps:$4 sm:$0xff]  }
  0xaf   :  { %4407 = vmatprep.subr.bf16.mxu0 %v5814_v37  ;;  %4735 = vmatprep.subr.bf16.mxu1 %v5817_v40  ;;  %v340_v37 = vld [vmem:[#allocation3 + $0x258] sm:$0xff]  ;;  %v140_v40 = vadd.f32 %v132_v30, %v105_v29  ;;  %v5850_v29 = vld [vmem:[#allocation11 + $0x2e4] ss:$16 sps:$4 sm:$0xff]  }
  0xb2   :  { %4408 = vmatpush1.bf16.msra.mxu0 %v5812_v41  ;;  %4736 = vmatpush1.bf16.msra.mxu1 %v5815_v44  ;;  %v186_v41 = vmul.f32 %v6737_v54, %v177_v33  ;;  %v276_v44 = vadd.f32 %v268_v21, %v249_v34  ;;  %v339_v33 = vld [vmem:[#allocation3 + $0x250] sm:$0xff]  ;;  %v5853_v34 = vld [vmem:[#allocation11 + $0x2ec] ss:$16 sps:$4 sm:$0xff]  }
  0xb3   :  { %4409 = vmatprep.subr.bf16.mxu0 %v5820_v55  ;;  %4737 = vmatprep.subr.bf16.mxu1 %v5823_v56  ;;  %v367_v55 = vld [vmem:[#allocation3 + $0x298] sm:$0xff]  ;;  %v167_v56 = vadd.f32 %v159_v32, %v140_v40  ;;  %v430_v32 = vmul.f32 %v6798_v4, %v421_v14  ;;  %v5848_v40 = vld [vmem:[#allocation11 + $0x2e0] ss:$16 sps:$4 sm:$0xff]  }
  0xb4   :  { %v303_v60 = vadd.f32 %v295_v35, %v276_v44  ;;  %v376_v10 = vmul.f32 %v6784_v46, %v367_v55  ;;  %v475_v35 = vld [vmem:[#allocation3 + $0x398] sm:$0xff]  ;;  %v366_v44 = vld [vmem:[#allocation3 + $0x290] sm:$0xff] }
  0xb6   :  { %4410 = vmatpush1.bf16.msra.mxu0 %v5818_v61  ;;  %4738 = vmatpush1.bf16.msra.mxu1 %v5821_v1  ;;  %v349_v61 = vmul.f32 %v6779_v39, %v340_v37  ;;  %v394_v1 = vld [vmem:[#allocation3 + $0x2d8] sm:$0xff]  ;;  %v330_v9 = vadd.f32 %v322_v49, %v303_v60  ;;  %v321_v37 = vmul.f32 %v6768_v22, %v312_v25 }
  0xb7   :  { %4411 = vmatprep.subr.bf16.mxu0 %v5826_v2  ;;  %4739 = vmatprep.subr.bf16.mxu1 %v5829_v5  ;;  %v194_v2 = vadd.f32 %v186_v41, %v167_v56  ;;  %v240_v5 = vmul.f32 %v6750_v3, %v231_v51  ;;  %v403_v23 = vmul.f32 %v6793_v63, %v394_v1  ;;  %v5851_v41 = vld [vmem:[#allocation11 + $0x2e8] ss:$16 sps:$4 sm:$0xff]  }
  0xb8   :  { %v357_v21 = vadd.f32 %v349_v61, %v330_v9  ;;  %v502_v49 = vld [vmem:[#allocation3 + $0x3d8] sm:$0xff]  ;;  %v484_v56 = vmul.f32 %v6813_v24, %v475_v35  ;;  %v375_v61 = vmul.f32 %v6784_v46, %v366_v44 }
  0xb9   :  { %v221_v15 = vadd.f32 %v213_v57, %v194_v2  ;;  %v393_v57 = vld [vmem:[#allocation3 + $0x2d0] sm:$0xff]  ;;  %v511_v2 = vmul.f32 %v6818_v31, %v502_v49  ;;  %v5871_v35 = vld [vmem:[#allocation11 + $0x34c] ss:$16 sps:$4 sm:$0xff]   ;;  %v5869_v49 = vld [vmem:[#allocation11 + $0x348] ss:$16 sps:$4 sm:$0xff]  }
  0xba   :  { %4412 = vmatpush1.bf16.msra.mxu0 %v5824_v11  ;;  %4740 = vmatpush1.bf16.msra.mxu1 %v5827_v13  ;;  %v285_v11 = vld [vmem:[#allocation3 + $0x1d0] sm:$0xff]  ;;  %v5847_v13 = vld [vmem:[#allocation11 + $0x2cc] ss:$16 sps:$4 sm:$0xff]   ;;  %v384_v30 = vadd.f32 %v376_v10, %v357_v21  ;;  %v402_v10 = vmul.f32 %v6793_v63, %v393_v57 }
  0xbb   :  { %4413 = vmatprep.subr.bf16.mxu0 %v5832_v18  ;;  %4741 = vmatprep.subr.bf16.mxu1 %v5835_v27  ;;  %v267_v18 = vmul.f32 %v6756_v8, %v258_v0  ;;  %v248_v27 = vadd.f32 %v240_v5, %v221_v15  ;;  %v294_v28 = vmul.f32 %v6763_v17, %v285_v11  ;;  %v5854_v0 = vld [vmem:[#allocation11 + $0x300] ss:$16 sps:$4 sm:$0xff]   ;;  %v5857_v11 = vld [vmem:[#allocation11 + $0x308] ss:$16 sps:$4 sm:$0xff]  }
  0xbc   :  { %v420_v5 = vld [vmem:[#allocation3 + $0x310] sm:$0xff] }
  0xbd   :  { %v275_v36 = vadd.f32 %v267_v18, %v248_v27  ;;  %v447_v15 = vld [vmem:[#allocation3 + $0x350] sm:$0xff]  ;;  %v429_v21 = vmul.f32 %v6798_v4, %v420_v5  ;;  %v5883_v5 = vld [vmem:[#allocation11 + $0x38c] ss:$16 sps:$4 sm:$0xff]  }
  0xbe   :  { %4414 = vmatpush1.bf16.msra.mxu0 %v5830_v42  ;;  %4742 = vmatpush1.bf16.msra.mxu1 %v5833_v43  ;;  %v411_v42 = vadd.f32 %v403_v23, %v384_v30  ;;  %v457_v43 = vmul.f32 %v6807_v16, %v448_v26  ;;  %v5862_v18 = vld [vmem:[#allocation11 + $0x324] ss:$16 sps:$4 sm:$0xff]   ;;  %v5860_v27 = vld [vmem:[#allocation11 + $0x320] ss:$16 sps:$4 sm:$0xff]   ;;  %v5863_v30 = vld [vmem:[#allocation11 + $0x328] ss:$16 sps:$4 sm:$0xff]  }
  0xbf   :  { %4415 = vmatprep.subr.bf16.mxu0 %v5838_v52  ;;  %4743 = vmatprep.subr.bf16.mxu1 %v5841_v53  ;;  %v302_v51 = vadd.f32 %v294_v28, %v275_v36  ;;  %v348_v52 = vmul.f32 %v6779_v39, %v339_v33  ;;  %v5856_v53 = vld [vmem:[#allocation11 + $0x304] ss:$16 sps:$4 sm:$0xff]  }
  0xc0   :  { %v438_v55 = vadd.f32 %v430_v32, %v411_v42  ;;  %v474_v26 = vld [vmem:[#allocation3 + $0x390] sm:$0xff] }
  0xc1   :  { %v329_v60 = vadd.f32 %v321_v37, %v302_v51  ;;  %v501_v33 = vld [vmem:[#allocation3 + $0x3d0] sm:$0xff]  ;;  %v483_v37 = vmul.f32 %v6813_v24, %v474_v26 }
  0xc2   :  { %4416 = vmatpush1.bf16.msra.mxu0 %v5836_v58  ;;  %4744 = vmatpush1.bf16.msra.mxu1 %v5839_v59  ;;  %v5859_v58 = vld [vmem:[#allocation11 + $0x30c] ss:$16 sps:$4 sm:$0xff]   ;;  %v465_v1 = vadd.f32 %v457_v43, %v438_v55  ;;  %v5866_v42 = vld [vmem:[#allocation11 + $0x340] ss:$16 sps:$4 sm:$0xff]   ;;  %v510_v44 = vmul.f32 %v6818_v31, %v501_v33 }
  0xc3   :  { %4417 = vmatprep.subr.bf16.mxu0 %v5844_v7  ;;  %4745 = vmatprep.subr.bf16.mxu1 %v5847_v13  ;;  %v529_v59 = vld [vmem:[#allocation3 + $0x418] sm:$0xff]  ;;  %v356_v9 = vadd.f32 %v348_v52, %v329_v60  ;;  %v555_v52 = vld [vmem:[#allocation3 + $0x450] sm:$0xff]  ;;  %v99_v33 = vld [vmem:[#allocation3 + $0x28] sm:$0xff] }
  0xc4   :  { %v556_v7 = vld [vmem:[#allocation3 + $0x458] sm:$0xff]  ;;  %v492_v13 = vadd.f32 %v484_v56, %v465_v1  ;;  %v538_v14 = vmul.f32 %v6823_v38, %v529_v59  ;;  %v5872_v59 = vld [vmem:[#allocation11 + $0x360] ss:$16 sps:$4 sm:$0xff]  }
  0xc5   :  { %v565_v25 = vmul.f32 %v6828_v50, %v556_v7  ;;  %v5877_v55 = vld [vmem:[#allocation11 + $0x36c] ss:$16 sps:$4 sm:$0xff]  }
  0xc6   :  { %4418 = vmatpush1.bf16.msra.mxu0 %v5842_v19  ;;  %4746 = vmatpush1.bf16.msra.mxu1 %v5845_v20  ;;  %v5865_v19 = vld [vmem:[#allocation11 + $0x32c] ss:$16 sps:$4 sm:$0xff]   ;;  %v383_v20 = vadd.f32 %v375_v61, %v356_v9  ;;  %v519_v23 = vadd.f32 %v511_v2, %v492_v13  ;;  %v564_v61 = vmul.f32 %v6828_v50, %v555_v52  ;;  %v5880_v2 = vld [vmem:[#allocation11 + $0x384] ss:$16 sps:$4 sm:$0xff]  }
  0xc7   :  { %4419 = vmatprep.subr.bf16.mxu0 %v5850_v29  ;;  %4747 = vmatprep.subr.bf16.mxu1 %v5853_v34  ;;  %v456_v29 = vmul.f32 %v6807_v16, %v447_v15  ;;  %v5868_v34 = vld [vmem:[#allocation11 + $0x344] ss:$16 sps:$4 sm:$0xff]   ;;  %v5907_v52 = vld [vmem:[#allocation11 + $0x40c] ss:$16 sps:$4 sm:$0xff]  }
  0xc8   :  { %v410_v28 = vadd.f32 %v402_v10, %v383_v20  ;;  %v546_v32 = vadd.f32 %v538_v14, %v519_v23  ;;  %v5878_v10 = vld [vmem:[#allocation11 + $0x380] ss:$16 sps:$4 sm:$0xff]   ;;  %v5881_v14 = vld [vmem:[#allocation11 + $0x388] ss:$16 sps:$4 sm:$0xff]   ;;  %v5886_v15 = vld [vmem:[#allocation11 + $0x3a4] ss:$16 sps:$4 sm:$0xff]  }
  0xc9   :  { %v5884_v20 = vld [vmem:[#allocation11 + $0x3a0] ss:$16 sps:$4 sm:$0xff]   ;;  %v5892_v23 = vld [vmem:[#allocation11 + $0x3c4] ss:$16 sps:$4 sm:$0xff]  }
  0xca   :  { %4420 = vmatpush1.bf16.msra.mxu0 %v5848_v40  ;;  %4748 = vmatpush1.bf16.msra.mxu1 %v5851_v41  ;;  %v437_v36 = vadd.f32 %v429_v21, %v410_v28  ;;  %v573_v40 = vadd.f32 %v565_v25, %v546_v32  ;;  %v528_v41 = vld [vmem:[#allocation3 + $0x410] sm:$0xff]  ;;  %v5887_v21 = vld [vmem:[#allocation11 + $0x3a8] ss:$16 sps:$4 sm:$0xff]   ;;  %v5895_v25 = vld [vmem:[#allocation11 + $0x3cc] ss:$16 sps:$4 sm:$0xff]  }
  0xcb   :  { %4421 = vmatprep.subr.bf16.mxu0 %v5856_v53  ;;  %4749 = vmatprep.subr.bf16.mxu1 %v5859_v58  ;;  %v5874_v53 = vld [vmem:[#allocation11 + $0x364] ss:$16 sps:$4 sm:$0xff]   ;;  %v537_v57 = vmul.f32 %v6823_v38, %v528_v41  ;;  %v5893_v28 = vld [vmem:[#allocation11 + $0x3c8] ss:$16 sps:$4 sm:$0xff]   ;;  %v5901_v32 = vld [vmem:[#allocation11 + $0x3ec] ss:$16 sps:$4 sm:$0xff]  }
  0xcc   :  { %v464_v43 = vadd.f32 %v456_v29, %v437_v36  ;;  %v583_v51 = vmul.f32 %v6835_v6, %v573_v40  ;;  %v5898_v29 = vld [vmem:[#allocation11 + $0x3e4] ss:$16 sps:$4 sm:$0xff]   ;;  %v180_v40 = vld [vmem:[#allocation3 + $0xe8] sm:$0xff]  ;;  %v5896_v41 = vld [vmem:[#allocation11 + $0x3e0] ss:$16 sps:$4 sm:$0xff]  }
  0xce   :  { %4422 = vmatpush1.bf16.msra.mxu0 %v5854_v0  ;;  %4750 = vmatpush1.bf16.msra.mxu1 %v5857_v11  ;;  %v491_v56 = vadd.f32 %v483_v37, %v464_v43  ;;  %v593_v58 = vadd.f32 %v6838_v12, %v583_v51  ;;  %v5875_v0 = vld [vmem:[#allocation11 + $0x368] ss:$16 sps:$4 sm:$0xff]   ;;  %v5904_v51 = vld [vmem:[#allocation11 + $0x404] ss:$16 sps:$4 sm:$0xff]  }
  0xcf   :  { %4423 = vmatprep.subr.bf16.mxu0 %v5862_v18  ;;  %4751 = vmatprep.subr.bf16.mxu1 %v5865_v19  ;;  %v5889_v18 = vld [vmem:[#allocation11 + $0x3ac] ss:$16 sps:$4 sm:$0xff]  }
  0xd0   :  { %v518_v60 = vadd.f32 %v510_v44, %v491_v56  ;;  %vm601_vm2 = vcmp.ge.f32.partialorder %v593_v58, 0.0  ;;  %v609_v1 = vmul.f32 0.3, %v593_v58  ;;  %v153_v37 = vld [vmem:[#allocation3 + $0xa8] sm:$0xff] }
  0xd1   :  { %v162_v44 = vmul.f32 %v6734_v48, %v153_v37  ;;  %v234_v56 = vld [vmem:[#allocation3 + $0x168] sm:$0xff] }
  0xd2   :  { %4424 = vmatpush1.bf16.msra.mxu0 %v5860_v27  ;;  %4752 = vmatpush1.bf16.msra.mxu1 %v5863_v30  ;;  %v545_v7 = vadd.f32 %v537_v57, %v518_v60  ;;  %v617_v9 = vsel %vm601_vm2, %v593_v58, %v609_v1  ;;  %v5890_v27 = vld [vmem:[#allocation11 + $0x3c0] ss:$16 sps:$4 sm:$0xff]   ;;  %v5905_v58 = vld [vmem:[#allocation11 + $0x408] ss:$16 sps:$4 sm:$0xff]   ;;  %v5910_v1 = vld [vmem:[#allocation11 + $0x424] ss:$16 sps:$4 sm:$0xff]  }
  0xd3   :  { %4425 = vmatprep.subr.bf16.mxu0 %v5868_v34  ;;  %4753 = vmatprep.subr.bf16.mxu1 %v5871_v35  ;;  %v5626_v11 = vpack.c.bf16 %v617_v9, %v617_v9  ;;  %v126_v34 = vld [vmem:[#allocation3 + $0x68] sm:$0xff]  ;;  %v108_v35 = vmul.f32 %v6728_v45, %v99_v33  ;;  %v5902_v57 = vld [vmem:[#allocation11 + $0x400] ss:$16 sps:$4 sm:$0xff]  }
  0xd4   :  { %v572_v13 = vadd.f32 %v564_v61, %v545_v7  ;;  %v135_v36 = vmul.f32 %v6732_v47, %v126_v34  ;;  %v243_v7 = vmul.f32 %v6750_v3, %v234_v56  ;;  %v5908_v9 = vld [vmem:[#allocation11 + $0x420] ss:$16 sps:$4 sm:$0xff]   ;;  %v342_v33 = vld [vmem:[#allocation3 + $0x268] sm:$0xff] }
  0xd5   :  { %4437 = vmatprep.mubr.bf16.mxu0 %v5626_v11  ;;  %4765 = vmatprep.mubr.bf16.mxu1 %v5626_v11  ;;  %v5917_v37 = vld [vmem:[#allocation11 + $0x448] ss:$16 sps:$4 sm:$0xff]   ;;  %v260_v56 = vld [vmem:[#allocation3 + $0x1a0] sm:$0xff] }
  0xd6   :  { %4426 = vmatpush1.bf16.msra.mxu0 %v5866_v42  ;;  %4754 = vmatpush1.bf16.msra.mxu1 %v5869_v49  ;;  %v582_v19 = vmul.f32 %v6835_v6, %v572_v13  ;;  %v5899_v42 = vld [vmem:[#allocation11 + $0x3e8] ss:$16 sps:$4 sm:$0xff]  }
  0xd7   :  { %4427 = vmatprep.subr.bf16.mxu0 %v5874_v53  ;;  %4755 = vmatprep.subr.bf16.mxu1 %v5877_v55  ;;  %v207_v49 = vld [vmem:[#allocation3 + $0x128] sm:$0xff]  ;;  %v143_v53 = vadd.f32 %v135_v36, %v108_v35  ;;  %v189_v55 = vmul.f32 %v6737_v54, %v180_v40  ;;  %v5914_v36 = vld [vmem:[#allocation11 + $0x440] ss:$16 sps:$4 sm:$0xff]  }
  0xd8   :  { %v592_v26 = vadd.f32 %v6838_v12, %v582_v19  ;;  %v216_v61 = vmul.f32 %v6746_v62, %v207_v49  ;;  %v5911_v19 = vld [vmem:[#allocation11 + $0x428] ss:$16 sps:$4 sm:$0xff]  }
  0xd9   :  { %v170_v60 = vadd.f32 %v162_v44, %v143_v53  ;;  %v5925_v44 = vld [vmem:[#allocation11 + $0x46c] ss:$16 sps:$4 sm:$0xff]  }
  0xda   :  { %4428 = vmatpush1.bf16.msra.mxu0 %v5872_v59  ;;  %4756 = vmatpush1.bf16.msra.mxu1 %v5875_v0  ;;  %v608_v30 = vmul.f32 0.3, %v592_v26  ;;  %vm600_vm3 = vcmp.ge.f32.partialorder %v592_v26, 0.0  ;;  %v261_v0 = vld [vmem:[#allocation3 + $0x1a8] sm:$0xff] }
  0xdb   :  { %4429 = vmatprep.subr.bf16.mxu0 %v5880_v2  ;;  %4757 = vmatprep.subr.bf16.mxu1 %v5883_v5  ;;  %v5913_v2 = vld [vmem:[#allocation11 + $0x42c] ss:$16 sps:$4 sm:$0xff]   ;;  %v197_v5 = vadd.f32 %v189_v55, %v170_v60  ;;  %v270_v13 = vmul.f32 %v6756_v8, %v261_v0  ;;  %v351_v55 = vmul.f32 %v6779_v39, %v342_v33  ;;  %v5928_v0 = vld [vmem:[#allocation11 + $0x484] ss:$16 sps:$4 sm:$0xff]  }
  0xdc   :  { %v616_v43 = vsel %vm600_vm3, %v592_v26, %v608_v30  ;;  %v179_v26 = vld [vmem:[#allocation3 + $0xe0] sm:$0xff]  ;;  %v369_v49 = vld [vmem:[#allocation3 + $0x2a8] sm:$0xff] }
  0xdd   :  { %v5625_v59 = vpack.c.bf16 %v616_v43, %v616_v43  ;;  %v224_v11 = vadd.f32 %v216_v61, %v197_v5  ;;  %v188_v35 = vmul.f32 %v6737_v54, %v179_v26  ;;  %v5922_v43 = vld [vmem:[#allocation11 + $0x464] ss:$16 sps:$4 sm:$0xff]  }
  0xde   :  { %4430 = vmatpush1.bf16.msra.mxu0 %v5878_v10  ;;  %4758 = vmatpush1.bf16.msra.mxu1 %v5881_v14  ;;  %v288_v10 = vld [vmem:[#allocation3 + $0x1e8] sm:$0xff]  ;;  %v98_v14 = vld [vmem:[#allocation3 + $0x20] sm:$0xff] }
  0xdf   :  { %4431 = vmatprep.subr.bf16.mxu0 %v5886_v15  ;;  %4759 = vmatprep.subr.bf16.mxu1 %v5889_v18  ;;  %v125_v15 = vld [vmem:[#allocation3 + $0x60] sm:$0xff]  ;;  %v297_v30 = vmul.f32 %v6763_v17, %v288_v10 }
  0xe0   :  { %v152_v18 = vld [vmem:[#allocation3 + $0xa0] sm:$0xff] }
  0xe1   :  { %v287_v5 = vld [vmem:[#allocation3 + $0x1e0] sm:$0xff] }
  0xe2   :  { %4432 = vmatpush1.bf16.msra.mxu0 %v5884_v20  ;;  %4760 = vmatpush1.bf16.msra.mxu1 %v5887_v21  ;;  %v315_v20 = vld [vmem:[#allocation3 + $0x228] sm:$0xff]  ;;  %v107_v21 = vmul.f32 %v6728_v45, %v98_v14 }
  0xe3   :  { %4433 = vmatprep.subr.bf16.mxu0 %v5892_v23  ;;  %4761 = vmatprep.subr.bf16.mxu1 %v5895_v25  ;;  %v134_v23 = vmul.f32 %v6732_v47, %v125_v15  ;;  %v161_v25 = vmul.f32 %v6734_v48, %v152_v18  ;;  %v314_v15 = vld [vmem:[#allocation3 + $0x220] sm:$0xff] }
  0xe4   :  { %v5926_v18 = vld [vmem:[#allocation11 + $0x480] ss:$16 sps:$4 sm:$0xff]   ;;  %v323_v33 = vmul.f32 %v6768_v22, %v314_v15 }
  0xe5   :  { %v142_v34 = vadd.f32 %v134_v23, %v107_v21  ;;  %v296_v23 = vmul.f32 %v6763_v17, %v287_v5  ;;  %v5941_v5 = vld [vmem:[#allocation11 + $0x4c8] ss:$16 sps:$4 sm:$0xff]  }
  0xe6   :  { %4434 = vmatpush1.bf16.msra.mxu0 %v5890_v27  ;;  %4762 = vmatpush1.bf16.msra.mxu1 %v5893_v28  ;;  %v5916_v27 = vld [vmem:[#allocation11 + $0x444] ss:$16 sps:$4 sm:$0xff]   ;;  %v5919_v28 = vld [vmem:[#allocation11 + $0x44c] ss:$16 sps:$4 sm:$0xff]  }
  0xe7   :  { %4435 = vmatprep.subr.bf16.mxu0 %v5898_v29  ;;  %4763 = vmatprep.subr.bf16.mxu1 %v5901_v32  ;;  %v251_v29 = vadd.f32 %v243_v7, %v224_v11  ;;  %v206_v32 = vld [vmem:[#allocation3 + $0x120] sm:$0xff]  ;;  %v5931_v7 = vld [vmem:[#allocation11 + $0x48c] ss:$16 sps:$4 sm:$0xff]   ;;  %v269_v11 = vmul.f32 %v6756_v8, %v260_v56 }
  0xe9   :  { %v278_v40 = vadd.f32 %v270_v13, %v251_v29  ;;  %v5937_v29 = vld [vmem:[#allocation11 + $0x4ac] ss:$16 sps:$4 sm:$0xff]  }
  0xea   :  { %4436 = vmatpush1.bf16.msra.mxu0 %v5896_v41  ;;  %4764 = vmatpush1.bf16.msra.mxu1 %v5899_v42  ;;  %v324_v41 = vmul.f32 %v6768_v22, %v315_v20  ;;  %v233_v42 = vld [vmem:[#allocation3 + $0x160] sm:$0xff]  ;;  %v450_v20 = vld [vmem:[#allocation3 + $0x368] sm:$0xff] }
  0xeb   :  { %4446 = vmatprep.subr.bf16.mxu0 %v5904_v51  ;;  %4774 = vmatprep.subr.bf16.mxu1 %v5907_v52  ;;  %v169_v51 = vadd.f32 %v161_v25, %v142_v34  ;;  %v215_v52 = vmul.f32 %v6746_v62, %v206_v32  ;;  %v305_v53 = vadd.f32 %v297_v30, %v278_v40  ;;  %v5934_v25 = vld [vmem:[#allocation11 + $0x4a4] ss:$16 sps:$4 sm:$0xff]   ;;  %v477_v30 = vld [vmem:[#allocation3 + $0x3a8] sm:$0xff] }
  0xec   :  { %v242_v61 = vmul.f32 %v6750_v3, %v233_v42  ;;  %v5935_v40 = vld [vmem:[#allocation11 + $0x4a8] ss:$16 sps:$4 sm:$0xff]  }
  0xed   :  { %4438 = vmatmul.mubr.bf16.vlgmr.msra.gmra.mrb[0].mxu0 %v5625_v59  ;;  %4766 = vmatmul.mubr.bf16.vlgmr.msra.gmra.mrb[0].mxu1 %v5625_v59  ;;  %v396_v59 = vld [vmem:[#allocation3 + $0x2e8] sm:$0xff]  ;;  %v196_v60 = vadd.f32 %v188_v35, %v169_v51  ;;  %v459_v35 = vmul.f32 %v6807_v16, %v450_v20  ;;  %v486_v51 = vmul.f32 %v6813_v24, %v477_v30  ;;  %v476_v20 = vld [vmem:[#allocation3 + $0x3a0] sm:$0xff] }
  0xee   :  { %4447 = vmatpush1.bf16.msra.mxu0 %v5902_v57  ;;  %4775 = vmatpush1.bf16.msra.mxu1 %v5905_v58  ;;  %v5920_v57 = vld [vmem:[#allocation11 + $0x460] ss:$16 sps:$4 sm:$0xff]   ;;  %v5923_v58 = vld [vmem:[#allocation11 + $0x468] ss:$16 sps:$4 sm:$0xff]   ;;  %v405_v14 = vmul.f32 %v6793_v63, %v396_v59 }
  0xef   :  { %4448 = vmatprep.subr.bf16.mxu0 %v5910_v1  ;;  %4776 = vmatprep.subr.bf16.mxu1 %v5913_v2  ;;  %v332_v1 = vadd.f32 %v324_v41, %v305_v53  ;;  %v378_v2 = vmul.f32 %v6784_v46, %v369_v49  ;;  %v223_v10 = vadd.f32 %v215_v52, %v196_v60  ;;  %v504_v41 = vld [vmem:[#allocation3 + $0x3e8] sm:$0xff]  ;;  %v395_v52 = vld [vmem:[#allocation3 + $0x2e0] sm:$0xff] }
  0xf0   :  { %v5943_v53 = vld [vmem:[#allocation11 + $0x4cc] ss:$16 sps:$4 sm:$0xff]   ;;  %v513_v59 = vmul.f32 %v6818_v31, %v504_v41  ;;  %v422_v60 = vld [vmem:[#allocation3 + $0x320] sm:$0xff] }
  0xf1   :  { %v359_v13 = vadd.f32 %v351_v55, %v332_v1  ;;  %v250_v21 = vadd.f32 %v242_v61, %v223_v10  ;;  %v531_v55 = vld [vmem:[#allocation3 + $0x428] sm:$0xff]  ;;  %v5938_v61 = vld [vmem:[#allocation11 + $0x4c0] ss:$16 sps:$4 sm:$0xff]   ;;  %v431_v15 = vmul.f32 %v6798_v4, %v422_v60  ;;  %v5958_v41 = vld [vmem:[#allocation11 + $0x524] ss:$16 sps:$4 sm:$0xff]  }
  0xf2   :  { %4449 = vmatpush1.bf16.msra.mxu0 %v5908_v9  ;;  %4777 = vmatpush1.bf16.msra.mxu1 %v5911_v19  ;;  %v423_v9 = vld [vmem:[#allocation3 + $0x328] sm:$0xff]  ;;  %v449_v10 = vld [vmem:[#allocation3 + $0x360] sm:$0xff] }
  0xf3   :  { %4450 = vmatprep.subr.bf16.mxu0 %v5916_v27  ;;  %4778 = vmatprep.subr.bf16.mxu1 %v5919_v28  ;;  %v5929_v19 = vld [vmem:[#allocation11 + $0x488] ss:$16 sps:$4 sm:$0xff]   ;;  %v386_v26 = vadd.f32 %v378_v2, %v359_v13  ;;  %v432_v27 = vmul.f32 %v6798_v4, %v423_v9  ;;  %v341_v28 = vld [vmem:[#allocation3 + $0x260] sm:$0xff]  ;;  %v277_v32 = vadd.f32 %v269_v11, %v250_v21  ;;  %v5949_v13 = vld [vmem:[#allocation11 + $0x4ec] ss:$16 sps:$4 sm:$0xff]  }
  0xf4   :  { %v404_v2 = vmul.f32 %v6793_v63, %v395_v52  ;;  %v540_v9 = vmul.f32 %v6823_v38, %v531_v55  ;;  %v5946_v11 = vld [vmem:[#allocation11 + $0x4e4] ss:$16 sps:$4 sm:$0xff]   ;;  %v5956_v52 = vld [vmem:[#allocation11 + $0x520] ss:$16 sps:$4 sm:$0xff]  }
  0xf5   :  { %v413_v34 = vadd.f32 %v405_v14, %v386_v26  ;;  %v304_v42 = vadd.f32 %v296_v23, %v277_v32  ;;  %v458_v23 = vmul.f32 %v6807_v16, %v449_v10  ;;  %v5947_v26 = vld [vmem:[#allocation11 + $0x4e8] ss:$16 sps:$4 sm:$0xff]   ;;  %v485_v32 = vmul.f32 %v6813_v24, %v476_v20  ;;  %v5973_v10 = vld [vmem:[#allocation11 + $0x56c] ss:$16 sps:$4 sm:$0xff]  }
  0xf6   :  { %4451 = vmatpush1.bf16.msra.mxu0 %v5914_v36  ;;  %4779 = vmatpush1.bf16.msra.mxu1 %v5917_v37  ;;  %v368_v36 = vld [vmem:[#allocation3 + $0x2a0] sm:$0xff]  ;;  %v5977_v20 = vld [vmem:[#allocation11 + $0x588] ss:$16 sps:$4 sm:$0xff]  }
  0xf7   :  { %4452 = vmatprep.subr.bf16.mxu0 %v5922_v43  ;;  %4780 = vmatprep.subr.bf16.mxu1 %v5925_v44  ;;  %v5932_v37 = vld [vmem:[#allocation11 + $0x4a0] ss:$16 sps:$4 sm:$0xff]   ;;  %v350_v43 = vmul.f32 %v6779_v39, %v341_v28  ;;  %v5940_v44 = vld [vmem:[#allocation11 + $0x4c4] ss:$16 sps:$4 sm:$0xff]   ;;  %v440_v49 = vadd.f32 %v432_v27, %v413_v34  ;;  %v331_v56 = vadd.f32 %v323_v33, %v304_v42  ;;  %v5961_v42 = vld [vmem:[#allocation11 + $0x52c] ss:$16 sps:$4 sm:$0xff]  }
  0xf8   :  { %v5952_v28 = vld [vmem:[#allocation11 + $0x504] ss:$16 sps:$4 sm:$0xff]  }
  0xf9   :  { %v358_v1 = vadd.f32 %v350_v43, %v331_v56  ;;  %v503_v34 = vld [vmem:[#allocation3 + $0x3e0] sm:$0xff] }
  0xfa   :  { %4453 = vmatpush1.bf16.msra.mxu0 %v5920_v57  ;;  %4781 = vmatpush1.bf16.msra.mxu1 %v5923_v58  ;;  %v377_v57 = vmul.f32 %v6784_v46, %v368_v36  ;;  %v467_v58 = vadd.f32 %v459_v35, %v440_v49  ;;  %v5950_v36 = vld [vmem:[#allocation11 + $0x500] ss:$16 sps:$4 sm:$0xff]   ;;  %v5964_v56 = vld [vmem:[#allocation11 + $0x544] ss:$16 sps:$4 sm:$0xff]  }
  0xfb   :  { %4454 = vmatprep.subr.bf16.mxu0 %v5928_v0  ;;  %4782 = vmatprep.subr.bf16.mxu1 %v5931_v7  ;;  %v558_v0 = vld [vmem:[#allocation3 + $0x468] sm:$0xff] }
  0xfc   :  { %v494_v7 = vadd.f32 %v486_v51, %v467_v58  ;;  %v385_v14 = vadd.f32 %v377_v57, %v358_v1  ;;  %v530_v51 = vld [vmem:[#allocation3 + $0x420] sm:$0xff]  ;;  %v5967_v57 = vld [vmem:[#allocation11 + $0x54c] ss:$16 sps:$4 sm:$0xff]  }
  0xfd   :  { %v5962_v1 = vld [vmem:[#allocation11 + $0x540] ss:$16 sps:$4 sm:$0xff]  }
  0xfe   :  { %4455 = vmatpush1.bf16.msra.mxu0 %v5926_v18  ;;  %4783 = vmatpush1.bf16.msra.mxu1 %v5929_v19  ;;  %v521_v18 = vadd.f32 %v513_v59, %v494_v7  ;;  %v567_v19 = vmul.f32 %v6828_v50, %v558_v0  ;;  %v412_v21 = vadd.f32 %v404_v2, %v385_v14  ;;  %v5965_v2 = vld [vmem:[#allocation11 + $0x548] ss:$16 sps:$4 sm:$0xff]  }
  0xff   :  { %4456 = vmatprep.subr.bf16.mxu0 %v5934_v25  ;;  %4784 = vmatprep.subr.bf16.mxu1 %v5937_v29  ;;  %v5944_v25 = vld [vmem:[#allocation11 + $0x4e0] ss:$16 sps:$4 sm:$0xff]   ;;  %v5955_v29 = vld [vmem:[#allocation11 + $0x50c] ss:$16 sps:$4 sm:$0xff]   ;;  %v539_v59 = vmul.f32 %v6823_v38, %v530_v51  ;;  %v5989_v51 = vld [vmem:[#allocation11 + $0x5c8] ss:$16 sps:$4 sm:$0xff]  }
 0x100   :  { %v548_v27 = vadd.f32 %v540_v9, %v521_v18  ;;  %v439_v30 = vadd.f32 %v431_v15, %v412_v21  ;;  %v5976_v15 = vld [vmem:[#allocation11 + $0x584] ss:$16 sps:$4 sm:$0xff]   ;;  %v5979_v18 = vld [vmem:[#allocation11 + $0x58c] ss:$16 sps:$4 sm:$0xff]  }
 0x101   :  { %v5982_v21 = vld [vmem:[#allocation11 + $0x5a4] ss:$16 sps:$4 sm:$0xff]  }
 0x102   :  { %4457 = vmatpush1.bf16.msra.mxu0 %v5932_v37  ;;  %4785 = vmatpush1.bf16.msra.mxu1 %v5935_v40  ;;  %v575_v33 = vadd.f32 %v567_v19, %v548_v27  ;;  %v466_v35 = vadd.f32 %v458_v23, %v439_v30  ;;  %v5953_v37 = vld [vmem:[#allocation11 + $0x508] ss:$16 sps:$4 sm:$0xff]   ;;  %v5974_v19 = vld [vmem:[#allocation11 + $0x580] ss:$16 sps:$4 sm:$0xff]  }
 0x103   :  { %4458 = vmatprep.subr.bf16.mxu0 %v5940_v44  ;;  %4786 = vmatprep.subr.bf16.mxu1 %v5943_v53  ;;  %v512_v44 = vmul.f32 %v6818_v31, %v503_v34  ;;  %v5959_v53 = vld [vmem:[#allocation11 + $0x528] ss:$16 sps:$4 sm:$0xff]  }
 0x104   :  { %v585_v40 = vmul.f32 %v6835_v6, %v575_v33  ;;  %v493_v43 = vadd.f32 %v485_v32, %v466_v35  ;;  %v128_v27 = vld [vmem:[#allocation3 + $0x78] sm:$0xff]  ;;  %v5980_v35 = vld [vmem:[#allocation11 + $0x5a0] ss:$16 sps:$4 sm:$0xff]  }
 0x105   :  { %v155_v30 = vld [vmem:[#allocation3 + $0xb8] sm:$0xff] }
 0x106   :  { %4459 = vmatpush1.bf16.msra.mxu0 %v5938_v61  ;;  %4787 = vmatpush1.bf16.msra.mxu1 %v5941_v5  ;;  %v595_v49 = vadd.f32 %v6838_v12, %v585_v40  ;;  %v520_v58 = vadd.f32 %v512_v44, %v493_v43  ;;  %v557_v61 = vld [vmem:[#allocation3 + $0x460] sm:$0xff]  ;;  %v182_v32 = vld [vmem:[#allocation3 + $0xf8] sm:$0xff]  ;;  %v164_v33 = vmul.f32 %v6734_v48, %v155_v30 }
 0x107   :  { %4460 = vmatprep.subr.bf16.mxu0 %v5946_v11  ;;  %4788 = vmatprep.subr.bf16.mxu1 %v5949_v13  ;;  %v5970_v5 = vld [vmem:[#allocation11 + $0x564] ss:$16 sps:$4 sm:$0xff]   ;;  %v566_v9 = vmul.f32 %v6828_v50, %v557_v61  ;;  %v5968_v11 = vld [vmem:[#allocation11 + $0x560] ss:$16 sps:$4 sm:$0xff]   ;;  %v5971_v13 = vld [vmem:[#allocation11 + $0x568] ss:$16 sps:$4 sm:$0xff]  }
 0x108   :  { %vm603_vm4 = vcmp.ge.f32.partialorder %v595_v49, 0.0  ;;  %v611_v55 = vmul.f32 0.3, %v595_v49  ;;  %v547_v7 = vadd.f32 %v539_v59, %v520_v58  ;;  %v209_v34 = vld [vmem:[#allocation3 + $0x138] sm:$0xff] }
 0x109   :  { %v5991_v43 = vld [vmem:[#allocation11 + $0x5cc] ss:$16 sps:$4 sm:$0xff]  }
 0x10a   :  { %4461 = vmatpush1.bf16.msra.mxu0 %v5944_v25  ;;  %4789 = vmatpush1.bf16.msra.mxu1 %v5947_v26  ;;  %v619_v60 = vsel %vm603_vm4, %v595_v49, %v611_v55  ;;  %v574_v14 = vadd.f32 %v566_v9, %v547_v7  ;;  %v5985_v25 = vld [vmem:[#allocation11 + $0x5ac] ss:$16 sps:$4 sm:$0xff]   ;;  %v5986_v49 = vld [vmem:[#allocation11 + $0x5c0] ss:$16 sps:$4 sm:$0xff]  }
 0x10b   :  { %4462 = vmatprep.subr.bf16.mxu0 %v5952_v28  ;;  %4790 = vmatprep.subr.bf16.mxu1 %v5955_v29  ;;  %v5628_v0 = vpack.c.bf16 %v619_v60, %v619_v60  ;;  %v101_v26 = vld [vmem:[#allocation3 + $0x38] sm:$0xff]  ;;  %v137_v29 = vmul.f32 %v6732_v47, %v128_v27  ;;  %v154_v7 = vld [vmem:[#allocation3 + $0xb0] sm:$0xff] }
 0x10c   :  { %v584_v23 = vmul.f32 %v6835_v6, %v574_v14  ;;  %v110_v28 = vmul.f32 %v6728_v45, %v101_v26  ;;  %v236_v44 = vld [vmem:[#allocation3 + $0x178] sm:$0xff]  ;;  %v181_v14 = vld [vmem:[#allocation3 + $0xf0] sm:$0xff] }
 0x10d   :  { %4478 = vmatprep.mubr.bf16.mxu0 %v5628_v0  ;;  %4806 = vmatprep.mubr.bf16.mxu1 %v5628_v0  ;;  %v263_v55 = vld [vmem:[#allocation3 + $0x1b8] sm:$0xff]  ;;  %v245_v59 = vmul.f32 %v6750_v3, %v236_v44 }
 0x10e   :  { %4463 = vmatpush1.bf16.msra.mxu0 %v5950_v36  ;;  %4791 = vmatpush1.bf16.msra.mxu1 %v5953_v37  ;;  %v5983_v36 = vld [vmem:[#allocation11 + $0x5a8] ss:$16 sps:$4 sm:$0xff]   ;;  %v594_v37 = vadd.f32 %v6838_v12, %v584_v23  ;;  %v145_v40 = vadd.f32 %v137_v29, %v110_v28  ;;  %v5997_v60 = vld [vmem:[#allocation11 + $0x5ec] ss:$16 sps:$4 sm:$0xff]   ;;  %v208_v23 = vld [vmem:[#allocation3 + $0x130] sm:$0xff] }
 0x10f   :  { %4464 = vmatprep.subr.bf16.mxu0 %v5958_v41  ;;  %4792 = vmatprep.subr.bf16.mxu1 %v5961_v42  ;;  %v191_v41 = vmul.f32 %v6737_v54, %v182_v32  ;;  %v5988_v42 = vld [vmem:[#allocation11 + $0x5c4] ss:$16 sps:$4 sm:$0xff]   ;;  %v290_v61 = vld [vmem:[#allocation3 + $0x1f8] sm:$0xff] }
 0x110   :  { %vm602_vm5 = vcmp.ge.f32.partialorder %v594_v37, 0.0  ;;  %v317_v9 = vld [vmem:[#allocation3 + $0x238] sm:$0xff]  ;;  %v235_v32 = vld [vmem:[#allocation3 + $0x170] sm:$0xff] }
 0x111   :  { %v6003_v26 = vld [vmem:[#allocation11 + $0x60c] ss:$16 sps:$4 sm:$0xff]   ;;  %v6001_v28 = vld [vmem:[#allocation11 + $0x608] ss:$16 sps:$4 sm:$0xff]   ;;  %v326_v30 = vmul.f32 %v6768_v22, %v317_v9 }
 0x112   :  { %4465 = vmatpush1.bf16.msra.mxu0 %v5956_v52  ;;  %4793 = vmatpush1.bf16.msra.mxu1 %v5959_v53  ;;  %v172_v52 = vadd.f32 %v164_v33, %v145_v40  ;;  %v218_v53 = vmul.f32 %v6746_v62, %v209_v34  ;;  %v6006_v34 = vld [vmem:[#allocation11 + $0x624] ss:$16 sps:$4 sm:$0xff]   ;;  %v217_v40 = vmul.f32 %v6746_v62, %v208_v23  ;;  %v6013_v9 = vld [vmem:[#allocation11 + $0x648] ss:$16 sps:$4 sm:$0xff]  }
 0x113   :  { %4466 = vmatprep.subr.bf16.mxu0 %v5964_v56  ;;  %4794 = vmatprep.subr.bf16.mxu1 %v5967_v57  ;;  %v5994_v56 = vld [vmem:[#allocation11 + $0x5e4] ss:$16 sps:$4 sm:$0xff]   ;;  %v610_v57 = vmul.f32 0.3, %v594_v37  ;;  %v506_v23 = vld [vmem:[#allocation3 + $0x3f8] sm:$0xff] }
 0x114   :  { %v199_v58 = vadd.f32 %v191_v41, %v172_v52  ;;  %v6007_v52 = vld [vmem:[#allocation11 + $0x628] ss:$16 sps:$4 sm:$0xff]   ;;  %v6012_v62 = vld [vmem:[#allocation11 + $0x644] ss:$16 sps:$4 sm:$0xff]  }
 0x116   :  { %4467 = vmatpush1.bf16.msra.mxu0 %v5962_v1  ;;  %4795 = vmatpush1.bf16.msra.mxu1 %v5965_v2  ;;  %v226_v0 = vadd.f32 %v218_v53, %v199_v58  ;;  %v272_v1 = vmul.f32 %v6756_v8, %v263_v55  ;;  %v100_v2 = vld [vmem:[#allocation3 + $0x30] sm:$0xff]  ;;  %v425_v58 = vld [vmem:[#allocation3 + $0x338] sm:$0xff] }
 0x117   :  { %4468 = vmatprep.subr.bf16.mxu0 %v5970_v5  ;;  %4796 = vmatprep.subr.bf16.mxu1 %v5973_v10  ;;  %v127_v5 = vld [vmem:[#allocation3 + $0x70] sm:$0xff]  ;;  %v109_v10 = vmul.f32 %v6728_v45, %v100_v2  ;;  %v344_v45 = vld [vmem:[#allocation3 + $0x278] sm:$0xff] }
 0x11a   :  { %4469 = vmatpush1.bf16.msra.mxu0 %v5968_v11  ;;  %4797 = vmatpush1.bf16.msra.mxu1 %v5971_v13  ;;  %v136_v11 = vmul.f32 %v6732_v47, %v127_v5  ;;  %v163_v13 = vmul.f32 %v6734_v48, %v154_v7  ;;  %v190_v47 = vmul.f32 %v6737_v54, %v181_v14  ;;  %v5998_v48 = vld [vmem:[#allocation11 + $0x600] ss:$16 sps:$4 sm:$0xff]   ;;  %v398_v54 = vld [vmem:[#allocation3 + $0x2f8] sm:$0xff]  ;;  %v6018_v14 = vld [vmem:[#allocation11 + $0x664] ss:$16 sps:$4 sm:$0xff]  }
 0x11b   :  { %4470 = vmatprep.subr.bf16.mxu0 %v5976_v15  ;;  %4798 = vmatprep.subr.bf16.mxu1 %v5979_v18  ;;  %v5992_v15 = vld [vmem:[#allocation11 + $0x5e0] ss:$16 sps:$4 sm:$0xff]   ;;  %v5995_v18 = vld [vmem:[#allocation11 + $0x5e8] ss:$16 sps:$4 sm:$0xff]  }
 0x11c   :  { %v144_v27 = vadd.f32 %v136_v11, %v109_v10  ;;  %v6010_v7 = vld [vmem:[#allocation11 + $0x640] ss:$16 sps:$4 sm:$0xff]   ;;  %v434_v11 = vmul.f32 %v6798_v4, %v425_v58 }
 0x11e   :  { %4471 = vmatpush1.bf16.msra.mxu0 %v5974_v19  ;;  %4799 = vmatpush1.bf16.msra.mxu1 %v5977_v20  ;;  %v618_v19 = vsel %vm602_vm5, %v594_v37, %v610_v57  ;;  %v253_v20 = vadd.f32 %v245_v59, %v226_v0  ;;  %v171_v37 = vadd.f32 %v163_v13, %v144_v27  ;;  %v6015_v57 = vld [vmem:[#allocation11 + $0x64c] ss:$16 sps:$4 sm:$0xff]   ;;  %v343_v13 = vld [vmem:[#allocation3 + $0x270] sm:$0xff]  ;;  %v6019_v27 = vld [vmem:[#allocation11 + $0x668] ss:$16 sps:$4 sm:$0xff]  }
 0x11f   :  { %4472 = vmatprep.subr.bf16.mxu0 %v5982_v21  ;;  %4800 = vmatprep.subr.bf16.mxu1 %v5985_v25  ;;  %v299_v21 = vmul.f32 %v6763_v17, %v290_v61  ;;  %v6000_v25 = vld [vmem:[#allocation11 + $0x604] ss:$16 sps:$4 sm:$0xff]   ;;  %v5627_v33 = vpack.c.bf16 %v618_v19, %v618_v19  ;;  %v407_v0 = vmul.f32 %v6793_v63, %v398_v54 }
 0x120   :  { %v280_v29 = vadd.f32 %v272_v1, %v253_v20  ;;  %v198_v44 = vadd.f32 %v190_v47, %v171_v37  ;;  %v452_v1 = vld [vmem:[#allocation3 + $0x378] sm:$0xff]  ;;  %v6022_v37 = vld [vmem:[#allocation11 + $0x680] ss:$16 sps:$4 sm:$0xff]  }
 0x122   :  { %4473 = vmatpush1.bf16.msra.mxu0 %v5980_v35  ;;  %4801 = vmatpush1.bf16.msra.mxu1 %v5983_v36  ;;  %v6009_v35 = vld [vmem:[#allocation11 + $0x62c] ss:$16 sps:$4 sm:$0xff]   ;;  %v307_v41 = vadd.f32 %v299_v21, %v280_v29  ;;  %v225_v59 = vadd.f32 %v217_v40, %v198_v44  ;;  %v461_v21 = vmul.f32 %v6807_v16, %v452_v1  ;;  %v6042_v1 = vld [vmem:[#allocation11 + $0x6e4] ss:$16 sps:$4 sm:$0xff]  }
 0x123   :  { %4474 = vmatprep.subr.bf16.mxu0 %v5988_v42  ;;  %4802 = vmatprep.subr.bf16.mxu1 %v5991_v43  ;;  %v371_v36 = vld [vmem:[#allocation3 + $0x2b8] sm:$0xff]  ;;  %v353_v42 = vmul.f32 %v6779_v39, %v344_v45  ;;  %v262_v43 = vld [vmem:[#allocation3 + $0x1b0] sm:$0xff] }
 0x124   :  { %v334_v53 = vadd.f32 %v326_v30, %v307_v41  ;;  %v380_v55 = vmul.f32 %v6784_v46, %v371_v36  ;;  %v6016_v45 = vld [vmem:[#allocation11 + $0x660] ss:$16 sps:$4 sm:$0xff]   ;;  %v6027_v29 = vld [vmem:[#allocation11 + $0x68c] ss:$16 sps:$4 sm:$0xff]  }
 0x125   :  { %v397_v36 = vld [vmem:[#allocation3 + $0x2f0] sm:$0xff]  ;;  %v6033_v44 = vld [vmem:[#allocation11 + $0x6ac] ss:$16 sps:$4 sm:$0xff]  }
 0x126   :  { %4475 = vmatpush1.bf16.msra.mxu0 %v5986_v49  ;;  %4803 = vmatpush1.bf16.msra.mxu1 %v5989_v51  ;;  %v244_v49 = vmul.f32 %v6750_v3, %v235_v32  ;;  %v6004_v51 = vld [vmem:[#allocation11 + $0x620] ss:$16 sps:$4 sm:$0xff]   ;;  %v361_v61 = vadd.f32 %v353_v42, %v334_v53  ;;  %v6025_v42 = vld [vmem:[#allocation11 + $0x688] ss:$16 sps:$4 sm:$0xff]  }
 0x127   :  { %4476 = vmatprep.subr.bf16.mxu0 %v5994_v56  ;;  %4804 = vmatprep.subr.bf16.mxu1 %v5997_v60  ;;  %v289_v56 = vld [vmem:[#allocation3 + $0x1f0] sm:$0xff]  ;;  %v271_v60 = vmul.f32 %v6756_v8, %v262_v43  ;;  %v6021_v8 = vld [vmem:[#allocation11 + $0x66c] ss:$16 sps:$4 sm:$0xff]  }
 0x128   :  { %v316_v3 = vld [vmem:[#allocation3 + $0x230] sm:$0xff]  ;;  %v252_v2 = vadd.f32 %v244_v49, %v225_v59  ;;  %v298_v5 = vmul.f32 %v6763_v17, %v289_v56  ;;  %v388_v10 = vadd.f32 %v380_v55, %v361_v61  ;;  %v6031_v56 = vld [vmem:[#allocation11 + $0x6a8] ss:$16 sps:$4 sm:$0xff]  }
 0x129   :  { %v325_v19 = vmul.f32 %v6768_v22, %v316_v3  ;;  %v533_v22 = vld [vmem:[#allocation3 + $0x438] sm:$0xff]  ;;  %v6030_v43 = vld [vmem:[#allocation11 + $0x6a4] ss:$16 sps:$4 sm:$0xff]   ;;  %v6028_v53 = vld [vmem:[#allocation11 + $0x6a0] ss:$16 sps:$4 sm:$0xff]  }
 0x12a   :  { %4477 = vmatpush1.bf16.msra.mxu0 %v5992_v15  ;;  %4805 = vmatpush1.bf16.msra.mxu1 %v5995_v18  ;;  %v479_v15 = vld [vmem:[#allocation3 + $0x3b8] sm:$0xff]  ;;  %v279_v18 = vadd.f32 %v271_v60, %v252_v2  ;;  %v415_v20 = vadd.f32 %v407_v0, %v388_v10  ;;  %v542_v41 = vmul.f32 %v6823_v38, %v533_v22  ;;  %v451_v61 = vld [vmem:[#allocation3 + $0x370] sm:$0xff] }
 0x12b   :  { %4487 = vmatprep.subr.bf16.mxu0 %v6000_v25  ;;  %4815 = vmatprep.subr.bf16.mxu1 %v6003_v26  ;;  %v352_v25 = vmul.f32 %v6779_v39, %v343_v13  ;;  %v370_v26 = vld [vmem:[#allocation3 + $0x2b0] sm:$0xff]  ;;  %v6037_v3 = vld [vmem:[#allocation11 + $0x6c8] ss:$16 sps:$4 sm:$0xff]   ;;  %v6045_v2 = vld [vmem:[#allocation11 + $0x6ec] ss:$16 sps:$4 sm:$0xff]  }
 0x12c   :  { %v306_v17 = vadd.f32 %v298_v5, %v279_v18  ;;  %v442_v47 = vadd.f32 %v434_v11, %v415_v20  ;;  %v6034_v0 = vld [vmem:[#allocation11 + $0x6c0] ss:$16 sps:$4 sm:$0xff]   ;;  %v6043_v13 = vld [vmem:[#allocation11 + $0x6e8] ss:$16 sps:$4 sm:$0xff]  }
 0x12d   :  { %4479 = vmatmul.mubr.bf16.vlgmr.msra.gmra.mrb[0].mxu0 %v5627_v33  ;;  %4807 = vmatmul.mubr.bf16.vlgmr.msra.gmra.mrb[0].mxu1 %v5627_v33  ;;  %v515_v33 = vmul.f32 %v6818_v31, %v506_v23  ;;  %v478_v10 = vld [vmem:[#allocation3 + $0x3b0] sm:$0xff]  ;;  %v6049_v23 = vld [vmem:[#allocation11 + $0x708] ss:$16 sps:$4 sm:$0xff]  }
 0x12e   :  { %4488 = vmatpush1.bf16.msra.mxu0 %v5998_v48  ;;  %4816 = vmatpush1.bf16.msra.mxu1 %v6001_v28  ;;  %v488_v48 = vmul.f32 %v6813_v24, %v479_v15  ;;  %v6024_v28 = vld [vmem:[#allocation11 + $0x684] ss:$16 sps:$4 sm:$0xff]   ;;  %v333_v30 = vadd.f32 %v325_v19, %v306_v17  ;;  %v469_v32 = vadd.f32 %v461_v21, %v442_v47  ;;  %v6040_v11 = vld [vmem:[#allocation11 + $0x6e0] ss:$16 sps:$4 sm:$0xff]   ;;  %v6051_v19 = vld [vmem:[#allocation11 + $0x70c] ss:$16 sps:$4 sm:$0xff]  }
 0x12f   :  { %4489 = vmatprep.subr.bf16.mxu0 %v6006_v34  ;;  %4817 = vmatprep.subr.bf16.mxu1 %v6009_v35  ;;  %v560_v34 = vld [vmem:[#allocation3 + $0x478] sm:$0xff]  ;;  %v379_v35 = vmul.f32 %v6784_v46, %v370_v26  ;;  %v424_v46 = vld [vmem:[#allocation3 + $0x330] sm:$0xff]  ;;  %v487_v18 = vmul.f32 %v6813_v24, %v478_v10 }
 0x130   :  { %v360_v39 = vadd.f32 %v352_v25, %v333_v30  ;;  %v496_v40 = vadd.f32 %v488_v48, %v469_v32  ;;  %v569_v54 = vmul.f32 %v6828_v50, %v560_v34  ;;  %v433_v60 = vmul.f32 %v6798_v4, %v424_v46  ;;  %v505_v21 = vld [vmem:[#allocation3 + $0x3f0] sm:$0xff]  ;;  %v6057_v26 = vld [vmem:[#allocation11 + $0x72c] ss:$16 sps:$4 sm:$0xff]   ;;  %v6055_v47 = vld [vmem:[#allocation11 + $0x728] ss:$16 sps:$4 sm:$0xff]  }
 0x131   :  { %v6054_v17 = vld [vmem:[#allocation11 + $0x724] ss:$16 sps:$4 sm:$0xff]   ;;  %v514_v24 = vmul.f32 %v6818_v31, %v505_v21  ;;  %v6058_v30 = vld [vmem:[#allocation11 + $0x740] ss:$16 sps:$4 sm:$0xff]   ;;  %v6975_v32 = vstv %s6962_s28  ;;  %v6061_v34 = vld [vmem:[#allocation11 + $0x748] ss:$16 sps:$4 sm:$0xff]   ;;  %v7019_v21 = vstv %s6996_s3 }
 0x132   :  { %4490 = vmatpush1.bf16.msra.mxu0 %v6004_v51  ;;  %4818 = vmatpush1.bf16.msra.mxu1 %v6007_v52  ;;  %v523_v49 = vadd.f32 %v515_v33, %v496_v40  ;;  %v387_v51 = vadd.f32 %v379_v35, %v360_v39  ;;  %v406_v52 = vmul.f32 %v6793_v63, %v397_v36  ;;  %v6060_v48 = vld [vmem:[#allocation11 + $0x744] ss:$16 sps:$4 sm:$0xff]   ;;  %v6978_v33 = vstv %s6964_s29  ;;  %v686_v40 = vld [vmem:[#allocation3 + $0x48] sm:$0xff] }
 0x133   :  { %4491 = vmatprep.subr.bf16.mxu0 %v6012_v62  ;;  %4819 = vmatprep.subr.bf16.mxu1 %v6015_v57  ;;  %v6036_v62 = vld [vmem:[#allocation11 + $0x6c4] ss:$16 sps:$4 sm:$0xff]   ;;  %v6039_v57 = vld [vmem:[#allocation11 + $0x6cc] ss:$16 sps:$4 sm:$0xff]   ;;  %v6982_v35 = vstv %s5065_s4 }
 0x134   :  { %v550_v55 = vadd.f32 %v542_v41, %v523_v49  ;;  %v414_v59 = vadd.f32 %v406_v52, %v387_v51  ;;  %v559_v22 = vld [vmem:[#allocation3 + $0x470] sm:$0xff]  ;;  %v6986_v41 = vstv %s6967_s30  ;;  %v738_v49 = vld [vmem:[#allocation3 + $0xc8] sm:$0xff] }
 0x135   :  { %v6066_v39 = vld [vmem:[#allocation11 + $0x764] ss:$16 sps:$4 sm:$0xff]   ;;  %v568_v36 = vmul.f32 %v6828_v50, %v559_v22  ;;  %v764_v52 = vld [vmem:[#allocation3 + $0x108] sm:$0xff]  ;;  %v6994_v50 = vstv %s6969_s7 }
 0x136   :  { %4492 = vmatpush1.bf16.msra.mxu0 %v6010_v7  ;;  %4820 = vmatpush1.bf16.msra.mxu1 %v6013_v9  ;;  %v577_v58 = vadd.f32 %v569_v54, %v550_v55  ;;  %v441_v7 = vadd.f32 %v433_v60, %v414_v59  ;;  %v460_v9 = vmul.f32 %v6807_v16, %v451_v61  ;;  %v6046_v16 = vld [vmem:[#allocation11 + $0x700] ss:$16 sps:$4 sm:$0xff]   ;;  %v6072_v59 = vld [vmem:[#allocation11 + $0x784] ss:$16 sps:$4 sm:$0xff]   ;;  %v6075_v60 = vld [vmem:[#allocation11 + $0x78c] ss:$16 sps:$4 sm:$0xff]  }
 0x137   :  { %4493 = vmatprep.subr.bf16.mxu0 %v6018_v14  ;;  %4821 = vmatprep.subr.bf16.mxu1 %v6021_v8  ;;  %v6048_v14 = vld [vmem:[#allocation11 + $0x704] ss:$16 sps:$4 sm:$0xff]   ;;  %v695_v54 = vmul.f32 %v6978_v33, %v686_v40  ;;  %v6064_v55 = vld [vmem:[#allocation11 + $0x760] ss:$16 sps:$4 sm:$0xff]   ;;  %v6081_v10 = vld [vmem:[#allocation11 + $0x7ac] ss:$16 sps:$4 sm:$0xff]   ;;  %v7036_v40 = vstv %s7008_s5 }
 0x138   :  { %v587_v63 = vmul.f32 %v6835_v6, %v577_v58  ;;  %v468_v15 = vadd.f32 %v460_v9, %v441_v7  ;;  %v7002_v58 = vstv %s6971_s8  ;;  %v6084_v22 = vld [vmem:[#allocation11 + $0x7c4] ss:$16 sps:$4 sm:$0xff]  }
 0x13a   :  { %4494 = vmatpush1.bf16.msra.mxu0 %v6016_v45  ;;  %4822 = vmatpush1.bf16.msra.mxu1 %v6019_v27  ;;  %v597_v5 = vadd.f32 %v6838_v12, %v587_v63  ;;  %v495_v25 = vadd.f32 %v487_v18, %v468_v15  ;;  %v532_v45 = vld [vmem:[#allocation3 + $0x430] sm:$0xff]  ;;  %v659_v15 = vld [vmem:[#allocation3] sm:$0xff] }
 0x13b   :  { %4495 = vmatprep.subr.bf16.mxu0 %v6024_v28  ;;  %4823 = vmatprep.subr.bf16.mxu1 %v6027_v29  ;;  %v6052_v27 = vld [vmem:[#allocation11 + $0x720] ss:$16 sps:$4 sm:$0xff]   ;;  %v541_v31 = vmul.f32 %v6823_v38, %v532_v45  ;;  %v6063_v29 = vld [vmem:[#allocation11 + $0x74c] ss:$16 sps:$4 sm:$0xff]  }
 0x13c   :  { %vm605_vm6 = vcmp.ge.f32.partialorder %v597_v5, 0.0  ;;  %v613_v4 = vmul.f32 0.3, %v597_v5  ;;  %v522_v28 = vadd.f32 %v514_v24, %v495_v25  ;;  %v6070_v63 = vld [vmem:[#allocation11 + $0x780] ss:$16 sps:$4 sm:$0xff]  }
 0x13d   :  { %v685_v18 = vld [vmem:[#allocation3 + $0x40] sm:$0xff] }
 0x13e   :  { %4496 = vmatpush1.bf16.msra.mxu0 %v6022_v37  ;;  %4824 = vmatpush1.bf16.msra.mxu1 %v6025_v42  ;;  %v621_v8 = vsel %vm605_vm6, %v597_v5, %v613_v4  ;;  %v549_v38 = vadd.f32 %v541_v31, %v522_v28  ;;  %v660_v37 = vld [vmem:[#allocation3 + $0x8] sm:$0xff]  ;;  %v6078_v5 = vld [vmem:[#allocation11 + $0x7a4] ss:$16 sps:$4 sm:$0xff]   ;;  %v6076_v25 = vld [vmem:[#allocation11 + $0x7a0] ss:$16 sps:$4 sm:$0xff]   ;;  %v7029_v28 = vstv %s6999_s11 }
 0x13f   :  { %4497 = vmatprep.subr.bf16.mxu0 %v6030_v43  ;;  %4825 = vmatprep.subr.bf16.mxu1 %v6033_v44  ;;  %v5630_v20 = vpack.c.bf16 %v621_v8, %v621_v8  ;;  %v6069_v42 = vld [vmem:[#allocation11 + $0x76c] ss:$16 sps:$4 sm:$0xff]   ;;  %v669_v43 = vmul.f32 %v6975_v32, %v660_v37  ;;  %v763_v45 = vld [vmem:[#allocation3 + $0x100] sm:$0xff] }
 0x140   :  { %v712_v44 = vld [vmem:[#allocation3 + $0x88] sm:$0xff] }
 0x141   :  { %4519 = vmatprep.mubr.bf16.mxu0 %v5630_v20  ;;  %4847 = vmatprep.mubr.bf16.mxu1 %v5630_v20  ;;  %v721_v51 = vmul.f32 %v6982_v35, %v712_v44  ;;  %v703_v46 = vadd.f32 %v695_v54, %v669_v43  ;;  %v868_v20 = vld [vmem:[#allocation3 + $0x208] sm:$0xff]  ;;  %v772_v43 = vmul.f32 %v6994_v50, %v763_v45  ;;  %v6090_v54 = vld [vmem:[#allocation11 + $0x7e4] ss:$16 sps:$4 sm:$0xff]  }
 0x142   :  { %4498 = vmatpush1.bf16.msra.mxu0 %v6028_v53  ;;  %4826 = vmatpush1.bf16.msra.mxu1 %v6031_v56  ;;  %v747_v53 = vmul.f32 %v6986_v41, %v738_v49  ;;  %v6067_v56 = vld [vmem:[#allocation11 + $0x768] ss:$16 sps:$4 sm:$0xff]  }
 0x143   :  { %4499 = vmatprep.subr.bf16.mxu0 %v6036_v62  ;;  %4827 = vmatprep.subr.bf16.mxu1 %v6039_v57  ;;  %v576_v62 = vadd.f32 %v568_v36, %v549_v38  ;;  %v790_v57 = vld [vmem:[#allocation3 + $0x148] sm:$0xff]  ;;  %v729_v61 = vadd.f32 %v721_v51, %v703_v46  ;;  %v789_v38 = vld [vmem:[#allocation3 + $0x140] sm:$0xff]  ;;  %v7045_v46 = vstv %s7015_s12 }
 0x144   :  { %v799_v9 = vmul.f32 %v7002_v58, %v790_v57  ;;  %v6082_v36 = vld [vmem:[#allocation11 + $0x7c0] ss:$16 sps:$4 sm:$0xff]   ;;  %v920_v37 = vld [vmem:[#allocation3 + $0x288] sm:$0xff] }
 0x145   :  { %v755_v7 = vadd.f32 %v747_v53, %v729_v61  ;;  %v586_v4 = vmul.f32 %v6835_v6, %v576_v62  ;;  %v668_v6 = vmul.f32 %v6975_v32, %v659_v15  ;;  %v929_v57 = vmul.f32 %v7036_v40, %v920_v37  ;;  %v6091_v61 = vld [vmem:[#allocation11 + $0x7e8] ss:$16 sps:$4 sm:$0xff]  }
 0x146   :  { %4500 = vmatpush1.bf16.msra.mxu0 %v6034_v0  ;;  %4828 = vmatpush1.bf16.msra.mxu1 %v6037_v3  ;;  %v773_v0 = vmul.f32 %v6994_v50, %v764_v52  ;;  %v816_v3 = vld [vmem:[#allocation3 + $0x188] sm:$0xff] }
 0x147   :  { %4501 = vmatprep.subr.bf16.mxu0 %v6042_v1  ;;  %4829 = vmatprep.subr.bf16.mxu1 %v6045_v2  ;;  %v7006_v1 = vstv %s6980_s9  ;;  %v6073_v2 = vld [vmem:[#allocation11 + $0x788] ss:$16 sps:$4 sm:$0xff]  }
 0x148   :  { %v825_v8 = vmul.f32 %v7006_v1, %v816_v3  ;;  %v946_v52 = vld [vmem:[#allocation3 + $0x2c8] sm:$0xff] }
 0x149   :  { %v1050_v45 = vld [vmem:[#allocation3 + $0x3c8] sm:$0xff] }
 0x14a   :  { %4502 = vmatpush1.bf16.msra.mxu0 %v6040_v11  ;;  %4830 = vmatpush1.bf16.msra.mxu1 %v6043_v13  ;;  %v842_v11 = vld [vmem:[#allocation3 + $0x1c8] sm:$0xff]  ;;  %v7013_v13 = vstv %s6988_s10 }
 0x14b   :  { %4503 = vmatprep.subr.bf16.mxu0 %v6048_v14  ;;  %4831 = vmatprep.subr.bf16.mxu1 %v6051_v19  ;;  %v781_v14 = vadd.f32 %v773_v0, %v755_v7  ;;  %v711_v19 = vld [vmem:[#allocation3 + $0x80] sm:$0xff]  ;;  %v972_v0 = vld [vmem:[#allocation3 + $0x308] sm:$0xff]  ;;  %v955_v7 = vmul.f32 %v7045_v46, %v946_v52 }
 0x14d   :  { %v807_v24 = vadd.f32 %v799_v9, %v781_v14 }
 0x14e   :  { %4504 = vmatpush1.bf16.msra.mxu0 %v6046_v16  ;;  %4832 = vmatpush1.bf16.msra.mxu1 %v6049_v23  ;;  %v694_v16 = vmul.f32 %v6978_v33, %v685_v18  ;;  %v720_v23 = vmul.f32 %v6982_v35, %v711_v19  ;;  %v841_v19 = vld [vmem:[#allocation3 + $0x1c0] sm:$0xff] }
 0x14f   :  { %4505 = vmatprep.subr.bf16.mxu0 %v6054_v17  ;;  %4833 = vmatprep.subr.bf16.mxu1 %v6057_v26  ;;  %v737_v17 = vld [vmem:[#allocation3 + $0xc0] sm:$0xff]  ;;  %v851_v26 = vmul.f32 %v7013_v13, %v842_v11 }
 0x150   :  { %v702_v31 = vadd.f32 %v694_v16, %v668_v6  ;;  %v6097_v6 = vld [vmem:[#allocation11 + $0x808] ss:$16 sps:$4 sm:$0xff]  }
 0x151   :  { %v1024_v16 = vld [vmem:[#allocation3 + $0x388] sm:$0xff] }
 0x152   :  { %4506 = vmatpush1.bf16.msra.mxu0 %v6052_v27  ;;  %4834 = vmatpush1.bf16.msra.mxu1 %v6055_v47  ;;  %v6079_v27 = vld [vmem:[#allocation11 + $0x7a8] ss:$16 sps:$4 sm:$0xff]   ;;  %v596_v47 = vadd.f32 %v6838_v12, %v586_v4  ;;  %v7056_v4 = vstv %s7031_s14 }
 0x153   :  { %4507 = vmatprep.subr.bf16.mxu0 %v6060_v48  ;;  %4835 = vmatprep.subr.bf16.mxu1 %v6063_v29  ;;  %v894_v48 = vld [vmem:[#allocation3 + $0x248] sm:$0xff]  ;;  %v746_v29 = vmul.f32 %v6986_v41, %v737_v17 }
 0x154   :  { %v6085_v12 = vld [vmem:[#allocation11 + $0x7c8] ss:$16 sps:$4 sm:$0xff]   ;;  %v903_v49 = vmul.f32 %v7029_v28, %v894_v48  ;;  %v612_v51 = vmul.f32 0.3, %v596_v47  ;;  %vm604_vm7 = vcmp.ge.f32.partialorder %v596_v47, 0.0  ;;  %v850_v48 = vmul.f32 %v7013_v13, %v841_v19 }
 0x155   :  { %v6123_v19 = vld [vmem:[#allocation11 + $0x88c] ss:$16 sps:$4 sm:$0xff]  }
 0x156   :  { %4508 = vmatpush1.bf16.msra.mxu0 %v6058_v30  ;;  %4836 = vmatpush1.bf16.msra.mxu1 %v6061_v34  ;;  %v6087_v30 = vld [vmem:[#allocation11 + $0x7cc] ss:$16 sps:$4 sm:$0xff]   ;;  %v833_v34 = vadd.f32 %v825_v8, %v807_v24  ;;  %v620_v9 = vsel %vm604_vm7, %v596_v47, %v612_v51 }
 0x157   :  { %4509 = vmatprep.subr.bf16.mxu0 %v6066_v39  ;;  %4837 = vmatprep.subr.bf16.mxu1 %v6069_v42  ;;  %v877_v39 = vmul.f32 %v7019_v21, %v868_v20  ;;  %v728_v42 = vadd.f32 %v720_v23, %v702_v31  ;;  %v6099_v8 = vld [vmem:[#allocation11 + $0x80c] ss:$16 sps:$4 sm:$0xff]   ;;  %v6094_v20 = vld [vmem:[#allocation11 + $0x800] ss:$16 sps:$4 sm:$0xff]   ;;  %v7063_v23 = vstv %s7038_s15  ;;  %v5629_v17 = vpack.c.bf16 %v620_v9, %v620_v9 }
 0x158   :  { %v859_v44 = vadd.f32 %v851_v26, %v833_v34  ;;  %v6105_v31 = vld [vmem:[#allocation11 + $0x82c] ss:$16 sps:$4 sm:$0xff]   ;;  %v6100_v34 = vld [vmem:[#allocation11 + $0x820] ss:$16 sps:$4 sm:$0xff]   ;;  %v7085_v9 = vstv %s7074_s0 }
 0x159   :  { %v754_v53 = vadd.f32 %v746_v29, %v728_v42  ;;  %v6111_v51 = vld [vmem:[#allocation11 + $0x84c] ss:$16 sps:$4 sm:$0xff]  }
 0x15a   :  { %4510 = vmatpush1.bf16.msra.mxu0 %v6064_v55  ;;  %4838 = vmatpush1.bf16.msra.mxu1 %v6067_v56  ;;  %v798_v55 = vmul.f32 %v7002_v58, %v789_v38  ;;  %v6093_v56 = vld [vmem:[#allocation11 + $0x7ec] ss:$16 sps:$4 sm:$0xff]   ;;  %v885_v62 = vadd.f32 %v877_v39, %v859_v44  ;;  %v6103_v39 = vld [vmem:[#allocation11 + $0x828] ss:$16 sps:$4 sm:$0xff]  }
 0x15b   :  { %4511 = vmatprep.subr.bf16.mxu0 %v6072_v59  ;;  %4839 = vmatprep.subr.bf16.mxu1 %v6075_v60  ;;  %v815_v59 = vld [vmem:[#allocation3 + $0x180] sm:$0xff]  ;;  %v780_v3 = vadd.f32 %v772_v43, %v754_v53  ;;  %v1076_v38 = vld [vmem:[#allocation3 + $0x408] sm:$0xff] }
 0x15c   :  { %v6088_v60 = vld [vmem:[#allocation11 + $0x7e0] ss:$16 sps:$4 sm:$0xff]   ;;  %v824_v14 = vmul.f32 %v7006_v1, %v815_v59  ;;  %v1102_v43 = vld [vmem:[#allocation3 + $0x448] sm:$0xff] }
 0x15d   :  { %v806_v11 = vadd.f32 %v798_v55, %v780_v3  ;;  %v893_v55 = vld [vmem:[#allocation3 + $0x240] sm:$0xff]  ;;  %v6117_v3 = vld [vmem:[#allocation11 + $0x86c] ss:$16 sps:$4 sm:$0xff]  }
 0x15e   :  { %4512 = vmatpush1.bf16.msra.mxu0 %v6070_v63  ;;  %4840 = vmatpush1.bf16.msra.mxu1 %v6073_v2  ;;  %v7050_v63 = vstv %s7021_s13  ;;  %v6096_v2 = vld [vmem:[#allocation11 + $0x804] ss:$16 sps:$4 sm:$0xff]  }
 0x15f   :  { %4513 = vmatprep.subr.bf16.mxu0 %v6078_v5  ;;  %4841 = vmatprep.subr.bf16.mxu1 %v6081_v10  ;;  %v911_v5 = vadd.f32 %v903_v49, %v885_v62  ;;  %v998_v10 = vld [vmem:[#allocation3 + $0x348] sm:$0xff]  ;;  %v981_v18 = vmul.f32 %v7050_v63, %v972_v0  ;;  %v832_v47 = vadd.f32 %v824_v14, %v806_v11  ;;  %v6120_v14 = vld [vmem:[#allocation11 + $0x884] ss:$16 sps:$4 sm:$0xff]  }
 0x160   :  { %v1007_v26 = vmul.f32 %v7056_v4, %v998_v10  ;;  %v6109_v62 = vld [vmem:[#allocation11 + $0x848] ss:$16 sps:$4 sm:$0xff]   ;;  %v902_v0 = vmul.f32 %v7029_v28, %v893_v55  ;;  %v1023_v55 = vld [vmem:[#allocation3 + $0x380] sm:$0xff] }
 0x161   :  { %v937_v15 = vadd.f32 %v929_v57, %v911_v5  ;;  %v858_v44 = vadd.f32 %v850_v48, %v832_v47  ;;  %v919_v5 = vld [vmem:[#allocation3 + $0x280] sm:$0xff]  ;;  %v6115_v10 = vld [vmem:[#allocation11 + $0x868] ss:$16 sps:$4 sm:$0xff]  }
 0x162   :  { %4514 = vmatpush1.bf16.msra.mxu0 %v6076_v25  ;;  %4842 = vmatpush1.bf16.msra.mxu1 %v6079_v27  ;;  %v6102_v25 = vld [vmem:[#allocation11 + $0x824] ss:$16 sps:$4 sm:$0xff]   ;;  %v7067_v27 = vstv %s7042_s16 }
 0x163   :  { %4515 = vmatprep.subr.bf16.mxu0 %v6084_v22  ;;  %4843 = vmatprep.subr.bf16.mxu1 %v6087_v30  ;;  %v963_v24 = vadd.f32 %v955_v7, %v937_v15  ;;  %v1033_v22 = vmul.f32 %v7063_v23, %v1024_v16  ;;  %v867_v30 = vld [vmem:[#allocation3 + $0x200] sm:$0xff]  ;;  %v1059_v42 = vmul.f32 %v7067_v27, %v1050_v45 }
 0x164   :  { %v876_v49 = vmul.f32 %v7019_v21, %v867_v30  ;;  %v6112_v7 = vld [vmem:[#allocation11 + $0x860] ss:$16 sps:$4 sm:$0xff]   ;;  %v6127_v30 = vld [vmem:[#allocation11 + $0x8a8] ss:$16 sps:$4 sm:$0xff]  }
 0x165   :  { %v989_v29 = vadd.f32 %v981_v18, %v963_v24  ;;  %v928_v18 = vmul.f32 %v7036_v40, %v919_v5  ;;  %v6118_v16 = vld [vmem:[#allocation11 + $0x880] ss:$16 sps:$4 sm:$0xff]  }
 0x166   :  { %4516 = vmatpush1.bf16.msra.mxu0 %v6082_v36  ;;  %4844 = vmatpush1.bf16.msra.mxu1 %v6085_v12  ;;  %v7072_v36 = vstv %s7052_s2  ;;  %v6108_v12 = vld [vmem:[#allocation11 + $0x844] ss:$16 sps:$4 sm:$0xff]  }
 0x167   :  { %4517 = vmatprep.subr.bf16.mxu0 %v6090_v54  ;;  %4845 = vmatprep.subr.bf16.mxu1 %v6093_v56  ;;  %v1015_v37 = vadd.f32 %v1007_v26, %v989_v29  ;;  %v7078_v54 = vstv %s7058_s17  ;;  %v1085_v53 = vmul.f32 %v7072_v36, %v1076_v38  ;;  %v6106_v56 = vld [vmem:[#allocation11 + $0x840] ss:$16 sps:$4 sm:$0xff]   ;;  %v6129_v26 = vld [vmem:[#allocation11 + $0x8ac] ss:$16 sps:$4 sm:$0xff]  }
 0x168   :  { %v1111_v59 = vmul.f32 %v7078_v54, %v1102_v43  ;;  %v6124_v29 = vld [vmem:[#allocation11 + $0x8a0] ss:$16 sps:$4 sm:$0xff]  }
 0x169   :  { %v1041_v52 = vadd.f32 %v1033_v22, %v1015_v37  ;;  %v6135_v37 = vld [vmem:[#allocation11 + $0x8cc] ss:$16 sps:$4 sm:$0xff]   ;;  %v6130_v43 = vld [vmem:[#allocation11 + $0x8c0] ss:$16 sps:$4 sm:$0xff]  }
 0x16a   :  { %4518 = vmatpush1.bf16.msra.mxu0 %v6088_v60  ;;  %4846 = vmatpush1.bf16.msra.mxu1 %v6091_v61  ;;  %v6114_v60 = vld [vmem:[#allocation11 + $0x864] ss:$16 sps:$4 sm:$0xff]   ;;  %v884_v61 = vadd.f32 %v876_v49, %v858_v44  ;;  %v6133_v44 = vld [vmem:[#allocation11 + $0x8c8] ss:$16 sps:$4 sm:$0xff]  }
 0x16b   :  { %4528 = vmatprep.subr.bf16.mxu0 %v6096_v2  ;;  %4856 = vmatprep.subr.bf16.mxu1 %v6099_v8  ;;  %v1067_v57 = vadd.f32 %v1059_v42, %v1041_v52  ;;  %v7087_v8 = vstv %s5082_s18  ;;  %v997_v42 = vld [vmem:[#allocation3 + $0x340] sm:$0xff] }
 0x16c   :  { %v910_v15 = vadd.f32 %v902_v0, %v884_v61  ;;  %v6138_v49 = vld [vmem:[#allocation11 + $0x8e4] ss:$16 sps:$4 sm:$0xff]   ;;  %v1006_v52 = vmul.f32 %v7056_v4, %v997_v42  ;;  %v6147_v0 = vld [vmem:[#allocation11 + $0x90c] ss:$16 sps:$4 sm:$0xff]  }
 0x16d   :  { %4520 = vmatmul.mubr.bf16.vlgmr.msra.gmra.mrb[0].mxu0 %v5629_v17  ;;  %4848 = vmatmul.mubr.bf16.vlgmr.msra.gmra.mrb[0].mxu1 %v5629_v17  ;;  %v1093_v2 = vadd.f32 %v1085_v53, %v1067_v57  ;;  %v6121_v17 = vld [vmem:[#allocation11 + $0x888] ss:$16 sps:$4 sm:$0xff]   ;;  %v6141_v53 = vld [vmem:[#allocation11 + $0x8ec] ss:$16 sps:$4 sm:$0xff]   ;;  %v6144_v61 = vld [vmem:[#allocation11 + $0x904] ss:$16 sps:$4 sm:$0xff]  }
 0x16e   :  { %4529 = vmatpush1.bf16.msra.mxu0 %v6094_v20  ;;  %4857 = vmatpush1.bf16.msra.mxu1 %v6097_v6  ;;  %v945_v6 = vld [vmem:[#allocation3 + $0x2c0] sm:$0xff]  ;;  %v936_v45 = vadd.f32 %v928_v18, %v910_v15 }
 0x16f   :  { %4530 = vmatprep.subr.bf16.mxu0 %v6102_v25  ;;  %4858 = vmatprep.subr.bf16.mxu1 %v6105_v31  ;;  %v1119_v11 = vadd.f32 %v1111_v59, %v1093_v2  ;;  %v6126_v25 = vld [vmem:[#allocation11 + $0x8a4] ss:$16 sps:$4 sm:$0xff]   ;;  %v954_v47 = vmul.f32 %v7045_v46, %v945_v6  ;;  %v1032_v59 = vmul.f32 %v7063_v23, %v1023_v55  ;;  %v6145_v2 = vld [vmem:[#allocation11 + $0x908] ss:$16 sps:$4 sm:$0xff]  }
 0x170   :  { %v971_v31 = vld [vmem:[#allocation3 + $0x300] sm:$0xff] }
 0x171   :  { %v1129_v20 = vmul.f32 %v7085_v9, %v1119_v11  ;;  %v962_v38 = vadd.f32 %v954_v47, %v936_v45  ;;  %v6150_v6 = vld [vmem:[#allocation11 + $0x924] ss:$16 sps:$4 sm:$0xff]   ;;  %v6148_v45 = vld [vmem:[#allocation11 + $0x920] ss:$16 sps:$4 sm:$0xff]   ;;  %v6151_v47 = vld [vmem:[#allocation11 + $0x928] ss:$16 sps:$4 sm:$0xff]  }
 0x172   :  { %4531 = vmatpush1.bf16.msra.mxu0 %v6100_v34  ;;  %4859 = vmatpush1.bf16.msra.mxu1 %v6103_v39  ;;  %v6132_v34 = vld [vmem:[#allocation11 + $0x8c4] ss:$16 sps:$4 sm:$0xff]  }
 0x173   :  { %4532 = vmatprep.subr.bf16.mxu0 %v6108_v12  ;;  %4860 = vmatprep.subr.bf16.mxu1 %v6111_v51  ;;  %v1139_v24 = vadd.f32 %v7087_v8, %v1129_v20  ;;  %v980_v12 = vmul.f32 %v7050_v63, %v971_v31  ;;  %v740_v20 = vld [vmem:[#allocation3 + $0xd8] sm:$0xff] }
 0x174   :  { %v792_v31 = vld [vmem:[#allocation3 + $0x158] sm:$0xff] }
 0x175   :  { %vm1147_vm8 = vcmp.ge.f32.partialorder %v1139_v24, 0.0  ;;  %v1155_v48 = vmul.f32 0.3, %v1139_v24  ;;  %v988_v51 = vadd.f32 %v980_v12, %v962_v38  ;;  %v818_v12 = vld [vmem:[#allocation3 + $0x198] sm:$0xff] }
 0x176   :  { %4533 = vmatpush1.bf16.msra.mxu0 %v6106_v56  ;;  %4861 = vmatpush1.bf16.msra.mxu1 %v6109_v62  ;;  %v6136_v56 = vld [vmem:[#allocation11 + $0x8e0] ss:$16 sps:$4 sm:$0xff]   ;;  %v6139_v62 = vld [vmem:[#allocation11 + $0x8e8] ss:$16 sps:$4 sm:$0xff]   ;;  %v827_v55 = vmul.f32 %v7006_v1, %v818_v12  ;;  %v6177_v12 = vld [vmem:[#allocation11 + $0x9ac] ss:$16 sps:$4 sm:$0xff]  }
 0x177   :  { %4534 = vmatprep.subr.bf16.mxu0 %v6114_v60  ;;  %4862 = vmatprep.subr.bf16.mxu1 %v6117_v3  ;;  %v1163_v22 = vsel %vm1147_vm8, %v1139_v24, %v1155_v48  ;;  %v1014_v57 = vadd.f32 %v1006_v52, %v988_v51  ;;  %v1049_v60 = vld [vmem:[#allocation3 + $0x3c0] sm:$0xff]  ;;  %v844_v51 = vld [vmem:[#allocation3 + $0x1d8] sm:$0xff] }
 0x178   :  { %v5632_v39 = vpack.c.bf16 %v1163_v22, %v1163_v22  ;;  %v6142_v3 = vld [vmem:[#allocation11 + $0x900] ss:$16 sps:$4 sm:$0xff]   ;;  %v1058_v5 = vmul.f32 %v7067_v27, %v1049_v60  ;;  %v6159_v22 = vld [vmem:[#allocation11 + $0x94c] ss:$16 sps:$4 sm:$0xff]  }
 0x179   :  { %v1040_v11 = vadd.f32 %v1032_v59, %v1014_v57  ;;  %v713_v57 = vld [vmem:[#allocation3 + $0x90] sm:$0xff]  ;;  %v6165_v60 = vld [vmem:[#allocation11 + $0x96c] ss:$16 sps:$4 sm:$0xff]  }
 0x17a   :  { %4535 = vmatpush1.bf16.msra.mxu0 %v6112_v7  ;;  %4863 = vmatpush1.bf16.msra.mxu1 %v6115_v10  ;;  %v662_v7 = vld [vmem:[#allocation3 + $0x18] sm:$0xff]  ;;  %v6162_v59 = vld [vmem:[#allocation11 + $0x964] ss:$16 sps:$4 sm:$0xff]  }
 0x17b   :  { %4536 = vmatprep.subr.bf16.mxu0 %v6120_v14  ;;  %4864 = vmatprep.subr.bf16.mxu1 %v6123_v19  ;;  %v688_v10 = vld [vmem:[#allocation3 + $0x58] sm:$0xff]  ;;  %v1075_v14 = vld [vmem:[#allocation3 + $0x400] sm:$0xff]  ;;  %v671_v15 = vmul.f32 %v6975_v32, %v662_v7  ;;  %v722_v7 = vmul.f32 %v6982_v35, %v713_v57 }
 0x17c   :  { %4560 = vmatprep.mubr.bf16.mxu0 %v5632_v39  ;;  %4888 = vmatprep.mubr.bf16.mxu1 %v5632_v39  ;;  %v697_v18 = vmul.f32 %v6978_v33, %v688_v10  ;;  %v714_v19 = vld [vmem:[#allocation3 + $0x98] sm:$0xff]  ;;  %v1084_v48 = vmul.f32 %v7072_v36, %v1075_v14  ;;  %v739_v14 = vld [vmem:[#allocation3 + $0xd0] sm:$0xff] }
 0x17d   :  { %v896_v10 = vld [vmem:[#allocation3 + $0x258] sm:$0xff] }
 0x17e   :  { %4537 = vmatpush1.bf16.msra.mxu0 %v6118_v16  ;;  %4865 = vmatpush1.bf16.msra.mxu1 %v6121_v17  ;;  %v6153_v16 = vld [vmem:[#allocation11 + $0x92c] ss:$16 sps:$4 sm:$0xff]   ;;  %v723_v17 = vmul.f32 %v6982_v35, %v714_v19  ;;  %v705_v24 = vadd.f32 %v697_v18, %v671_v15  ;;  %v6160_v15 = vld [vmem:[#allocation11 + $0x960] ss:$16 sps:$4 sm:$0xff]   ;;  %v6163_v18 = vld [vmem:[#allocation11 + $0x968] ss:$16 sps:$4 sm:$0xff]  }
 0x17f   :  { %4538 = vmatprep.subr.bf16.mxu0 %v6126_v25  ;;  %4866 = vmatprep.subr.bf16.mxu1 %v6129_v26  ;;  %v766_v25 = vld [vmem:[#allocation3 + $0x118] sm:$0xff]  ;;  %v749_v26 = vmul.f32 %v6986_v41, %v740_v20 }
 0x180   :  { %v731_v39 = vadd.f32 %v723_v17, %v705_v24  ;;  %v775_v38 = vmul.f32 %v6994_v50, %v766_v25  ;;  %v6171_v17 = vld [vmem:[#allocation11 + $0x98c] ss:$16 sps:$4 sm:$0xff]   ;;  %v6166_v24 = vld [vmem:[#allocation11 + $0x980] ss:$16 sps:$4 sm:$0xff]  }
 0x181   :  { %v922_v25 = vld [vmem:[#allocation3 + $0x298] sm:$0xff] }
 0x182   :  { %4539 = vmatpush1.bf16.msra.mxu0 %v6124_v29  ;;  %4867 = vmatpush1.bf16.msra.mxu1 %v6127_v30  ;;  %v6156_v29 = vld [vmem:[#allocation11 + $0x944] ss:$16 sps:$4 sm:$0xff]   ;;  %v1066_v30 = vadd.f32 %v1058_v5, %v1040_v11  ;;  %v757_v42 = vadd.f32 %v749_v26, %v731_v39  ;;  %v853_v5 = vmul.f32 %v7013_v13, %v844_v51 }
 0x183   :  { %4540 = vmatprep.subr.bf16.mxu0 %v6132_v34  ;;  %4868 = vmatprep.subr.bf16.mxu1 %v6135_v37  ;;  %v1101_v34 = vld [vmem:[#allocation3 + $0x440] sm:$0xff] }
 0x184   :  { %v6154_v37 = vld [vmem:[#allocation11 + $0x940] ss:$16 sps:$4 sm:$0xff]   ;;  %v1092_v52 = vadd.f32 %v1084_v48, %v1066_v30  ;;  %v6174_v30 = vld [vmem:[#allocation11 + $0x9a4] ss:$16 sps:$4 sm:$0xff]  }
 0x186   :  { %4541 = vmatpush1.bf16.msra.mxu0 %v6130_v43  ;;  %4869 = vmatpush1.bf16.msra.mxu1 %v6133_v44  ;;  %v801_v43 = vmul.f32 %v7002_v58, %v792_v31  ;;  %v6157_v44 = vld [vmem:[#allocation11 + $0x948] ss:$16 sps:$4 sm:$0xff]   ;;  %v748_v31 = vmul.f32 %v6986_v41, %v739_v14  ;;  %v817_v14 = vld [vmem:[#allocation3 + $0x190] sm:$0xff] }
 0x187   :  { %4542 = vmatprep.subr.bf16.mxu0 %v6138_v49  ;;  %4870 = vmatprep.subr.bf16.mxu1 %v6141_v53  ;;  %v1110_v49 = vmul.f32 %v7078_v54, %v1101_v34  ;;  %v783_v53 = vadd.f32 %v775_v38, %v757_v42  ;;  %v931_v38 = vmul.f32 %v7036_v40, %v922_v25  ;;  %v6172_v42 = vld [vmem:[#allocation11 + $0x9a0] ss:$16 sps:$4 sm:$0xff]  }
 0x189   :  { %v1118_v19 = vadd.f32 %v1110_v49, %v1092_v52  ;;  %v1000_v49 = vld [vmem:[#allocation3 + $0x358] sm:$0xff] }
 0x18a   :  { %4543 = vmatpush1.bf16.msra.mxu0 %v6136_v56  ;;  %4871 = vmatpush1.bf16.msra.mxu1 %v6139_v62  ;;  %v661_v56 = vld [vmem:[#allocation3 + $0x10] sm:$0xff] }
 0x18b   :  { %4544 = vmatprep.subr.bf16.mxu0 %v6144_v61  ;;  %4872 = vmatprep.subr.bf16.mxu1 %v6147_v0  ;;  %v687_v62 = vld [vmem:[#allocation3 + $0x50] sm:$0xff]  ;;  %v870_v61 = vld [vmem:[#allocation3 + $0x218] sm:$0xff]  ;;  %v670_v0 = vmul.f32 %v6975_v32, %v661_v56  ;;  %v1128_v34 = vmul.f32 %v7085_v9, %v1118_v19 }
 0x18c   :  { %v6180_v56 = vld [vmem:[#allocation11 + $0x9c4] ss:$16 sps:$4 sm:$0xff]  }
 0x18e   :  { %4545 = vmatpush1.bf16.msra.mxu0 %v6142_v3  ;;  %4873 = vmatpush1.bf16.msra.mxu1 %v6145_v2  ;;  %v696_v3 = vmul.f32 %v6978_v33, %v687_v62  ;;  %v809_v2 = vadd.f32 %v801_v43, %v783_v53  ;;  %v791_v53 = vld [vmem:[#allocation3 + $0x150] sm:$0xff]  ;;  %v1138_v62 = vadd.f32 %v7087_v8, %v1128_v34 }
 0x18f   :  { %4546 = vmatprep.subr.bf16.mxu0 %v6150_v6  ;;  %4874 = vmatprep.subr.bf16.mxu1 %v6153_v16  ;;  %v879_v6 = vmul.f32 %v7019_v21, %v870_v61  ;;  %v6168_v16 = vld [vmem:[#allocation11 + $0x984] ss:$16 sps:$4 sm:$0xff]   ;;  %v1026_v61 = vld [vmem:[#allocation3 + $0x398] sm:$0xff] }
 0x190   :  { %v704_v11 = vadd.f32 %v696_v3, %v670_v0  ;;  %v835_v20 = vadd.f32 %v827_v55, %v809_v2  ;;  %v6175_v55 = vld [vmem:[#allocation11 + $0x9a8] ss:$16 sps:$4 sm:$0xff]   ;;  %v6178_v0 = vld [vmem:[#allocation11 + $0x9c0] ss:$16 sps:$4 sm:$0xff]   ;;  %vm1146_vm9 = vcmp.ge.f32.partialorder %v1138_v62, 0.0 }
 0x191   :  { %v6181_v3 = vld [vmem:[#allocation11 + $0x9c8] ss:$16 sps:$4 sm:$0xff]   ;;  %v6192_v34 = vld [vmem:[#allocation11 + $0xa04] ss:$16 sps:$4 sm:$0xff]  }
 0x192   :  { %4547 = vmatpush1.bf16.msra.mxu0 %v6148_v45  ;;  %4875 = vmatpush1.bf16.msra.mxu1 %v6151_v47  ;;  %v861_v26 = vadd.f32 %v853_v5, %v835_v20  ;;  %v905_v45 = vmul.f32 %v7029_v28, %v896_v10  ;;  %v948_v47 = vld [vmem:[#allocation3 + $0x2d8] sm:$0xff]  ;;  %v730_v48 = vadd.f32 %v722_v7, %v704_v11 }
 0x193   :  { %4548 = vmatprep.subr.bf16.mxu0 %v6156_v29  ;;  %4876 = vmatprep.subr.bf16.mxu1 %v6159_v22  ;;  %v765_v29 = vld [vmem:[#allocation3 + $0x110] sm:$0xff]  ;;  %v6169_v22 = vld [vmem:[#allocation11 + $0x988] ss:$16 sps:$4 sm:$0xff]   ;;  %v1009_v5 = vmul.f32 %v7056_v4, %v1000_v49  ;;  %v800_v11 = vmul.f32 %v7002_v58, %v791_v53  ;;  %v1035_v20 = vmul.f32 %v7063_v23, %v1026_v61 }
 0x194   :  { %v887_v39 = vadd.f32 %v879_v6, %v861_v26  ;;  %v756_v51 = vadd.f32 %v748_v31, %v730_v48  ;;  %v774_v52 = vmul.f32 %v6994_v50, %v765_v29  ;;  %v1052_v7 = vld [vmem:[#allocation3 + $0x3d8] sm:$0xff]  ;;  %v6184_v48 = vld [vmem:[#allocation11 + $0x9e0] ss:$16 sps:$4 sm:$0xff]   ;;  %v6198_v53 = vld [vmem:[#allocation11 + $0xa24] ss:$16 sps:$4 sm:$0xff]  }
 0x195   :  { %v6189_v6 = vld [vmem:[#allocation11 + $0x9ec] ss:$16 sps:$4 sm:$0xff]   ;;  %v1061_v25 = vmul.f32 %v7067_v27, %v1052_v7  ;;  %v6187_v31 = vld [vmem:[#allocation11 + $0x9e8] ss:$16 sps:$4 sm:$0xff]   ;;  %v6190_v49 = vld [vmem:[#allocation11 + $0xa00] ss:$16 sps:$4 sm:$0xff]  }
 0x196   :  { %4549 = vmatpush1.bf16.msra.mxu0 %v6154_v37  ;;  %4877 = vmatpush1.bf16.msra.mxu1 %v6157_v44  ;;  %v974_v37 = vld [vmem:[#allocation3 + $0x318] sm:$0xff]  ;;  %v913_v43 = vadd.f32 %v905_v45, %v887_v39  ;;  %v957_v44 = vmul.f32 %v7045_v46, %v948_v47  ;;  %v782_v10 = vadd.f32 %v774_v52, %v756_v51  ;;  %v843_v47 = vld [vmem:[#allocation3 + $0x1d0] sm:$0xff] }
 0x197   :  { %4550 = vmatprep.subr.bf16.mxu0 %v6162_v59  ;;  %4878 = vmatprep.subr.bf16.mxu1 %v6165_v60  ;;  %v983_v59 = vmul.f32 %v7050_v63, %v974_v37  ;;  %v6183_v60 = vld [vmem:[#allocation11 + $0x9cc] ss:$16 sps:$4 sm:$0xff]   ;;  %v826_v45 = vmul.f32 %v7006_v1, %v817_v14  ;;  %v6193_v51 = vld [vmem:[#allocation11 + $0xa08] ss:$16 sps:$4 sm:$0xff]   ;;  %v921_v14 = vld [vmem:[#allocation3 + $0x290] sm:$0xff] }
 0x198   :  { %v939_v57 = vadd.f32 %v931_v38, %v913_v43  ;;  %v808_v26 = vadd.f32 %v800_v11, %v782_v10  ;;  %v6195_v39 = vld [vmem:[#allocation11 + $0xa0c] ss:$16 sps:$4 sm:$0xff]   ;;  %v6199_v61 = vld [vmem:[#allocation11 + $0xa28] ss:$16 sps:$4 sm:$0xff]  }
 0x19a   :  { %4551 = vmatpush1.bf16.msra.mxu0 %v6160_v15  ;;  %4879 = vmatpush1.bf16.msra.mxu1 %v6163_v18  ;;  %v965_v2 = vadd.f32 %v957_v44, %v939_v57  ;;  %v6186_v15 = vld [vmem:[#allocation11 + $0x9e4] ss:$16 sps:$4 sm:$0xff]   ;;  %v1154_v18 = vmul.f32 0.3, %v1138_v62  ;;  %v834_v37 = vadd.f32 %v826_v45, %v808_v26  ;;  %v6211_v45 = vld [vmem:[#allocation11 + $0xa68] ss:$16 sps:$4 sm:$0xff]  }
 0x19b   :  { %4552 = vmatprep.subr.bf16.mxu0 %v6168_v16  ;;  %4880 = vmatprep.subr.bf16.mxu1 %v6171_v17  ;;  %v1078_v16 = vld [vmem:[#allocation3 + $0x418] sm:$0xff]  ;;  %v869_v44 = vld [vmem:[#allocation3 + $0x210] sm:$0xff] }
 0x19c   :  { %v991_v19 = vadd.f32 %v983_v59, %v965_v2  ;;  %v1162_v29 = vsel %vm1146_vm9, %v1138_v62, %v1154_v18  ;;  %v878_v57 = vmul.f32 %v7019_v21, %v869_v44  ;;  %v895_v59 = vld [vmem:[#allocation3 + $0x250] sm:$0xff]  ;;  %v6207_v2 = vld [vmem:[#allocation11 + $0xa4c] ss:$16 sps:$4 sm:$0xff]   ;;  %v6223_v44 = vld [vmem:[#allocation11 + $0xaa8] ss:$16 sps:$4 sm:$0xff]  }
 0x19d   :  { %v5631_v43 = vpack.c.bf16 %v1162_v29, %v1162_v29  ;;  %v904_v11 = vmul.f32 %v7029_v28, %v895_v59  ;;  %v947_v26 = vld [vmem:[#allocation3 + $0x2d0] sm:$0xff] }
 0x19e   :  { %4553 = vmatpush1.bf16.msra.mxu0 %v6166_v24  ;;  %4881 = vmatpush1.bf16.msra.mxu1 %v6169_v22  ;;  %v1017_v17 = vadd.f32 %v1009_v5, %v991_v19  ;;  %v1104_v24 = vld [vmem:[#allocation3 + $0x458] sm:$0xff]  ;;  %v6202_v5 = vld [vmem:[#allocation11 + $0xa40] ss:$16 sps:$4 sm:$0xff]   ;;  %v6210_v19 = vld [vmem:[#allocation11 + $0xa64] ss:$16 sps:$4 sm:$0xff]  }
 0x19f   :  { %4554 = vmatprep.subr.bf16.mxu0 %v6174_v30  ;;  %4882 = vmatprep.subr.bf16.mxu1 %v6177_v12  ;;  %v1087_v30 = vmul.f32 %v7072_v36, %v1078_v16  ;;  %v1113_v12 = vmul.f32 %v7078_v54, %v1104_v24 }
 0x1a0   :  { %v1043_v22 = vadd.f32 %v1035_v20, %v1017_v17  ;;  %v6213_v20 = vld [vmem:[#allocation11 + $0xa6c] ss:$16 sps:$4 sm:$0xff]   ;;  %v930_v17 = vmul.f32 %v7036_v40, %v921_v14 }
 0x1a2   :  { %4555 = vmatpush1.bf16.msra.mxu0 %v6172_v42  ;;  %4883 = vmatpush1.bf16.msra.mxu1 %v6175_v55  ;;  %v1069_v38 = vadd.f32 %v1061_v25, %v1043_v22  ;;  %v852_v42 = vmul.f32 %v7013_v13, %v843_v47  ;;  %v6201_v55 = vld [vmem:[#allocation11 + $0xa2c] ss:$16 sps:$4 sm:$0xff]   ;;  %v6208_v25 = vld [vmem:[#allocation11 + $0xa60] ss:$16 sps:$4 sm:$0xff]   ;;  %v6216_v47 = vld [vmem:[#allocation11 + $0xa84] ss:$16 sps:$4 sm:$0xff]   ;;  %v956_v22 = vmul.f32 %v7045_v46, %v947_v26 }
 0x1a3   :  { %4556 = vmatprep.subr.bf16.mxu0 %v6180_v56  ;;  %4884 = vmatprep.subr.bf16.mxu1 %v6183_v60  ;;  %v6196_v60 = vld [vmem:[#allocation11 + $0xa20] ss:$16 sps:$4 sm:$0xff]   ;;  %v6240_v26 = vld [vmem:[#allocation11 + $0xb04] ss:$16 sps:$4 sm:$0xff]  }
 0x1a4   :  { %v1095_v52 = vadd.f32 %v1087_v30, %v1069_v38  ;;  %v860_v62 = vadd.f32 %v852_v42, %v834_v37  ;;  %v6217_v30 = vld [vmem:[#allocation11 + $0xa88] ss:$16 sps:$4 sm:$0xff]   ;;  %v6225_v38 = vld [vmem:[#allocation11 + $0xaac] ss:$16 sps:$4 sm:$0xff]   ;;  %v6220_v42 = vld [vmem:[#allocation11 + $0xaa0] ss:$16 sps:$4 sm:$0xff]  }
 0x1a6   :  { %4557 = vmatpush1.bf16.msra.mxu0 %v6178_v0  ;;  %4885 = vmatpush1.bf16.msra.mxu1 %v6181_v3  ;;  %v1121_v56 = vadd.f32 %v1113_v12, %v1095_v52  ;;  %v6204_v3 = vld [vmem:[#allocation11 + $0xa44] ss:$16 sps:$4 sm:$0xff]   ;;  %v886_v10 = vadd.f32 %v878_v57, %v860_v62 }
 0x1a7   :  { %4558 = vmatprep.subr.bf16.mxu0 %v6186_v15  ;;  %4886 = vmatprep.subr.bf16.mxu1 %v6189_v6  ;;  %v6205_v15 = vld [vmem:[#allocation11 + $0xa48] ss:$16 sps:$4 sm:$0xff]   ;;  %v1025_v62 = vld [vmem:[#allocation3 + $0x390] sm:$0xff] }
 0x1a8   :  { %v1131_v0 = vmul.f32 %v7085_v9, %v1121_v56  ;;  %v912_v16 = vadd.f32 %v904_v11, %v886_v10  ;;  %v690_v56 = vld [vmem:[#allocation3 + $0x68] sm:$0xff] }
 0x1a9   :  { %v699_v59 = vmul.f32 %v6978_v33, %v690_v56  ;;  %v6237_v10 = vld [vmem:[#allocation11 + $0xaec] ss:$16 sps:$4 sm:$0xff]   ;;  %v6247_v56 = vld [vmem:[#allocation11 + $0xb28] ss:$16 sps:$4 sm:$0xff]  }
 0x1aa   :  { %4559 = vmatpush1.bf16.msra.mxu0 %v6184_v48  ;;  %4887 = vmatpush1.bf16.msra.mxu1 %v6187_v31  ;;  %v1141_v7 = vadd.f32 %v7087_v8, %v1131_v0  ;;  %v6219_v48 = vld [vmem:[#allocation11 + $0xa8c] ss:$16 sps:$4 sm:$0xff]   ;;  %v6214_v31 = vld [vmem:[#allocation11 + $0xa80] ss:$16 sps:$4 sm:$0xff]   ;;  %v938_v29 = vadd.f32 %v930_v17, %v912_v16 }
 0x1ab   :  { %4569 = vmatprep.subr.bf16.mxu0 %v6192_v34  ;;  %4897 = vmatprep.subr.bf16.mxu1 %v6195_v39  ;;  %v973_v34 = vld [vmem:[#allocation3 + $0x310] sm:$0xff] }
 0x1ac   :  { %vm1149_vm10 = vcmp.ge.f32.partialorder %v1141_v7, 0.0  ;;  %v1157_v18 = vmul.f32 0.3, %v1141_v7  ;;  %v6222_v39 = vld [vmem:[#allocation11 + $0xaa4] ss:$16 sps:$4 sm:$0xff]   ;;  %v964_v12 = vadd.f32 %v956_v22, %v938_v29  ;;  %v982_v37 = vmul.f32 %v7050_v63, %v973_v34  ;;  %v846_v22 = vld [vmem:[#allocation3 + $0x1e8] sm:$0xff] }
 0x1ad   :  { %4561 = vmatmul.mubr.bf16.vlgmr.msra.gmra.mrb[0].mxu0 %v5631_v43  ;;  %4889 = vmatmul.mubr.bf16.vlgmr.msra.gmra.mrb[0].mxu1 %v5631_v43  ;;  %v999_v43 = vld [vmem:[#allocation3 + $0x350] sm:$0xff] }
 0x1ae   :  { %4570 = vmatpush1.bf16.msra.mxu0 %v6190_v49  ;;  %4898 = vmatpush1.bf16.msra.mxu1 %v6193_v51  ;;  %v1165_v6 = vsel %vm1149_vm10, %v1141_v7, %v1157_v18  ;;  %v6228_v49 = vld [vmem:[#allocation11 + $0xac4] ss:$16 sps:$4 sm:$0xff]   ;;  %v6231_v51 = vld [vmem:[#allocation11 + $0xacc] ss:$16 sps:$4 sm:$0xff]   ;;  %v990_v52 = vadd.f32 %v982_v37, %v964_v12  ;;  %v6226_v0 = vld [vmem:[#allocation11 + $0xac0] ss:$16 sps:$4 sm:$0xff]   ;;  %v1034_v18 = vmul.f32 %v7063_v23, %v1025_v62 }
 0x1af   :  { %4571 = vmatprep.subr.bf16.mxu0 %v6198_v53  ;;  %4899 = vmatprep.subr.bf16.mxu1 %v6201_v55  ;;  %v5634_v24 = vpack.c.bf16 %v1165_v6, %v1165_v6  ;;  %v1008_v53 = vmul.f32 %v7056_v4, %v999_v43  ;;  %v664_v55 = vld [vmem:[#allocation3 + $0x28] sm:$0xff]  ;;  %v6234_v7 = vld [vmem:[#allocation11 + $0xae4] ss:$16 sps:$4 sm:$0xff]  }
 0x1b0   :  { %v673_v57 = vmul.f32 %v6975_v32, %v664_v55  ;;  %v6235_v6 = vld [vmem:[#allocation11 + $0xae8] ss:$16 sps:$4 sm:$0xff]   ;;  %v1051_v16 = vld [vmem:[#allocation3 + $0x3d0] sm:$0xff]  ;;  %v6249_v43 = vld [vmem:[#allocation11 + $0xb2c] ss:$16 sps:$4 sm:$0xff]  }
 0x1b1   :  { %4601 = vmatprep.mubr.bf16.mxu0 %v5634_v24  ;;  %4929 = vmatprep.mubr.bf16.mxu1 %v5634_v24  ;;  %v820_v24 = vld [vmem:[#allocation3 + $0x1a8] sm:$0xff]  ;;  %v1060_v29 = vmul.f32 %v7067_v27, %v1051_v16  ;;  %v6252_v62 = vld [vmem:[#allocation11 + $0xb44] ss:$16 sps:$4 sm:$0xff]  }
 0x1b2   :  { %4572 = vmatpush1.bf16.msra.mxu0 %v6196_v60  ;;  %4900 = vmatpush1.bf16.msra.mxu1 %v6199_v61  ;;  %v716_v60 = vld [vmem:[#allocation3 + $0xa8] sm:$0xff]  ;;  %v707_v11 = vadd.f32 %v699_v59, %v673_v57  ;;  %v1103_v57 = vld [vmem:[#allocation3 + $0x450] sm:$0xff] }
 0x1b3   :  { %4573 = vmatprep.subr.bf16.mxu0 %v6204_v3  ;;  %4901 = vmatprep.subr.bf16.mxu1 %v6207_v2  ;;  %v742_v61 = vld [vmem:[#allocation3 + $0xe8] sm:$0xff]  ;;  %v725_v2 = vmul.f32 %v6982_v35, %v716_v60 }
 0x1b4   :  { %v6229_v3 = vld [vmem:[#allocation11 + $0xac8] ss:$16 sps:$4 sm:$0xff]   ;;  %v751_v14 = vmul.f32 %v6986_v41, %v742_v61 }
 0x1b5   :  { %v733_v17 = vadd.f32 %v725_v2, %v707_v11  ;;  %v6241_v12 = vld [vmem:[#allocation11 + $0xb08] ss:$16 sps:$4 sm:$0xff]   ;;  %v6255_v2 = vld [vmem:[#allocation11 + $0xb4c] ss:$16 sps:$4 sm:$0xff]  }
 0x1b6   :  { %4574 = vmatpush1.bf16.msra.mxu0 %v6202_v5  ;;  %4902 = vmatpush1.bf16.msra.mxu1 %v6205_v15  ;;  %v768_v5 = vld [vmem:[#allocation3 + $0x128] sm:$0xff]  ;;  %v1016_v15 = vadd.f32 %v1008_v53, %v990_v52 }
 0x1b7   :  { %4575 = vmatprep.subr.bf16.mxu0 %v6210_v19  ;;  %4903 = vmatprep.subr.bf16.mxu1 %v6213_v20  ;;  %v794_v19 = vld [vmem:[#allocation3 + $0x168] sm:$0xff]  ;;  %v6232_v20 = vld [vmem:[#allocation11 + $0xae0] ss:$16 sps:$4 sm:$0xff]  }
 0x1b8   :  { %v872_v37 = vld [vmem:[#allocation3 + $0x228] sm:$0xff] }
 0x1b9   :  { %v898_v55 = vld [vmem:[#allocation3 + $0x268] sm:$0xff]  ;;  %v881_v60 = vmul.f32 %v7019_v21, %v872_v37 }
 0x1ba   :  { %4576 = vmatpush1.bf16.msra.mxu0 %v6208_v25  ;;  %4904 = vmatpush1.bf16.msra.mxu1 %v6211_v45  ;;  %v777_v25 = vmul.f32 %v6994_v50, %v768_v5  ;;  %v6243_v45 = vld [vmem:[#allocation11 + $0xb0c] ss:$16 sps:$4 sm:$0xff]  }
 0x1bb   :  { %4577 = vmatprep.subr.bf16.mxu0 %v6216_v47  ;;  %4905 = vmatprep.subr.bf16.mxu1 %v6219_v48  ;;  %v759_v47 = vadd.f32 %v751_v14, %v733_v17  ;;  %v803_v48 = vmul.f32 %v7002_v58, %v794_v19  ;;  %v924_v61 = vld [vmem:[#allocation3 + $0x2a8] sm:$0xff]  ;;  %v1112_v14 = vmul.f32 %v7078_v54, %v1103_v57  ;;  %v6258_v19 = vld [vmem:[#allocation11 + $0xb64] ss:$16 sps:$4 sm:$0xff]  }
 0x1bc   :  { %v1028_v37 = vld [vmem:[#allocation3 + $0x3a8] sm:$0xff] }
 0x1bd   :  { %v785_v34 = vadd.f32 %v777_v25, %v759_v47  ;;  %v976_v25 = vld [vmem:[#allocation3 + $0x328] sm:$0xff]  ;;  %v1037_v57 = vmul.f32 %v7063_v23, %v1028_v37 }
 0x1be   :  { %4578 = vmatpush1.bf16.msra.mxu0 %v6214_v31  ;;  %4906 = vmatpush1.bf16.msra.mxu1 %v6217_v30  ;;  %v1042_v31 = vadd.f32 %v1034_v18, %v1016_v15  ;;  %v1077_v30 = vld [vmem:[#allocation3 + $0x410] sm:$0xff]  ;;  %v950_v15 = vld [vmem:[#allocation3 + $0x2e8] sm:$0xff] }
 0x1bf   :  { %4579 = vmatprep.subr.bf16.mxu0 %v6222_v39  ;;  %4907 = vmatprep.subr.bf16.mxu1 %v6225_v38  ;;  %v829_v39 = vmul.f32 %v7006_v1, %v820_v24  ;;  %v6238_v38 = vld [vmem:[#allocation11 + $0xb00] ss:$16 sps:$4 sm:$0xff]   ;;  %v1086_v53 = vmul.f32 %v7072_v36, %v1077_v30  ;;  %v6253_v18 = vld [vmem:[#allocation11 + $0xb48] ss:$16 sps:$4 sm:$0xff]   ;;  %v959_v47 = vmul.f32 %v7045_v46, %v950_v15  ;;  %v6264_v30 = vld [vmem:[#allocation11 + $0xb84] ss:$16 sps:$4 sm:$0xff]  }
 0x1c0   :  { %v1068_v52 = vadd.f32 %v1060_v29, %v1042_v31  ;;  %v715_v24 = vld [vmem:[#allocation3 + $0xa0] sm:$0xff]  ;;  %v1002_v29 = vld [vmem:[#allocation3 + $0x368] sm:$0xff] }
 0x1c2   :  { %4580 = vmatpush1.bf16.msra.mxu0 %v6220_v42  ;;  %4908 = vmatpush1.bf16.msra.mxu1 %v6223_v44  ;;  %v6246_v42 = vld [vmem:[#allocation11 + $0xb24] ss:$16 sps:$4 sm:$0xff]   ;;  %v811_v44 = vadd.f32 %v803_v48, %v785_v34  ;;  %v1094_v11 = vadd.f32 %v1086_v53, %v1068_v52  ;;  %v6256_v48 = vld [vmem:[#allocation11 + $0xb60] ss:$16 sps:$4 sm:$0xff]   ;;  %v1054_v53 = vld [vmem:[#allocation3 + $0x3e8] sm:$0xff] }
 0x1c3   :  { %4581 = vmatprep.subr.bf16.mxu0 %v6228_v49  ;;  %4909 = vmatprep.subr.bf16.mxu1 %v6231_v51  ;;  %v855_v49 = vmul.f32 %v7013_v13, %v846_v22  ;;  %v6244_v51 = vld [vmem:[#allocation11 + $0xb20] ss:$16 sps:$4 sm:$0xff]   ;;  %v6259_v22 = vld [vmem:[#allocation11 + $0xb68] ss:$16 sps:$4 sm:$0xff]  }
 0x1c4   :  { %v837_v59 = vadd.f32 %v829_v39, %v811_v44  ;;  %v1120_v31 = vadd.f32 %v1112_v14, %v1094_v11  ;;  %v985_v39 = vmul.f32 %v7050_v63, %v976_v25  ;;  %v6268_v11 = vld [vmem:[#allocation11 + $0xba0] ss:$16 sps:$4 sm:$0xff]   ;;  %v6271_v14 = vld [vmem:[#allocation11 + $0xba8] ss:$16 sps:$4 sm:$0xff]  }
 0x1c6   :  { %4582 = vmatpush1.bf16.msra.mxu0 %v6226_v0  ;;  %4910 = vmatpush1.bf16.msra.mxu1 %v6229_v3  ;;  %v663_v0 = vld [vmem:[#allocation3 + $0x20] sm:$0xff]  ;;  %v863_v5 = vadd.f32 %v855_v49, %v837_v59  ;;  %v1011_v49 = vmul.f32 %v7056_v4, %v1002_v29  ;;  %v1130_v52 = vmul.f32 %v7085_v9, %v1120_v31 }
 0x1c7   :  { %4583 = vmatprep.subr.bf16.mxu0 %v6234_v7  ;;  %4911 = vmatprep.subr.bf16.mxu1 %v6237_v10  ;;  %v689_v3 = vld [vmem:[#allocation3 + $0x60] sm:$0xff]  ;;  %v907_v7 = vmul.f32 %v7029_v28, %v898_v55  ;;  %v672_v16 = vmul.f32 %v6975_v32, %v663_v0  ;;  %v6265_v55 = vld [vmem:[#allocation11 + $0xb88] ss:$16 sps:$4 sm:$0xff]  }
 0x1c8   :  { %v6250_v10 = vld [vmem:[#allocation11 + $0xb40] ss:$16 sps:$4 sm:$0xff]   ;;  %v698_v17 = vmul.f32 %v6978_v33, %v689_v3  ;;  %v6273_v3 = vld [vmem:[#allocation11 + $0xbac] ss:$16 sps:$4 sm:$0xff]  }
 0x1c9   :  { %v767_v0 = vld [vmem:[#allocation3 + $0x120] sm:$0xff] }
 0x1ca   :  { %4584 = vmatpush1.bf16.msra.mxu0 %v6232_v20  ;;  %4912 = vmatpush1.bf16.msra.mxu1 %v6235_v6  ;;  %v889_v20 = vadd.f32 %v881_v60, %v863_v5  ;;  %v933_v6 = vmul.f32 %v7036_v40, %v924_v61  ;;  %v1080_v61 = vld [vmem:[#allocation3 + $0x428] sm:$0xff]  ;;  %v1063_v5 = vmul.f32 %v7067_v27, %v1054_v53 }
 0x1cb   :  { %4585 = vmatprep.subr.bf16.mxu0 %v6240_v26  ;;  %4913 = vmatprep.subr.bf16.mxu1 %v6243_v45  ;;  %v6261_v26 = vld [vmem:[#allocation11 + $0xb6c] ss:$16 sps:$4 sm:$0xff]  }
 0x1cc   :  { %v915_v45 = vadd.f32 %v907_v7, %v889_v20  ;;  %v1140_v7 = vadd.f32 %v7087_v8, %v1130_v52  ;;  %v776_v20 = vmul.f32 %v6994_v50, %v767_v0  ;;  %v6291_v52 = vld [vmem:[#allocation11 + $0xc0c] ss:$16 sps:$4 sm:$0xff]   ;;  %v871_v0 = vld [vmem:[#allocation3 + $0x220] sm:$0xff] }
 0x1ce   :  { %4586 = vmatpush1.bf16.msra.mxu0 %v6238_v38  ;;  %4914 = vmatpush1.bf16.msra.mxu1 %v6241_v12  ;;  %v941_v34 = vadd.f32 %v933_v6, %v915_v45  ;;  %v706_v38 = vadd.f32 %v698_v17, %v672_v16  ;;  %v724_v12 = vmul.f32 %v6982_v35, %v715_v24  ;;  %v6276_v6 = vld [vmem:[#allocation11 + $0xbc4] ss:$16 sps:$4 sm:$0xff]   ;;  %v6279_v17 = vld [vmem:[#allocation11 + $0xbcc] ss:$16 sps:$4 sm:$0xff]   ;;  %v6277_v45 = vld [vmem:[#allocation11 + $0xbc8] ss:$16 sps:$4 sm:$0xff]  }
 0x1cf   :  { %4587 = vmatprep.subr.bf16.mxu0 %v6246_v42  ;;  %4915 = vmatprep.subr.bf16.mxu1 %v6249_v43  ;;  %v741_v42 = vld [vmem:[#allocation3 + $0xe0] sm:$0xff]  ;;  %v6267_v43 = vld [vmem:[#allocation11 + $0xb8c] ss:$16 sps:$4 sm:$0xff]   ;;  %vm1148_vm11 = vcmp.ge.f32.partialorder %v1140_v7, 0.0 }
 0x1d0   :  { %v967_v44 = vadd.f32 %v959_v47, %v941_v34  ;;  %v732_v59 = vadd.f32 %v724_v12, %v706_v38  ;;  %v750_v60 = vmul.f32 %v6986_v41, %v741_v42  ;;  %v793_v16 = vld [vmem:[#allocation3 + $0x160] sm:$0xff]  ;;  %v1156_v47 = vmul.f32 0.3, %v1140_v7  ;;  %v6285_v34 = vld [vmem:[#allocation11 + $0xbec] ss:$16 sps:$4 sm:$0xff]  }
 0x1d1   :  { %v802_v29 = vmul.f32 %v7002_v58, %v793_v16  ;;  %v6280_v38 = vld [vmem:[#allocation11 + $0xbe0] ss:$16 sps:$4 sm:$0xff]   ;;  %v6283_v12 = vld [vmem:[#allocation11 + $0xbe8] ss:$16 sps:$4 sm:$0xff]  }
 0x1d2   :  { %4588 = vmatpush1.bf16.msra.mxu0 %v6244_v51  ;;  %4916 = vmatpush1.bf16.msra.mxu1 %v6247_v56  ;;  %v6262_v51 = vld [vmem:[#allocation11 + $0xb80] ss:$16 sps:$4 sm:$0xff]   ;;  %v6270_v56 = vld [vmem:[#allocation11 + $0xba4] ss:$16 sps:$4 sm:$0xff]   ;;  %v1164_v37 = vsel %vm1148_vm11, %v1140_v7, %v1156_v47  ;;  %v6307_v47 = vld [vmem:[#allocation11 + $0xc68] ss:$16 sps:$4 sm:$0xff]  }
 0x1d3   :  { %4589 = vmatprep.subr.bf16.mxu0 %v6252_v62  ;;  %4917 = vmatprep.subr.bf16.mxu1 %v6255_v2  ;;  %v993_v62 = vadd.f32 %v985_v39, %v967_v44 }
 0x1d5   :  { %v1019_v2 = vadd.f32 %v1011_v49, %v993_v62  ;;  %v6288_v49 = vld [vmem:[#allocation11 + $0xc04] ss:$16 sps:$4 sm:$0xff]   ;;  %v6289_v62 = vld [vmem:[#allocation11 + $0xc08] ss:$16 sps:$4 sm:$0xff]  }
 0x1d6   :  { %4590 = vmatpush1.bf16.msra.mxu0 %v6250_v10  ;;  %4918 = vmatpush1.bf16.msra.mxu1 %v6253_v18  ;;  %v1106_v10 = vld [vmem:[#allocation3 + $0x468] sm:$0xff]  ;;  %v1089_v18 = vmul.f32 %v7072_v36, %v1080_v61  ;;  %v6294_v61 = vld [vmem:[#allocation11 + $0xc24] ss:$16 sps:$4 sm:$0xff]  }
 0x1d7   :  { %4591 = vmatprep.subr.bf16.mxu0 %v6258_v19  ;;  %4919 = vmatprep.subr.bf16.mxu1 %v6261_v26  ;;  %v1045_v15 = vadd.f32 %v1037_v57, %v1019_v2  ;;  %v758_v19 = vadd.f32 %v750_v60, %v732_v59  ;;  %v1115_v24 = vmul.f32 %v7078_v54, %v1106_v10  ;;  %v6274_v26 = vld [vmem:[#allocation11 + $0xbc0] ss:$16 sps:$4 sm:$0xff]   ;;  %v6295_v10 = vld [vmem:[#allocation11 + $0xc28] ss:$16 sps:$4 sm:$0xff]  }
 0x1d9   :  { %v1071_v25 = vadd.f32 %v1063_v5, %v1045_v15  ;;  %v784_v31 = vadd.f32 %v776_v20, %v758_v19  ;;  %v6292_v5 = vld [vmem:[#allocation11 + $0xc20] ss:$16 sps:$4 sm:$0xff]   ;;  %v880_v15 = vmul.f32 %v7019_v21, %v871_v0  ;;  %v6303_v19 = vld [vmem:[#allocation11 + $0xc4c] ss:$16 sps:$4 sm:$0xff]  }
 0x1da   :  { %4592 = vmatpush1.bf16.msra.mxu0 %v6256_v48  ;;  %4920 = vmatpush1.bf16.msra.mxu1 %v6259_v22  ;;  %v6282_v22 = vld [vmem:[#allocation11 + $0xbe4] ss:$16 sps:$4 sm:$0xff]   ;;  %v6298_v20 = vld [vmem:[#allocation11 + $0xc40] ss:$16 sps:$4 sm:$0xff]  }
 0x1db   :  { %4593 = vmatprep.subr.bf16.mxu0 %v6264_v30  ;;  %4921 = vmatprep.subr.bf16.mxu1 %v6267_v43  ;;  %v1097_v48 = vadd.f32 %v1089_v18, %v1071_v25  ;;  %v819_v30 = vld [vmem:[#allocation3 + $0x1a0] sm:$0xff]  ;;  %v810_v43 = vadd.f32 %v802_v29, %v784_v31 }
 0x1dc   :  { %v828_v44 = vmul.f32 %v7006_v1, %v819_v30  ;;  %v897_v18 = vld [vmem:[#allocation3 + $0x260] sm:$0xff]  ;;  %v6315_v30 = vld [vmem:[#allocation11 + $0xc8c] ss:$16 sps:$4 sm:$0xff]  }
 0x1dd   :  { %v1123_v39 = vadd.f32 %v1115_v24, %v1097_v48  ;;  %v923_v25 = vld [vmem:[#allocation3 + $0x2a0] sm:$0xff] }
 0x1de   :  { %4594 = vmatpush1.bf16.msra.mxu0 %v6262_v51  ;;  %4922 = vmatpush1.bf16.msra.mxu1 %v6265_v55  ;;  %v845_v51 = vld [vmem:[#allocation3 + $0x1e0] sm:$0xff]  ;;  %v836_v59 = vadd.f32 %v828_v44, %v810_v43  ;;  %v932_v29 = vmul.f32 %v7036_v40, %v923_v25 }
 0x1df   :  { %4595 = vmatprep.subr.bf16.mxu0 %v6270_v56  ;;  %4923 = vmatprep.subr.bf16.mxu1 %v6273_v3  ;;  %v1133_v42 = vmul.f32 %v7085_v9, %v1123_v39  ;;  %v6286_v55 = vld [vmem:[#allocation11 + $0xc00] ss:$16 sps:$4 sm:$0xff]   ;;  %v5633_v56 = vpack.c.bf16 %v1164_v37, %v1164_v37  ;;  %v854_v60 = vmul.f32 %v7013_v13, %v845_v51  ;;  %v6297_v3 = vld [vmem:[#allocation11 + $0xc2c] ss:$16 sps:$4 sm:$0xff]   ;;  %v6306_v24 = vld [vmem:[#allocation11 + $0xc64] ss:$16 sps:$4 sm:$0xff]  }
 0x1e0   :  { %v6312_v48 = vld [vmem:[#allocation11 + $0xc84] ss:$16 sps:$4 sm:$0xff]   ;;  %v692_v39 = vld [vmem:[#allocation3 + $0x78] sm:$0xff] }
 0x1e1   :  { %v1143_v53 = vadd.f32 %v7087_v8, %v1133_v42  ;;  %v718_v37 = vld [vmem:[#allocation3 + $0xb8] sm:$0xff] }
 0x1e2   :  { %4596 = vmatpush1.bf16.msra.mxu0 %v6268_v11  ;;  %4924 = vmatpush1.bf16.msra.mxu1 %v6271_v14  ;;  %v6300_v11 = vld [vmem:[#allocation11 + $0xc44] ss:$16 sps:$4 sm:$0xff]   ;;  %v862_v14 = vadd.f32 %v854_v60, %v836_v59  ;;  %v744_v42 = vld [vmem:[#allocation3 + $0xf8] sm:$0xff] }
 0x1e3   :  { %4597 = vmatprep.subr.bf16.mxu0 %v6276_v6  ;;  %4925 = vmatprep.subr.bf16.mxu1 %v6279_v17  ;;  %vm1151_vm12 = vcmp.ge.f32.partialorder %v1143_v53, 0.0  ;;  %v1159_v57 = vmul.f32 0.3, %v1143_v53  ;;  %v6301_v6 = vld [vmem:[#allocation11 + $0xc48] ss:$16 sps:$4 sm:$0xff]   ;;  %v906_v17 = vmul.f32 %v7029_v28, %v897_v18 }
 0x1e4   :  { %v888_v16 = vadd.f32 %v880_v15, %v862_v14  ;;  %v770_v51 = vld [vmem:[#allocation3 + $0x138] sm:$0xff]  ;;  %v6324_v18 = vld [vmem:[#allocation11 + $0xcc4] ss:$16 sps:$4 sm:$0xff]  }
 0x1e5   :  { %v1167_v2 = vsel %vm1151_vm12, %v1143_v53, %v1159_v57  ;;  %v6313_v53 = vld [vmem:[#allocation11 + $0xc88] ss:$16 sps:$4 sm:$0xff]   ;;  %v6318_v57 = vld [vmem:[#allocation11 + $0xca4] ss:$16 sps:$4 sm:$0xff]   ;;  %v6321_v59 = vld [vmem:[#allocation11 + $0xcac] ss:$16 sps:$4 sm:$0xff]   ;;  %v779_v0 = vmul.f32 %v6994_v50, %v770_v51 }
 0x1e6   :  { %4598 = vmatpush1.bf16.msra.mxu0 %v6274_v26  ;;  %4926 = vmatpush1.bf16.msra.mxu1 %v6277_v45  ;;  %v5636_v7 = vpack.c.bf16 %v1167_v2, %v1167_v2  ;;  %v6309_v26 = vld [vmem:[#allocation11 + $0xc6c] ss:$16 sps:$4 sm:$0xff]   ;;  %v6304_v45 = vld [vmem:[#allocation11 + $0xc60] ss:$16 sps:$4 sm:$0xff]   ;;  %v914_v31 = vadd.f32 %v906_v17, %v888_v16 }
 0x1e7   :  { %4599 = vmatprep.subr.bf16.mxu0 %v6282_v22  ;;  %4927 = vmatprep.subr.bf16.mxu1 %v6285_v34  ;;  %v949_v22 = vld [vmem:[#allocation3 + $0x2e0] sm:$0xff]  ;;  %v666_v34 = vld [vmem:[#allocation3 + $0x38] sm:$0xff] }
 0x1e8   :  { %v940_v43 = vadd.f32 %v932_v29, %v914_v31  ;;  %v958_v44 = vmul.f32 %v7045_v46, %v949_v22  ;;  %v796_v60 = vld [vmem:[#allocation3 + $0x178] sm:$0xff]  ;;  %v6330_v29 = vld [vmem:[#allocation11 + $0xce4] ss:$16 sps:$4 sm:$0xff]  }
 0x1e9   :  { %v805_v15 = vmul.f32 %v7002_v58, %v796_v60  ;;  %v6333_v22 = vld [vmem:[#allocation11 + $0xcec] ss:$16 sps:$4 sm:$0xff]  }
 0x1ea   :  { %4600 = vmatpush1.bf16.msra.mxu0 %v6280_v38  ;;  %4928 = vmatpush1.bf16.msra.mxu1 %v6283_v12  ;;  %v675_v38 = vmul.f32 %v6975_v32, %v666_v34  ;;  %v701_v12 = vmul.f32 %v6978_v33, %v692_v39  ;;  %v978_v60 = vld [vmem:[#allocation3 + $0x338] sm:$0xff] }
 0x1eb   :  { %4610 = vmatprep.subr.bf16.mxu0 %v6288_v49  ;;  %4938 = vmatprep.subr.bf16.mxu1 %v6291_v52  ;;  %v727_v49 = vmul.f32 %v6982_v35, %v718_v37  ;;  %v6310_v52 = vld [vmem:[#allocation11 + $0xc80] ss:$16 sps:$4 sm:$0xff]   ;;  %v926_v37 = vld [vmem:[#allocation3 + $0x2b8] sm:$0xff] }
 0x1ed   :  { %4602 = vmatmul.mubr.bf16.vlgmr.msra.gmra.mrb[0].mxu0 %v5633_v56  ;;  %4930 = vmatmul.mubr.bf16.vlgmr.msra.gmra.mrb[0].mxu1 %v5633_v56  ;;  %v709_v56 = vadd.f32 %v701_v12, %v675_v38 }
 0x1ee   :  { %4611 = vmatpush1.bf16.msra.mxu0 %v6286_v55  ;;  %4939 = vmatpush1.bf16.msra.mxu1 %v6289_v62  ;;  %v975_v55 = vld [vmem:[#allocation3 + $0x320] sm:$0xff]  ;;  %v753_v62 = vmul.f32 %v6986_v41, %v744_v42 }
 0x1ef   :  { %4612 = vmatprep.subr.bf16.mxu0 %v6294_v61  ;;  %4940 = vmatprep.subr.bf16.mxu1 %v6297_v3  ;;  %v735_v61 = vadd.f32 %v727_v49, %v709_v56  ;;  %v966_v3 = vadd.f32 %v958_v44, %v940_v43  ;;  %v984_v2 = vmul.f32 %v7050_v63, %v975_v55  ;;  %v6328_v42 = vld [vmem:[#allocation11 + $0xce0] ss:$16 sps:$4 sm:$0xff]   ;;  %v6331_v43 = vld [vmem:[#allocation11 + $0xce8] ss:$16 sps:$4 sm:$0xff]  }
 0x1f0   :  { %4642 = vmatprep.mubr.bf16.mxu0 %v5636_v7  ;;  %4970 = vmatprep.mubr.bf16.mxu1 %v5636_v7  ;;  %v6316_v7 = vld [vmem:[#allocation11 + $0xca0] ss:$16 sps:$4 sm:$0xff]   ;;  %v952_v55 = vld [vmem:[#allocation3 + $0x2f8] sm:$0xff] }
 0x1f1   :  { %v761_v14 = vadd.f32 %v753_v62, %v735_v61  ;;  %v992_v17 = vadd.f32 %v984_v2, %v966_v3  ;;  %v1053_v44 = vld [vmem:[#allocation3 + $0x3e0] sm:$0xff]  ;;  %v935_v62 = vmul.f32 %v7036_v40, %v926_v37  ;;  %v6349_v37 = vld [vmem:[#allocation11 + $0xd48] ss:$16 sps:$4 sm:$0xff]  }
 0x1f2   :  { %4613 = vmatpush1.bf16.msra.mxu0 %v6292_v5  ;;  %4941 = vmatpush1.bf16.msra.mxu1 %v6295_v10  ;;  %v822_v5 = vld [vmem:[#allocation3 + $0x1b8] sm:$0xff]  ;;  %v6334_v61 = vld [vmem:[#allocation11 + $0xd00] ss:$16 sps:$4 sm:$0xff]  }
 0x1f3   :  { %4614 = vmatprep.subr.bf16.mxu0 %v6300_v11  ;;  %4942 = vmatprep.subr.bf16.mxu1 %v6303_v19  ;;  %v6319_v10 = vld [vmem:[#allocation11 + $0xca8] ss:$16 sps:$4 sm:$0xff]   ;;  %v1001_v11 = vld [vmem:[#allocation3 + $0x360] sm:$0xff]  ;;  %v6327_v19 = vld [vmem:[#allocation11 + $0xccc] ss:$16 sps:$4 sm:$0xff]   ;;  %v831_v16 = vmul.f32 %v7006_v1, %v822_v5  ;;  %v961_v5 = vmul.f32 %v7045_v46, %v952_v55 }
 0x1f4   :  { %v1010_v25 = vmul.f32 %v7056_v4, %v1001_v11  ;;  %v1079_v3 = vld [vmem:[#allocation3 + $0x420] sm:$0xff]  ;;  %v1004_v11 = vld [vmem:[#allocation3 + $0x378] sm:$0xff] }
 0x1f6   :  { %4615 = vmatpush1.bf16.msra.mxu0 %v6298_v20  ;;  %4943 = vmatpush1.bf16.msra.mxu1 %v6301_v6  ;;  %v848_v20 = vld [vmem:[#allocation3 + $0x1f8] sm:$0xff]  ;;  %v787_v6 = vadd.f32 %v779_v0, %v761_v14  ;;  %v1018_v38 = vadd.f32 %v1010_v25, %v992_v17  ;;  %v6348_v17 = vld [vmem:[#allocation11 + $0xd44] ss:$16 sps:$4 sm:$0xff]  }
 0x1f7   :  { %4616 = vmatprep.subr.bf16.mxu0 %v6306_v24  ;;  %4944 = vmatprep.subr.bf16.mxu1 %v6309_v26  ;;  %v874_v24 = vld [vmem:[#allocation3 + $0x238] sm:$0xff]  ;;  %v6322_v26 = vld [vmem:[#allocation11 + $0xcc0] ss:$16 sps:$4 sm:$0xff]   ;;  %v857_v31 = vmul.f32 %v7013_v13, %v848_v20 }
 0x1f8   :  { %v883_v39 = vmul.f32 %v7019_v21, %v874_v24  ;;  %v6337_v0 = vld [vmem:[#allocation11 + $0xd08] ss:$16 sps:$4 sm:$0xff]   ;;  %v1105_v25 = vld [vmem:[#allocation3 + $0x460] sm:$0xff] }
 0x1fa   :  { %4617 = vmatpush1.bf16.msra.mxu0 %v6304_v45  ;;  %4945 = vmatpush1.bf16.msra.mxu1 %v6307_v47  ;;  %v6325_v45 = vld [vmem:[#allocation11 + $0xcc8] ss:$16 sps:$4 sm:$0xff]   ;;  %v1027_v47 = vld [vmem:[#allocation3 + $0x3a0] sm:$0xff] }
 0x1fb   :  { %4618 = vmatprep.subr.bf16.mxu0 %v6312_v48  ;;  %4946 = vmatprep.subr.bf16.mxu1 %v6315_v30  ;;  %v813_v48 = vadd.f32 %v805_v15, %v787_v6  ;;  %v900_v30 = vld [vmem:[#allocation3 + $0x278] sm:$0xff]  ;;  %v1036_v12 = vmul.f32 %v7063_v23, %v1027_v47  ;;  %v987_v15 = vmul.f32 %v7050_v63, %v978_v60 }
 0x1fc   :  { %v909_v51 = vmul.f32 %v7029_v28, %v900_v30  ;;  %v1088_v6 = vmul.f32 %v7072_v36, %v1079_v3  ;;  %v6351_v47 = vld [vmem:[#allocation11 + $0xd4c] ss:$16 sps:$4 sm:$0xff]   ;;  %v6355_v60 = vld [vmem:[#allocation11 + $0xd68] ss:$16 sps:$4 sm:$0xff]  }
 0x1fd   :  { %v839_v34 = vadd.f32 %v831_v16, %v813_v48  ;;  %v1030_v16 = vld [vmem:[#allocation3 + $0x3b8] sm:$0xff]  ;;  %v665_v48 = vld [vmem:[#allocation3 + $0x30] sm:$0xff] }
 0x1fe   :  { %4619 = vmatpush1.bf16.msra.mxu0 %v6310_v52  ;;  %4947 = vmatpush1.bf16.msra.mxu1 %v6313_v53  ;;  %v6336_v52 = vld [vmem:[#allocation11 + $0xd04] ss:$16 sps:$4 sm:$0xff]   ;;  %v6339_v53 = vld [vmem:[#allocation11 + $0xd0c] ss:$16 sps:$4 sm:$0xff]  }
 0x1ff   :  { %4620 = vmatprep.subr.bf16.mxu0 %v6318_v57  ;;  %4948 = vmatprep.subr.bf16.mxu1 %v6321_v59  ;;  %v865_v49 = vadd.f32 %v857_v31, %v839_v34  ;;  %v1044_v57 = vadd.f32 %v1036_v12, %v1018_v38  ;;  %v1062_v59 = vmul.f32 %v7067_v27, %v1053_v44  ;;  %v691_v31 = vld [vmem:[#allocation3 + $0x70] sm:$0xff]  ;;  %v1082_v38 = vld [vmem:[#allocation3 + $0x438] sm:$0xff] }
 0x200   :  { %v1114_v34 = vmul.f32 %v7078_v54, %v1105_v25  ;;  %v6346_v12 = vld [vmem:[#allocation11 + $0xd40] ss:$16 sps:$4 sm:$0xff]   ;;  %v674_v44 = vmul.f32 %v6975_v32, %v665_v48  ;;  %v6363_v3 = vld [vmem:[#allocation11 + $0xd8c] ss:$16 sps:$4 sm:$0xff]  }
 0x201   :  { %v891_v56 = vadd.f32 %v883_v39, %v865_v49  ;;  %v1070_v20 = vadd.f32 %v1062_v59, %v1044_v57  ;;  %v700_v49 = vmul.f32 %v6978_v33, %v691_v31  ;;  %v6352_v59 = vld [vmem:[#allocation11 + $0xd60] ss:$16 sps:$4 sm:$0xff]   ;;  %v6360_v33 = vld [vmem:[#allocation11 + $0xd84] ss:$16 sps:$4 sm:$0xff]  }
 0x202   :  { %4621 = vmatpush1.bf16.msra.mxu0 %v6316_v7  ;;  %4949 = vmatpush1.bf16.msra.mxu1 %v6319_v10  ;;  %v6342_v7 = vld [vmem:[#allocation11 + $0xd24] ss:$16 sps:$4 sm:$0xff]   ;;  %v6345_v10 = vld [vmem:[#allocation11 + $0xd2c] ss:$16 sps:$4 sm:$0xff]   ;;  %v6370_v31 = vld [vmem:[#allocation11 + $0xdc0] ss:$16 sps:$4 sm:$0xff]  }
 0x203   :  { %4622 = vmatprep.subr.bf16.mxu0 %v6324_v18  ;;  %4950 = vmatprep.subr.bf16.mxu1 %v6327_v19  ;;  %v917_v2 = vadd.f32 %v909_v51, %v891_v56  ;;  %v6340_v18 = vld [vmem:[#allocation11 + $0xd20] ss:$16 sps:$4 sm:$0xff]   ;;  %v6343_v19 = vld [vmem:[#allocation11 + $0xd28] ss:$16 sps:$4 sm:$0xff]   ;;  %v1096_v30 = vadd.f32 %v1088_v6, %v1070_v20  ;;  %v6354_v51 = vld [vmem:[#allocation11 + $0xd64] ss:$16 sps:$4 sm:$0xff]   ;;  %v1091_v56 = vmul.f32 %v7072_v36, %v1082_v38 }
 0x204   :  { %v769_v20 = vld [vmem:[#allocation3 + $0x130] sm:$0xff]  ;;  %v6381_v38 = vld [vmem:[#allocation11 + $0xdec] ss:$16 sps:$4 sm:$0xff]  }
 0x205   :  { %v943_v14 = vadd.f32 %v935_v62, %v917_v2  ;;  %v1122_v62 = vadd.f32 %v1114_v34, %v1096_v30  ;;  %v743_v2 = vld [vmem:[#allocation3 + $0xf0] sm:$0xff] }
 0x206   :  { %4623 = vmatpush1.bf16.msra.mxu0 %v6322_v26  ;;  %4951 = vmatpush1.bf16.msra.mxu1 %v6325_v45  ;;  %v1013_v26 = vmul.f32 %v7056_v4, %v1004_v11  ;;  %v1056_v45 = vld [vmem:[#allocation3 + $0x3f8] sm:$0xff] }
 0x207   :  { %4624 = vmatprep.subr.bf16.mxu0 %v6330_v29  ;;  %4952 = vmatprep.subr.bf16.mxu1 %v6333_v22  ;;  %v969_v24 = vadd.f32 %v961_v5, %v943_v14  ;;  %v1039_v22 = vmul.f32 %v7063_v23, %v1030_v16  ;;  %v1065_v39 = vmul.f32 %v7067_v27, %v1056_v45  ;;  %v6361_v11 = vld [vmem:[#allocation11 + $0xd88] ss:$16 sps:$4 sm:$0xff]   ;;  %v6364_v16 = vld [vmem:[#allocation11 + $0xda0] ss:$16 sps:$4 sm:$0xff]   ;;  %v6372_v45 = vld [vmem:[#allocation11 + $0xdc4] ss:$16 sps:$4 sm:$0xff]  }
 0x209   :  { %v995_v29 = vadd.f32 %v987_v15, %v969_v24 }
 0x20a   :  { %4625 = vmatpush1.bf16.msra.mxu0 %v6328_v42  ;;  %4953 = vmatpush1.bf16.msra.mxu1 %v6331_v43  ;;  %v1108_v43 = vld [vmem:[#allocation3 + $0x478] sm:$0xff] }
 0x20b   :  { %4626 = vmatprep.subr.bf16.mxu0 %v6336_v52  ;;  %4954 = vmatprep.subr.bf16.mxu1 %v6339_v53  ;;  %v1021_v42 = vadd.f32 %v1013_v26, %v995_v29  ;;  %v6357_v52 = vld [vmem:[#allocation11 + $0xd6c] ss:$16 sps:$4 sm:$0xff]   ;;  %v717_v53 = vld [vmem:[#allocation3 + $0xb0] sm:$0xff]  ;;  %v1117_v57 = vmul.f32 %v7078_v54, %v1108_v43  ;;  %v778_v26 = vmul.f32 %v6994_v50, %v769_v20  ;;  %v6373_v29 = vld [vmem:[#allocation11 + $0xdc8] ss:$16 sps:$4 sm:$0xff]  }
 0x20c   :  { %v726_v32 = vmul.f32 %v6982_v35, %v717_v53  ;;  %v6369_v35 = vld [vmem:[#allocation11 + $0xdac] ss:$16 sps:$4 sm:$0xff]   ;;  %v821_v50 = vld [vmem:[#allocation3 + $0x1b0] sm:$0xff]  ;;  %v6403_v20 = vld [vmem:[#allocation11 + $0xe68] ss:$16 sps:$4 sm:$0xff]  }
 0x20d   :  { %v1047_v55 = vadd.f32 %v1039_v22, %v1021_v42  ;;  %v6379_v42 = vld [vmem:[#allocation11 + $0xde8] ss:$16 sps:$4 sm:$0xff]  }
 0x20e   :  { %4627 = vmatpush1.bf16.msra.mxu0 %v6334_v61  ;;  %4955 = vmatpush1.bf16.msra.mxu1 %v6337_v0  ;;  %v708_v0 = vadd.f32 %v700_v49, %v674_v44  ;;  %v830_v49 = vmul.f32 %v7006_v1, %v821_v50  ;;  %v6421_v50 = vld [vmem:[#allocation11 + $0xec8] ss:$16 sps:$4 sm:$0xff]  }
 0x20f   :  { %4628 = vmatprep.subr.bf16.mxu0 %v6342_v7  ;;  %4956 = vmatprep.subr.bf16.mxu1 %v6345_v10  ;;  %v1073_v61 = vadd.f32 %v1065_v39, %v1047_v55  ;;  %v1132_v7 = vmul.f32 %v7085_v9, %v1122_v62  ;;  %v6358_v10 = vld [vmem:[#allocation11 + $0xd80] ss:$16 sps:$4 sm:$0xff]   ;;  %v6378_v39 = vld [vmem:[#allocation11 + $0xde4] ss:$16 sps:$4 sm:$0xff]   ;;  %v6385_v62 = vld [vmem:[#allocation11 + $0xe08] ss:$16 sps:$4 sm:$0xff]  }
 0x210   :  { %v734_v15 = vadd.f32 %v726_v32, %v708_v0  ;;  %v873_v0 = vld [vmem:[#allocation3 + $0x230] sm:$0xff] }
 0x211   :  { %v1099_v5 = vadd.f32 %v1091_v56, %v1073_v61  ;;  %v1142_v25 = vadd.f32 %v7087_v8, %v1132_v7  ;;  %v6382_v56 = vld [vmem:[#allocation11 + $0xe00] ss:$16 sps:$4 sm:$0xff]   ;;  %v6393_v61 = vld [vmem:[#allocation11 + $0xe2c] ss:$16 sps:$4 sm:$0xff]  }
 0x212   :  { %4629 = vmatpush1.bf16.msra.mxu0 %v6340_v18  ;;  %4957 = vmatpush1.bf16.msra.mxu1 %v6343_v19  ;;  %v752_v18 = vmul.f32 %v6986_v41, %v743_v2  ;;  %v6366_v19 = vld [vmem:[#allocation11 + $0xda4] ss:$16 sps:$4 sm:$0xff]   ;;  %v6375_v41 = vld [vmem:[#allocation11 + $0xdcc] ss:$16 sps:$4 sm:$0xff]   ;;  %v6388_v32 = vld [vmem:[#allocation11 + $0xe20] ss:$16 sps:$4 sm:$0xff]   ;;  %v882_v2 = vmul.f32 %v7019_v21, %v873_v0 }
 0x213   :  { %4630 = vmatprep.subr.bf16.mxu0 %v6348_v17  ;;  %4958 = vmatprep.subr.bf16.mxu1 %v6351_v47  ;;  %v1125_v14 = vadd.f32 %v1117_v57, %v1099_v5  ;;  %v6367_v17 = vld [vmem:[#allocation11 + $0xda8] ss:$16 sps:$4 sm:$0xff]   ;;  %v795_v47 = vld [vmem:[#allocation3 + $0x170] sm:$0xff]  ;;  %v1158_v22 = vmul.f32 0.3, %v1142_v25  ;;  %vm1150_vm13 = vcmp.ge.f32.partialorder %v1142_v25, 0.0 }
 0x214   :  { %v760_v24 = vadd.f32 %v752_v18, %v734_v15  ;;  %v804_v34 = vmul.f32 %v7002_v58, %v795_v47  ;;  %v6387_v58 = vld [vmem:[#allocation11 + $0xe0c] ss:$16 sps:$4 sm:$0xff]   ;;  %v6396_v5 = vld [vmem:[#allocation11 + $0xe44] ss:$16 sps:$4 sm:$0xff]   ;;  %v6400_v21 = vld [vmem:[#allocation11 + $0xe60] ss:$16 sps:$4 sm:$0xff]  }
 0x215   :  { %v1135_v6 = vmul.f32 %v7085_v9, %v1125_v14  ;;  %v1166_v43 = vsel %vm1150_vm13, %v1142_v25, %v1158_v22  ;;  %v6399_v7 = vld [vmem:[#allocation11 + $0xe4c] ss:$16 sps:$4 sm:$0xff]   ;;  %v6402_v18 = vld [vmem:[#allocation11 + $0xe64] ss:$16 sps:$4 sm:$0xff]   ;;  %v6439_v0 = vld [vmem:[#allocation11 + $0xf28] ss:$16 sps:$4 sm:$0xff]  }
 0x216   :  { %4631 = vmatpush1.bf16.msra.mxu0 %v6346_v12  ;;  %4959 = vmatpush1.bf16.msra.mxu1 %v6349_v37  ;;  %v786_v30 = vadd.f32 %v778_v26, %v760_v24  ;;  %v6376_v37 = vld [vmem:[#allocation11 + $0xde0] ss:$16 sps:$4 sm:$0xff]   ;;  %v5635_v53 = vpack.c.bf16 %v1166_v43, %v1166_v43  ;;  %v6411_v25 = vld [vmem:[#allocation11 + $0xe8c] ss:$16 sps:$4 sm:$0xff]   ;;  %v6409_v26 = vld [vmem:[#allocation11 + $0xe88] ss:$16 sps:$4 sm:$0xff]  }
 0x217   :  { %4632 = vmatprep.subr.bf16.mxu0 %v6354_v51  ;;  %4960 = vmatprep.subr.bf16.mxu1 %v6357_v52  ;;  %v1145_v48 = vadd.f32 %v7087_v8, %v1135_v6  ;;  %v6384_v51 = vld [vmem:[#allocation11 + $0xe04] ss:$16 sps:$4 sm:$0xff]   ;;  %v6429_v43 = vld [vmem:[#allocation11 + $0xeec] ss:$16 sps:$4 sm:$0xff]  }
 0x218   :  { %v812_v44 = vadd.f32 %v804_v34, %v786_v30  ;;  %v847_v52 = vld [vmem:[#allocation3 + $0x1f0] sm:$0xff] }
 0x219   :  { %v1161_v12 = vmul.f32 0.3, %v1145_v48  ;;  %vm1153_vm14 = vcmp.ge.f32.partialorder %v1145_v48, 0.0  ;;  %v951_v24 = vld [vmem:[#allocation3 + $0x2f0] sm:$0xff] }
 0x21a   :  { %4633 = vmatpush1.bf16.msra.mxu0 %v6352_v59  ;;  %4961 = vmatpush1.bf16.msra.mxu1 %v6355_v60  ;;  %v838_v57 = vadd.f32 %v830_v49, %v812_v44  ;;  %v856_v59 = vmul.f32 %v7013_v13, %v847_v52  ;;  %v6390_v60 = vld [vmem:[#allocation11 + $0xe24] ss:$16 sps:$4 sm:$0xff]   ;;  %v6427_v49 = vld [vmem:[#allocation11 + $0xee8] ss:$16 sps:$4 sm:$0xff]  }
 0x21b   :  { %4634 = vmatprep.subr.bf16.mxu0 %v6360_v33  ;;  %4962 = vmatprep.subr.bf16.mxu1 %v6363_v3  ;;  %v1169_v55 = vsel %vm1153_vm14, %v1145_v48, %v1161_v12  ;;  %v6391_v33 = vld [vmem:[#allocation11 + $0xe28] ss:$16 sps:$4 sm:$0xff]   ;;  %v899_v13 = vld [vmem:[#allocation3 + $0x270] sm:$0xff]  ;;  %v6417_v48 = vld [vmem:[#allocation11 + $0xeac] ss:$16 sps:$4 sm:$0xff]  }
 0x21c   :  { %v5638_v1 = vpack.c.bf16 %v1169_v55, %v1169_v55  ;;  %v864_v3 = vadd.f32 %v856_v59, %v838_v57  ;;  %v908_v15 = vmul.f32 %v7029_v28, %v899_v13  ;;  %v6406_v28 = vld [vmem:[#allocation11 + $0xe80] ss:$16 sps:$4 sm:$0xff]   ;;  %v6414_v47 = vld [vmem:[#allocation11 + $0xea4] ss:$16 sps:$4 sm:$0xff]  }
 0x21d   :  { %v6420_v34 = vld [vmem:[#allocation11 + $0xec4] ss:$16 sps:$4 sm:$0xff]  }
 0x21e   :  { %4635 = vmatpush1.bf16.msra.mxu0 %v6358_v10  ;;  %4963 = vmatpush1.bf16.msra.mxu1 %v6361_v11  ;;  %v6394_v10 = vld [vmem:[#allocation11 + $0xe40] ss:$16 sps:$4 sm:$0xff]   ;;  %v6397_v11 = vld [vmem:[#allocation11 + $0xe48] ss:$16 sps:$4 sm:$0xff]   ;;  %v890_v14 = vadd.f32 %v882_v2, %v864_v3  ;;  %v6432_v52 = vld [vmem:[#allocation11 + $0xf04] ss:$16 sps:$4 sm:$0xff]  }
 0x21f   :  { %4636 = vmatprep.subr.bf16.mxu0 %v6366_v19  ;;  %4964 = vmatprep.subr.bf16.mxu1 %v6369_v35  ;;  %v6405_v19 = vld [vmem:[#allocation11 + $0xe6c] ss:$16 sps:$4 sm:$0xff]   ;;  %v925_v35 = vld [vmem:[#allocation3 + $0x2b0] sm:$0xff] }
 0x220   :  { %v916_v6 = vadd.f32 %v908_v15, %v890_v14  ;;  %v1029_v44 = vld [vmem:[#allocation3 + $0x3b0] sm:$0xff]  ;;  %v6447_v3 = vld [vmem:[#allocation11 + $0xf4c] ss:$16 sps:$4 sm:$0xff]  }
 0x221   :  { %v1055_v55 = vld [vmem:[#allocation3 + $0x3f0] sm:$0xff] }
 0x222   :  { %4637 = vmatpush1.bf16.msra.mxu0 %v6364_v16  ;;  %4965 = vmatpush1.bf16.msra.mxu1 %v6367_v17  ;;  %v934_v16 = vmul.f32 %v7036_v40, %v925_v35  ;;  %v6408_v17 = vld [vmem:[#allocation11 + $0xe84] ss:$16 sps:$4 sm:$0xff]   ;;  %v6412_v40 = vld [vmem:[#allocation11 + $0xea0] ss:$16 sps:$4 sm:$0xff]   ;;  %v1064_v57 = vmul.f32 %v7067_v27, %v1055_v55 }
 0x223   :  { %4638 = vmatprep.subr.bf16.mxu0 %v6372_v45  ;;  %4966 = vmatprep.subr.bf16.mxu1 %v6375_v41  ;;  %v960_v41 = vmul.f32 %v7045_v46, %v951_v24  ;;  %v6418_v46 = vld [vmem:[#allocation11 + $0xec0] ss:$16 sps:$4 sm:$0xff]   ;;  %v6438_v59 = vld [vmem:[#allocation11 + $0xf24] ss:$16 sps:$4 sm:$0xff]  }
 0x224   :  { %v942_v45 = vadd.f32 %v934_v16, %v916_v6  ;;  %v1107_v2 = vld [vmem:[#allocation3 + $0x470] sm:$0xff]  ;;  %v6465_v6 = vld [vmem:[#allocation11 + $0xfac] ss:$16 sps:$4 sm:$0xff]  }
 0x225   :  { %v6442_v27 = vld [vmem:[#allocation11 + $0xf40] ss:$16 sps:$4 sm:$0xff]   ;;  %v1116_v13 = vmul.f32 %v7078_v54, %v1107_v2  ;;  %v6462_v54 = vld [vmem:[#allocation11 + $0xfa4] ss:$16 sps:$4 sm:$0xff]  }
 0x226   :  { %4639 = vmatpush1.bf16.msra.mxu0 %v6370_v31  ;;  %4967 = vmatpush1.bf16.msra.mxu1 %v6373_v29  ;;  %v977_v31 = vld [vmem:[#allocation3 + $0x330] sm:$0xff]  ;;  %v6415_v29 = vld [vmem:[#allocation11 + $0xea8] ss:$16 sps:$4 sm:$0xff]   ;;  %v968_v22 = vadd.f32 %v960_v41, %v942_v45 }
 0x227   :  { %4640 = vmatprep.subr.bf16.mxu0 %v6378_v39  ;;  %4968 = vmatprep.subr.bf16.mxu1 %v6381_v38  ;;  %v986_v30 = vmul.f32 %v7050_v63, %v977_v31  ;;  %v6423_v39 = vld [vmem:[#allocation11 + $0xecc] ss:$16 sps:$4 sm:$0xff]   ;;  %v1003_v38 = vld [vmem:[#allocation3 + $0x370] sm:$0xff]  ;;  %v6469_v45 = vld [vmem:[#allocation11 + $0xfc8] ss:$16 sps:$4 sm:$0xff]  }
 0x228   :  { %v6424_v63 = vld [vmem:[#allocation11 + $0xee0] ss:$16 sps:$4 sm:$0xff]   ;;  %v6468_v24 = vld [vmem:[#allocation11 + $0xfc4] ss:$16 sps:$4 sm:$0xff]   ;;  %v6475_v31 = vld [vmem:[#allocation11 + $0xfe8] ss:$16 sps:$4 sm:$0xff]  }
 0x229   :  { %v994_v12 = vadd.f32 %v986_v30, %v968_v22  ;;  %v6448_v14 = vld [vmem:[#allocation11 + $0xf60] ss:$16 sps:$4 sm:$0xff]  }
 0x22a   :  { %4641 = vmatpush1.bf16.msra.mxu0 %v6376_v37  ;;  %4969 = vmatpush1.bf16.msra.mxu1 %v6379_v42  ;;  %v1012_v37 = vmul.f32 %v7056_v4, %v1003_v38  ;;  %v6426_v42 = vld [vmem:[#allocation11 + $0xee4] ss:$16 sps:$4 sm:$0xff]   ;;  %v6430_v4 = vld [vmem:[#allocation11 + $0xf00] ss:$16 sps:$4 sm:$0xff]  }
 0x22b   :  { %4651 = vmatprep.subr.bf16.mxu0 %v6384_v51  ;;  %4979 = vmatprep.subr.bf16.mxu1 %v6387_v58  ;;  %v1038_v58 = vmul.f32 %v7063_v23, %v1029_v44  ;;  %v6436_v23 = vld [vmem:[#allocation11 + $0xf20] ss:$16 sps:$4 sm:$0xff]  }
 0x22c   :  { %v1020_v51 = vadd.f32 %v1012_v37, %v994_v12  ;;  %v6454_v35 = vld [vmem:[#allocation11 + $0xf80] ss:$16 sps:$4 sm:$0xff]  }
 0x22d   :  { %4643 = vmatmul.mubr.bf16.vlgmr.msra.gmra.mrb[0].mxu0 %v5635_v53  ;;  %4971 = vmatmul.mubr.bf16.vlgmr.msra.gmra.mrb[0].mxu1 %v5635_v53  ;;  %v6435_v53 = vld [vmem:[#allocation11 + $0xf0c] ss:$16 sps:$4 sm:$0xff]   ;;  %v6460_v16 = vld [vmem:[#allocation11 + $0xfa0] ss:$16 sps:$4 sm:$0xff]  }
 0x22e   :  { %4652 = vmatpush1.bf16.msra.mxu0 %v6382_v56  ;;  %4980 = vmatpush1.bf16.msra.mxu1 %v6385_v62  ;;  %v6433_v56 = vld [vmem:[#allocation11 + $0xf08] ss:$16 sps:$4 sm:$0xff]   ;;  %v1046_v62 = vadd.f32 %v1038_v58, %v1020_v51 }
 0x22f   :  { %4653 = vmatprep.subr.bf16.mxu0 %v6390_v60  ;;  %4981 = vmatprep.subr.bf16.mxu1 %v6393_v61  ;;  %v6441_v60 = vld [vmem:[#allocation11 + $0xf2c] ss:$16 sps:$4 sm:$0xff]   ;;  %v1081_v61 = vld [vmem:[#allocation3 + $0x430] sm:$0xff] }
 0x230   :  { %4683 = vmatprep.mubr.bf16.mxu0 %v5638_v1  ;;  %5011 = vmatprep.mubr.bf16.mxu1 %v5638_v1  ;;  %v1072_v1 = vadd.f32 %v1064_v57, %v1046_v62 }
 0x232   :  { %4654 = vmatpush1.bf16.msra.mxu0 %v6388_v32  ;;  %4982 = vmatpush1.bf16.msra.mxu1 %v6391_v33  ;;  %v1090_v32 = vmul.f32 %v7072_v36, %v1081_v61  ;;  %v6444_v33 = vld [vmem:[#allocation11 + $0xf44] ss:$16 sps:$4 sm:$0xff]   ;;  %v6451_v36 = vld [vmem:[#allocation11 + $0xf68] ss:$16 sps:$4 sm:$0xff]  }
 0x233   :  { %4655 = vmatprep.subr.bf16.mxu0 %v6396_v5  ;;  %4983 = vmatprep.subr.bf16.mxu1 %v6399_v7  ;;  %v6445_v5 = vld [vmem:[#allocation11 + $0xf48] ss:$16 sps:$4 sm:$0xff]  }
 0x234   :  { %v1098_v7 = vadd.f32 %v1090_v32, %v1072_v1 }
 0x236   :  { %4656 = vmatpush1.bf16.msra.mxu0 %v6394_v10  ;;  %4984 = vmatpush1.bf16.msra.mxu1 %v6397_v11  ;;  %v6450_v10 = vld [vmem:[#allocation11 + $0xf64] ss:$16 sps:$4 sm:$0xff]   ;;  %v6453_v11 = vld [vmem:[#allocation11 + $0xf6c] ss:$16 sps:$4 sm:$0xff]   ;;  %v1124_v15 = vadd.f32 %v1116_v13, %v1098_v7 }
 0x237   :  { %4657 = vmatprep.subr.bf16.mxu0 %v6402_v18  ;;  %4985 = vmatprep.subr.bf16.mxu1 %v6405_v19  ;;  %v6456_v18 = vld [vmem:[#allocation11 + $0xf84] ss:$16 sps:$4 sm:$0xff]   ;;  %v6459_v19 = vld [vmem:[#allocation11 + $0xf8c] ss:$16 sps:$4 sm:$0xff]  }
 0x23a   :  { %4658 = vmatpush1.bf16.msra.mxu0 %v6400_v21  ;;  %4986 = vmatpush1.bf16.msra.mxu1 %v6403_v20  ;;  %v6457_v21 = vld [vmem:[#allocation11 + $0xf88] ss:$16 sps:$4 sm:$0xff]   ;;  %v1134_v20 = vmul.f32 %v7085_v9, %v1124_v15  ;;  %v6474_v9 = vld [vmem:[#allocation11 + $0xfe4] ss:$16 sps:$4 sm:$0xff]  }
 0x23b   :  { %4659 = vmatprep.subr.bf16.mxu0 %v6408_v17  ;;  %4987 = vmatprep.subr.bf16.mxu1 %v6411_v25  ;;  %v6463_v17 = vld [vmem:[#allocation11 + $0xfa8] ss:$16 sps:$4 sm:$0xff]  }
 0x23c   :  { %v1144_v25 = vadd.f32 %v7087_v8, %v1134_v20 }
 0x23e   :  { %4660 = vmatpush1.bf16.msra.mxu0 %v6406_v28  ;;  %4988 = vmatpush1.bf16.msra.mxu1 %v6409_v26  ;;  %v6471_v28 = vld [vmem:[#allocation11 + $0xfcc] ss:$16 sps:$4 sm:$0xff]   ;;  %v6466_v26 = vld [vmem:[#allocation11 + $0xfc0] ss:$16 sps:$4 sm:$0xff]   ;;  %v1160_v41 = vmul.f32 0.3, %v1144_v25 }
 0x23f   :  { %4661 = vmatprep.subr.bf16.mxu0 %v6414_v47  ;;  %4989 = vmatprep.subr.bf16.mxu1 %v6417_v48  ;;  %v6477_v47 = vld [vmem:[#allocation11 + $0xfec] ss:$16 sps:$4 sm:$0xff]   ;;  %vm1152_vm15 = vcmp.ge.f32.partialorder %v1144_v25, 0.0  ;;  %v6472_v48 = vld [vmem:[#allocation11 + $0xfe0] ss:$16 sps:$4 sm:$0xff]  }
 0x242   :  { %4662 = vmatpush1.bf16.msra.mxu0 %v6412_v40  ;;  %4990 = vmatpush1.bf16.msra.mxu1 %v6415_v29  ;;  %v1168_v40 = vsel %vm1152_vm15, %v1144_v25, %v1160_v41  ;;  %v1728_v29 = vlaneseq }
 0x243   :  { %4663 = vmatprep.subr.bf16.mxu0 %v6420_v34  ;;  %4991 = vmatprep.subr.bf16.mxu1 %v6423_v39  ;;  %v5637_v8 = vpack.c.bf16 %v1168_v40, %v1168_v40  ;;  %v1726_v39 = vld [vmem:[#allocation13] sm:$0xf] }
 0x244   :  { %v1729_v22 = vshrl.u32 %v1728_v29, 7 }
 0x246   :  { %4664 = vmatpush1.bf16.msra.mxu0 %v6418_v46  ;;  %4992 = vmatpush1.bf16.msra.mxu1 %v6421_v50  ;;  %v1730_v30 = vsub.s32 0, %v1729_v22  ;;  %v1738_v34 = vsub.s32 2, %v1729_v22  ;;  %v1734_v38 = vsub.s32 1, %v1729_v22  ;;  %v1742_v46 = vsub.s32 3, %v1729_v22 }
 0x247   :  { %4665 = vmatprep.subr.bf16.mxu0 %v6426_v42  ;;  %4993 = vmatprep.subr.bf16.mxu1 %v6429_v43 }
 0x248   :  { %v1731_v50 = vrot.slane %v1726_v39, %v1730_v30  ;;  %v1739_v12 = vrot.slane %v1726_v39, %v1738_v34  ;;  %v1735_v37 = vrot.slane %v1726_v39, %v1734_v38  ;;  %v1743_v42 = vrot.slane %v1726_v39, %v1742_v46 }
 0x24a   :  { %4666 = vmatpush1.bf16.msra.mxu0 %v6424_v63  ;;  %4994 = vmatpush1.bf16.msra.mxu1 %v6427_v49 }
 0x24b   :  { %4667 = vmatprep.subr.bf16.mxu0 %v6432_v52  ;;  %4995 = vmatprep.subr.bf16.mxu1 %v6435_v53 }
 0x24e   :  { %4668 = vmatpush1.bf16.msra.mxu0 %v6430_v4  ;;  %4996 = vmatpush1.bf16.msra.mxu1 %v6433_v56 }
 0x24f   :  { %4669 = vmatprep.subr.bf16.mxu0 %v6438_v59  ;;  %4997 = vmatprep.subr.bf16.mxu1 %v6441_v60 }
 0x252   :  { %4670 = vmatpush1.bf16.msra.mxu0 %v6436_v23  ;;  %4998 = vmatpush1.bf16.msra.mxu1 %v6439_v0 }
 0x253   :  { %4671 = vmatprep.subr.bf16.mxu0 %v6444_v33  ;;  %4999 = vmatprep.subr.bf16.mxu1 %v6447_v3 }
 0x256   :  { %4672 = vmatpush1.bf16.msra.mxu0 %v6442_v27  ;;  %5000 = vmatpush1.bf16.msra.mxu1 %v6445_v5 }
 0x257   :  { %4673 = vmatprep.subr.bf16.mxu0 %v6450_v10  ;;  %5001 = vmatprep.subr.bf16.mxu1 %v6453_v11 }
 0x25a   :  { %4674 = vmatpush1.bf16.msra.mxu0 %v6448_v14  ;;  %5002 = vmatpush1.bf16.msra.mxu1 %v6451_v36 }
 0x25b   :  { %4675 = vmatprep.subr.bf16.mxu0 %v6456_v18  ;;  %5003 = vmatprep.subr.bf16.mxu1 %v6459_v19 }
 0x25e   :  { %4676 = vmatpush1.bf16.msra.mxu0 %v6454_v35  ;;  %5004 = vmatpush1.bf16.msra.mxu1 %v6457_v21 }
 0x25f   :  { %4677 = vmatprep.subr.bf16.mxu0 %v6462_v54  ;;  %5005 = vmatprep.subr.bf16.mxu1 %v6465_v6 }
 0x262   :  { %4678 = vmatpush1.bf16.msra.mxu0 %v6460_v16  ;;  %5006 = vmatpush1.bf16.msra.mxu1 %v6463_v17 }
 0x263   :  { %4679 = vmatprep.subr.bf16.mxu0 %v6468_v24  ;;  %5007 = vmatprep.subr.bf16.mxu1 %v6471_v28 }
 0x266   :  { %4680 = vmatpush1.bf16.msra.mxu0 %v6466_v26  ;;  %5008 = vmatpush1.bf16.msra.mxu1 %v6469_v45 }
 0x267   :  { %4681 = vmatprep.subr.bf16.mxu0 %v6474_v9  ;;  %5009 = vmatprep.subr.bf16.mxu1 %v6477_v47 }
 0x26a   :  { %4682 = vmatpush1.bf16.msra.mxu0 %v6472_v48  ;;  %5010 = vmatpush1.bf16.msra.mxu1 %v6475_v31 }
 0x26d   :  { %4684 = vmatmul.mubr.bf16.vlgmr.msra.gmra.mrb[0].mxu0 %v5637_v8  ;;  %5012 = vmatmul.mubr.bf16.vlgmr.msra.gmra.mrb[0].mxu1 %v5637_v8 }
 0x340   :  { %v4685_v43 = vpop.f32.mrb[0].mxu0  ;;  %v5013_v44 = vpop.f32.mrb[0].mxu1 }
 0x341   :  { %v5639_v63 = vadd.f32 %v4685_v43, %v1731_v50  ;;  %v5641_v49 = vadd.f32 %v5013_v44, %v1739_v12  ;;  %v4687_v51 = vpop.f32.mrb[1].mxu0  ;;  %v5015_v58 = vpop.f32.mrb[1].mxu1 }
 0x342   :  { %v5640_v52 = vadd.f32 %v4687_v51, %v1735_v37  ;;  %v5642_v53 = vadd.f32 %v5015_v58, %v1743_v42  ;;  %v4689_v55 = vpop.f32.mrb[2].mxu0  ;;  %v5017_v4 = vpop.f32.mrb[2].mxu1 }
 0x343   :  { %5020 = vst [vmem:[#allocation14] sm:$0xff] %v5639_v63  ;;  %5022 = vst [vmem:[#allocation14 + $0x10] sm:$0xff] %v5641_v49  ;;  %v4690_v56 = vpop.f32.mrb[3].mxu0  ;;  %v5018_v62 = vpop.f32.mrb[3].mxu1 }
 0x344   :  { %5021 = vst [vmem:[#allocation14 + $0x8] sm:$0xff] %v5640_v52  ;;  %5023 = vst [vmem:[#allocation14 + $0x18] sm:$0xff] %v5642_v53 }
 0x345   :  { %6585 = shalt.err (!%p6582_p9)
}
 0x346   :  { %s6586_s24 = scalar_lea.hbm %s7239_s6, 512 }
 0x347   :  { %p6587_p10 = scmp.ne.s32.totalorder %s7239_s6, %s6586_s24  ;;  %p6590_p11 = scmp.lt.u32.totalorder %s6586_s24, %s7239_s6 }
 0x349   :  { %p6592_p12 = pnand %p6590_p11, %p6587_p10 }
 0x34b   :  { %6595 = shalt.err (!%p6592_p12)
}
 0x34c   :  { %5033 = dma.vmem_to_hbm [thread:$0]  %s5031_s20, 512, %s7239_s6, [#allocation5]  }
 0x34d   :  { %6604 = dma.done.wait [#allocation5], 512  }
 0x34e   :  { %6605 = vsyncadd [#allocation5], 4294966784 }
 0x34f   :  { %5037 = vsyncpa [#allocation4], 1 }
 0x350   :  { %5038 = vsyncpa [#allocation12], 1 }
 0x351   :  { %5039 = vsyncpa [#allocation5], 1 }
 0x352   :  { %5040 = vsyncpa [#allocation6], 1 }
 0x353   :  { %5041 = vsyncpa [#allocation9], 1 }

</bundles_post_ra>
